<compile_context>
chip_gen: v6e
topology: v6e:2x2x1
jax: 0.10.0
libtpu: 0.0.40
codegen_flags: <defaults>
</compile_context>

<pallas_src>
import math

import jax
import jax.numpy as jnp
from jax import lax
from jax.experimental import pallas as pl
from jax.experimental.pallas import tpu as pltpu


def fourier_features_kernel(x_ref, w_ref, o_ref):
    half = w_ref.shape[0]
    # MXU matmul with f32 accumulation; contract the shared feature dims
    # (x: (TM, in), w: (half, in))  ==  x @ w.T with no transpose materialized.
    f = lax.dot_general(
        x_ref[...],
        w_ref[...],
        dimension_numbers=(((1,), (1,)), ((), ())),
        preferred_element_type=jnp.float32,
    )
    # Two direct stores instead of a concatenate: no extra vreg copy, and each
    # half is a lane-dense store when half is a multiple of 128.
    o_ref[:, :half] = jnp.cos(f).astype(o_ref.dtype)
    o_ref[:, half:] = jnp.sin(f).astype(o_ref.dtype)


def fourier_features(x: jax.Array, weight: jax.Array, *, block_rows: int = 512) -> jax.Array:
    """x: (B, in_features); weight: (half, in_features) = 2*pi * nn.Linear weight."""
    B, in_features = x.shape
    half, in_features_w = weight.shape
    assert in_features == in_features_w
    out_features = 2 * half

    # Batch tile: whole batch if small, else a sublane-aligned (multiple-of-8) tile.
    if B <= block_rows:
        tm = B
    else:
        tm = max(8, (block_rows // 8) * 8)
    grid = (pl.cdiv(B, tm),)

    # NOTE: for production sizes keep half a multiple of 128 so both output
    # halves are unmasked full-lane stores (lane-dense out_spec).
    return pl.pallas_call(
        fourier_features_kernel,
        out_shape=jax.ShapeDtypeStruct((B, out_features), x.dtype),
        grid_spec=pltpu.PrefetchScalarGridSpec(
            num_scalar_prefetch=0,
            grid=grid,
            in_specs=[
                # x: stream one batch tile per grid step (double-buffered).
                pl.BlockSpec((tm, in_features), lambda i: (i, 0)),
                # weight: constant index map -> DMA'd once, VMEM-resident.
                pl.BlockSpec((half, in_features), lambda i: (0, 0)),
            ],
            out_specs=pl.BlockSpec((tm, out_features), lambda i: (i, 0)),
        ),
        compiler_params=pltpu.CompilerParams(
            # Batch tiles are independent -> megacore-shardable on v7x.
            dimension_semantics=("parallel",),
        ),
    )(x, weight)


def fourier_features_ref(x: jax.Array, weight: jax.Array) -> jax.Array:
    f = jnp.dot(x, weight.T, preferred_element_type=jnp.float32).astype(x.dtype)
    return jnp.concatenate([jnp.cos(f), jnp.sin(f)], axis=-1)


if __name__ == "__main__":
    in_features = 32
    out_features = 256          # even; half = 128 -> lane-dense output stores
    half = out_features // 2
    B = 1024                    # 4 batch tiles of 256 rows -> pipelined grid

    key = jax.random.PRNGKey(0)
    kx, kw = jax.random.split(key)

    # Deterministic synthetic params: nn.Linear(in, half, bias=False)-shaped
    # weight, scaled by 2*pi as in the module's __init__.
    bound = 1.0 / math.sqrt(in_features)
    weight = jax.random.uniform(
        kw, (half, in_features), minval=-bound, maxval=bound, dtype=jnp.float32
    ) * (2.0 * math.pi)

    x = jax.random.normal(kx, (B, in_features), dtype=jnp.float32)

    out = fourier_features(x, weight, block_rows=256)
    out = jax.block_until_ready(out)

    ref = fourier_features_ref(x, weight)
    assert out.shape == (B, out_features), out.shape
    max_err = float(jnp.max(jnp.abs(out - ref)))
    assert jnp.allclose(out, ref, atol=3e-5, rtol=3e-5), max_err

    print("KERNEL_OK")
</pallas_src>

<mosaic_0001>
module attributes {stable_mosaic.version = 11 : i64} {
  func.func @fourier_features_kernel(%arg0: i32, %arg1: memref<256x32xf32, #tpu.memory_space<vmem>>, %arg2: memref<128x32xf32, #tpu.memory_space<vmem>>, %arg3: memref<256x256xf32, #tpu.memory_space<vmem>>) attributes {dimension_semantics = [#tpu.dimension_semantics<parallel>], iteration_bounds = array<i64: 4>, scalar_prefetch = 0 : i64, scratch_operands = 0 : i64, tpu.core_type = #tpu.core_type<tc>, window_params = [{transform_indices = @transform_0, window_bounds = array<i64: 256, 32>}, {pipeline_mode = #tpu.pipeline_mode<synchronous>, transform_indices = @transform_1, window_bounds = array<i64: 128, 32>}, {transform_indices = @transform_2, window_bounds = array<i64: 256, 256>}]} {
    %c0 = arith.constant 0 : index
    %c0_0 = arith.constant 0 : index
    %0 = vector.load %arg1[%c0, %c0_0] : memref<256x32xf32, #tpu.memory_space<vmem>>, vector<256x32xf32>
    %c0_1 = arith.constant 0 : index
    %c0_2 = arith.constant 0 : index
    %1 = vector.load %arg2[%c0_1, %c0_2] : memref<128x32xf32, #tpu.memory_space<vmem>>, vector<128x32xf32>
    %cst = arith.constant dense<0.000000e+00> : vector<256x128xf32>
    %2 = tpu.matmul %0, %1, %cst {dimension_numbers = #tpu.dot_dimension_numbers<[1], [1], [0], [0], [0, 0, 1, 0], [], []>} : vector<256x32xf32>, vector<128x32xf32>, vector<256x128xf32> -> vector<256x128xf32>
    %3 = math.cos %2 : vector<256x128xf32>
    %c0_3 = arith.constant 0 : index
    %c0_4 = arith.constant 0 : index
    %4 = vector.load %arg3[%c0_3, %c0_4] : memref<256x256xf32, #tpu.memory_space<vmem>>, vector<256x128xf32>
    tpu.vector_store %arg3[%c0_3, %c0_4], %3 {strides = array<i32>} : memref<256x256xf32, #tpu.memory_space<vmem>>, vector<256x128xf32>,
    %5 = math.sin %2 : vector<256x128xf32>
    %c0_5 = arith.constant 0 : index
    %c128 = arith.constant 128 : index
    %6 = vector.load %arg3[%c0_5, %c128] : memref<256x256xf32, #tpu.memory_space<vmem>>, vector<256x128xf32>
    tpu.vector_store %arg3[%c0_5, %c128], %5 {strides = array<i32>} : memref<256x256xf32, #tpu.memory_space<vmem>>, vector<256x128xf32>,
    return
  }
  func.func @transform_0(%arg0: i32) -> (i32, i32) {
    %c0_i32 = arith.constant 0 : i32
    %c0_i32_0 = arith.constant 0 : i32
    return %arg0, %c0_i32 : i32, i32
  }
  func.func @transform_1(%arg0: i32) -> (i32, i32) {
    %c0_i32 = arith.constant 0 : i32
    %c0_i32_0 = arith.constant 0 : i32
    %c0_i32_1 = arith.constant 0 : i32
    return %c0_i32, %c0_i32_0 : i32, i32
  }
  func.func @transform_2(%arg0: i32) -> (i32, i32) {
    %c0_i32 = arith.constant 0 : i32
    %c0_i32_0 = arith.constant 0 : i32
    return %arg0, %c0_i32 : i32, i32
  }
}

</mosaic_0001>

<bundles_post_ra>
// kernel: tpu_custom_call.1
= control target key start
LH: loop header
LB: loop body
LE: loop exit
PB: predicated region body
PF: predicated region fallthrough
CT: control target
= control target key end

     0   :  { %7 = vsyncpa [#allocation3], 0  ;;  %s11377_s0 = inlined_call_operand.vmem [shape: f32[1024,32], index: 0, kind: input, shape index: {}]   ;;  %s11378_s1 = inlined_call_operand.vmem [shape: f32[128,32], index: 1, kind: input, shape index: {}]   ;;  %s11379_s2 = inlined_call_operand.hbm [shape: f32[1024,256], index: 2, kind: output, shape index: {}]  }
   0x1   :  { %9 = vsyncpa [#allocation3 + $0x1], 0  ;;  %s8196_s9 = smov 0   ;;  %s8198_s10 = smov 0  }
   0x2   :  { %s8200_s11 = smov 0   ;;  %s8202_s12 = smov 0  }
   0x3 LB: > { %s8217_s13 = sadd.s32 4294967295, %s8170_s12   ;;  %s7328_s14 = sadd.s32 4294967294, %s8170_s12   ;;  %s8170_s12 = sphi %s8202_s12, %s11443_s12   ;;  %s8166_s11 = sphi %s8200_s11, %s11442_s11   ;;  %s8162_s10 = sphi %s8198_s10, %s11441_s10   ;;  %s8158_s9 = sphi %s8196_s9, %s11440_s9  }
   0x4   : > { %s8221_s15 = sadd.s32 1, %s8170_s12   ;;  %s69_s16 = sadd.s32 1, %s8166_s11 }
   0x5   : > { %s66_s17 = ssub.s32 %s8170_s12, %s8221_s15  ;;  %p79_p0 = scmp.ne.s32.totalorder %s8166_s11, %s8162_s10 }
   0x6   : > { %p67_p1 = scmp.eq.s32.totalorder %s66_s17, 0  ;;  %p80_p2 = scmp.eq.s32.totalorder %s8217_s13, 3 }
   0x7   : > { %p85_p3 = scmp.ne.s32.totalorder %s8162_s10, %s8158_s9  ;;  %p86_p4 = scmp.eq.s32.totalorder %s7328_s14, 3 }
   0x8   : > { %s8232_s18 = scalar_select %p67_p1, %s8166_s11, %s69_s16  }
   0x9   : > { %p8234_p5 = por %p80_p2, %p79_p0  ;;  %p8238_p6 = por %p86_p4, %p85_p3 }
   0xa   : > { %p7331_p7 = scmp.ge.s32.totalorder %s8170_s12, 1  ;;  %p116_p8 = scmp.lt.s32.totalorder %s8170_s12, 5 }
   0xc   : > { %p117_p9 = pnand %p7331_p7, %p116_p8 }
   0xd   : > { %s7333_s25 = sshll.u32 (!%p117_p9), %s8217_s13, 5  ;;  %s7646_s23 = sshll.u32 (!%p117_p9), %s8217_s13, 13 }
   0xe   : > { %120 = sbr.rel (%p117_p9) target bundleno = 1174 (0x496), region = 28  ;;  %p139_p10 = scmp.lt.s32.totalorder (!%p117_p9), %s7333_s25, 127 }
   0xf   : > { %s11328_s13 = scalar_lea.hbm (!%p117_p9), %s11379_s2, %s7646_s23  ;;  %s8178_s29 = smov (!%p117_p9), [#allocation2]  }
  0x10   : > { %s8114_s30 = sshll.u32 (!%p117_p9), %s8178_s29, 4  ;;  %s8115_s30 = int_to_ptr.vmem [resolvable:$false] %s8114_s30 }
  0x11   : > { %s8116_s4 = scalar_lea.vmem (!%p117_p9), %s8115_s30, 16384 }
  0x13   : > { %v192_v0 = vld [vmem:[%s11378_s1 + $0x78] sm:$0xff]  ;;  %vm193_vm0 = vcmask 261120   ;;  %v191_v1 = vld [vmem:[%s11378_s1 + $0x70] sm:$0xff]  ;;  %s11445_s25 = smov (!%p139_p10, %s7333_s25), 127  ;;  %v190_v2 = vld [vmem:[%s11378_s1 + $0x68] sm:$0xff] }
  0x14   : > { %7695 = vmatprep.subr.msk.mxu0 %vm193_vm0, %v192_v0  ;;  %7775 = vmatprep.subr.msk.mxu1 %vm193_vm0, %v192_v0  ;;  %s7334_s28 = sshll.u32 %s11445_s25, 3  ;;  %v189_v5 = vld [vmem:[%s11378_s1 + $0x60] sm:$0xff]  ;;  %v188_v6 = vld [vmem:[%s11378_s1 + $0x58] sm:$0xff]  ;;  %v187_v7 = vld [vmem:[%s11378_s1 + $0x50] sm:$0xff] }
  0x15   : > { %7696 = vmatpush3.xpose.msk.msra.mxu0 %vm193_vm0, %v192_v0  ;;  %7791 = vmatpush3.xpose.msk.msra.mxu1 %vm193_vm0, %v192_v0  ;;  %s8265_s3 = scalar_lea.vmem %s11377_s0, %s7334_s28  ;;  %v186_v8 = vld [vmem:[%s11378_s1 + $0x48] sm:$0xff]  ;;  %v185_v9 = vld [vmem:[%s11378_s1 + $0x40] sm:$0xff]  ;;  %v184_v10 = vld [vmem:[%s11378_s1 + $0x38] sm:$0xff] }
  0x16   : > { %7697 = vmatprep.subr.msk.mxu0 %vm193_vm0, %v191_v1  ;;  %7776 = vmatprep.subr.msk.mxu1 %vm193_vm0, %v191_v1  ;;  %v145_v3 = vld [vmem:[%s8265_s3] sm:$0xff]  ;;  %v183_v11 = vld [vmem:[%s11378_s1 + $0x30] sm:$0xff]  ;;  %v182_v12 = vld [vmem:[%s11378_s1 + $0x28] sm:$0xff] }
  0x17   : > { %v161_v4 = vld [vmem:[%s8265_s3 + $0x80] sm:$0xff]  ;;  %7727 = vmatprep.mubr.msk.f32.mxu0 %vm193_vm0, %v145_v3  ;;  %v180_v14 = vld [vmem:[%s11378_s1 + $0x18] sm:$0xff]  ;;  %v179_v15 = vld [vmem:[%s11378_s1 + $0x10] sm:$0xff] }
  0x18   : > { %7751 = vmatprep.mubr.msk.f32.mxu1 %vm193_vm0, %v161_v4  ;;  %v181_v13 = vld [vmem:[%s11378_s1 + $0x20] sm:$0xff]  ;;  %v178_v16 = vld [vmem:[%s11378_s1 + $0x8] sm:$0xff]  ;;  %v147_v20 = vld [vmem:[%s8265_s3 + $0x10] sm:$0xff] }
  0x19   : > { %7698 = vmatpush3.xpose.msk.msra.mxu0 %vm193_vm0, %v191_v1  ;;  %7792 = vmatpush3.xpose.msk.msra.mxu1 %vm193_vm0, %v191_v1  ;;  %v177_v17 = vld [vmem:[%s11378_s1] sm:$0xff]  ;;  %v146_v18 = vld [vmem:[%s8265_s3 + $0x8] sm:$0xff]  ;;  %v163_v21 = vld [vmem:[%s8265_s3 + $0x90] sm:$0xff] }
  0x1a   : > { %7699 = vmatprep.subr.msk.mxu0 %vm193_vm0, %v190_v2  ;;  %7777 = vmatprep.subr.msk.mxu1 %vm193_vm0, %v190_v2  ;;  %v162_v19 = vld [vmem:[%s8265_s3 + $0x88] sm:$0xff]  ;;  %v148_v22 = vld [vmem:[%s8265_s3 + $0x18] sm:$0xff]  ;;  %v149_v24 = vld [vmem:[%s8265_s3 + $0x20] sm:$0xff] }
  0x1b   : > { %v164_v23 = vld [vmem:[%s8265_s3 + $0x98] sm:$0xff]  ;;  %v165_v25 = vld [vmem:[%s8265_s3 + $0xa0] sm:$0xff]  ;;  %v150_v26 = vld [vmem:[%s8265_s3 + $0x28] sm:$0xff] }
  0x1c   : > { %v166_v27 = vld [vmem:[%s8265_s3 + $0xa8] sm:$0xff]  ;;  %v151_v28 = vld [vmem:[%s8265_s3 + $0x30] sm:$0xff]  ;;  %v152_v30 = vld [vmem:[%s8265_s3 + $0x38] sm:$0xff] }
  0x1d   : > { %7700 = vmatpush3.xpose.msk.msra.mxu0 %vm193_vm0, %v190_v2  ;;  %7793 = vmatpush3.xpose.msk.msra.mxu1 %vm193_vm0, %v190_v2  ;;  %v167_v29 = vld [vmem:[%s8265_s3 + $0xb0] sm:$0xff]  ;;  %v168_v31 = vld [vmem:[%s8265_s3 + $0xb8] sm:$0xff]  ;;  %v153_v32 = vld [vmem:[%s8265_s3 + $0x40] sm:$0xff] }
  0x1e   : > { %7701 = vmatprep.subr.msk.mxu0 %vm193_vm0, %v189_v5  ;;  %7778 = vmatprep.subr.msk.mxu1 %vm193_vm0, %v189_v5  ;;  %v169_v33 = vld [vmem:[%s8265_s3 + $0xc0] sm:$0xff]  ;;  %v154_v34 = vld [vmem:[%s8265_s3 + $0x48] sm:$0xff]  ;;  %v155_v36 = vld [vmem:[%s8265_s3 + $0x50] sm:$0xff] }
  0x1f   : > { %v170_v35 = vld [vmem:[%s8265_s3 + $0xc8] sm:$0xff]  ;;  %v171_v37 = vld [vmem:[%s8265_s3 + $0xd0] sm:$0xff]  ;;  %v156_v38 = vld [vmem:[%s8265_s3 + $0x58] sm:$0xff] }
  0x20   : > { %v172_v39 = vld [vmem:[%s8265_s3 + $0xd8] sm:$0xff]  ;;  %v157_v40 = vld [vmem:[%s8265_s3 + $0x60] sm:$0xff]  ;;  %v158_v42 = vld [vmem:[%s8265_s3 + $0x68] sm:$0xff] }
  0x21   : > { %7702 = vmatpush3.xpose.msk.msra.mxu0 %vm193_vm0, %v189_v5  ;;  %7794 = vmatpush3.xpose.msk.msra.mxu1 %vm193_vm0, %v189_v5  ;;  %v173_v41 = vld [vmem:[%s8265_s3 + $0xe0] sm:$0xff]  ;;  %v174_v43 = vld [vmem:[%s8265_s3 + $0xe8] sm:$0xff]  ;;  %v159_v44 = vld [vmem:[%s8265_s3 + $0x70] sm:$0xff] }
  0x22   : > { %7703 = vmatprep.subr.msk.mxu0 %vm193_vm0, %v188_v6  ;;  %7779 = vmatprep.subr.msk.mxu1 %vm193_vm0, %v188_v6  ;;  %v175_v45 = vld [vmem:[%s8265_s3 + $0xf0] sm:$0xff]  ;;  %v160_v46 = vld [vmem:[%s8265_s3 + $0x78] sm:$0xff] }
  0x23   : > { %v176_v47 = vld [vmem:[%s8265_s3 + $0xf8] sm:$0xff]  ;;  %s135_s3 = sand.u32 1, %s8162_s10  }
  0x24   : > { %s7332_s21 = sshll.u32 %s135_s3, 9  ;;  %s11337_s27 = scalar_lea.sflag [#allocation3], %s135_s3 }
  0x25   : > { %7704 = vmatpush3.xpose.msk.msra.mxu0 %vm193_vm0, %v188_v6  ;;  %7795 = vmatpush3.xpose.msk.msra.mxu1 %vm193_vm0, %v188_v6  ;;  %s8731_s22 = scalar_lea.vmem [#allocation2], %s7332_s21 }
  0x26   : > { %7705 = vmatprep.subr.msk.mxu0 %vm193_vm0, %v187_v7  ;;  %7780 = vmatprep.subr.msk.mxu1 %vm193_vm0, %v187_v7  ;;  %s7266_s24 = sshll.u32 %s8731_s22, 4  ;;  %s11330_s24 = int_to_ptr.vmem [resolvable:$true] %s7266_s24 }
  0x27   : > { %s8110_s28 = scalar_lea.vmem %s11330_s24, 8192  ;;  %p8117_p0 = scmp.lt.s32.totalorder %s11330_s24, %s8115_s30 }
  0x28   : > { %p8111_p11 = scmp.ne.s32.totalorder %s11330_s24, %s8110_s28  ;;  %p8118_p1 = scmp.lt.s32.totalorder %s8116_s4, %s8110_s28 }
  0x29   : > { %7706 = vmatpush3.xpose.msk.msra.mxu0 %vm193_vm0, %v187_v7  ;;  %7796 = vmatpush3.xpose.msk.msra.mxu1 %vm193_vm0, %v187_v7 }
  0x2a   : > { %7707 = vmatprep.subr.msk.mxu0 %vm193_vm0, %v186_v8  ;;  %7781 = vmatprep.subr.msk.mxu1 %vm193_vm0, %v186_v8  ;;  %p8112_p12 = pnand %p8111_p11, %p8234_p5  ;;  %p8119_p2 = por %p8118_p1, %p8117_p0 }
  0x2c   : > { %p8113_p13 = pneg %p8112_p12 }
  0x2d   : > { %7708 = vmatpush3.xpose.msk.msra.mxu0 %vm193_vm0, %v186_v8  ;;  %7797 = vmatpush3.xpose.msk.msra.mxu1 %vm193_vm0, %v186_v8 }
  0x2e   : > { %7709 = vmatprep.subr.msk.mxu0 %vm193_vm0, %v185_v9  ;;  %7782 = vmatprep.subr.msk.mxu1 %vm193_vm0, %v185_v9  ;;  %p8120_p3 = pnand %p8119_p2, %p8113_p13 }
  0x31   : > { %7710 = vmatpush3.xpose.msk.msra.mxu0 %vm193_vm0, %v185_v9  ;;  %7798 = vmatpush3.xpose.msk.msra.mxu1 %vm193_vm0, %v185_v9 }
  0x32   : > { %7711 = vmatprep.subr.msk.mxu0 %vm193_vm0, %v184_v10  ;;  %7783 = vmatprep.subr.msk.mxu1 %vm193_vm0, %v184_v10 }
  0x35   : > { %7712 = vmatpush3.xpose.msk.msra.mxu0 %vm193_vm0, %v184_v10  ;;  %7799 = vmatpush3.xpose.msk.msra.mxu1 %vm193_vm0, %v184_v10 }
  0x36   : > { %7713 = vmatprep.subr.msk.mxu0 %vm193_vm0, %v183_v11  ;;  %7784 = vmatprep.subr.msk.mxu1 %vm193_vm0, %v183_v11 }
  0x39   : > { %7714 = vmatpush3.xpose.msk.msra.mxu0 %vm193_vm0, %v183_v11  ;;  %7800 = vmatpush3.xpose.msk.msra.mxu1 %vm193_vm0, %v183_v11 }
  0x3a   : > { %7715 = vmatprep.subr.msk.mxu0 %vm193_vm0, %v182_v12  ;;  %7785 = vmatprep.subr.msk.mxu1 %vm193_vm0, %v182_v12 }
  0x3d   : > { %7716 = vmatpush3.xpose.msk.msra.mxu0 %vm193_vm0, %v182_v12  ;;  %7801 = vmatpush3.xpose.msk.msra.mxu1 %vm193_vm0, %v182_v12 }
  0x3e   : > { %7717 = vmatprep.subr.msk.mxu0 %vm193_vm0, %v181_v13  ;;  %7786 = vmatprep.subr.msk.mxu1 %vm193_vm0, %v181_v13 }
  0x41   : > { %7718 = vmatpush3.xpose.msk.msra.mxu0 %vm193_vm0, %v181_v13  ;;  %7802 = vmatpush3.xpose.msk.msra.mxu1 %vm193_vm0, %v181_v13  ;;  %v8172_v13 = vmov 683565275  }
  0x42   : > { %7719 = vmatprep.subr.msk.mxu0 %vm193_vm0, %v180_v14  ;;  %7787 = vmatprep.subr.msk.mxu1 %vm193_vm0, %v180_v14 }
  0x45   : > { %7720 = vmatpush3.xpose.msk.msra.mxu0 %vm193_vm0, %v180_v14  ;;  %7803 = vmatpush3.xpose.msk.msra.mxu1 %vm193_vm0, %v180_v14 }
  0x46   : > { %7721 = vmatprep.subr.msk.mxu0 %vm193_vm0, %v179_v15  ;;  %7788 = vmatprep.subr.msk.mxu1 %vm193_vm0, %v179_v15 }
  0x49   : > { %7722 = vmatpush3.xpose.msk.msra.mxu0 %vm193_vm0, %v179_v15  ;;  %7804 = vmatpush3.xpose.msk.msra.mxu1 %vm193_vm0, %v179_v15 }
  0x4a   : > { %7723 = vmatprep.subr.msk.mxu0 %vm193_vm0, %v178_v16  ;;  %7789 = vmatprep.subr.msk.mxu1 %vm193_vm0, %v178_v16 }
  0x4d   : > { %7724 = vmatpush3.xpose.msk.msra.mxu0 %vm193_vm0, %v178_v16  ;;  %7805 = vmatpush3.xpose.msk.msra.mxu1 %vm193_vm0, %v178_v16 }
  0x4e   : > { %7725 = vmatprep.subr.msk.mxu0 %vm193_vm0, %v177_v17  ;;  %7790 = vmatprep.subr.msk.mxu1 %vm193_vm0, %v177_v17 }
  0x51   : > { %7726 = vmatpush3.xpose.msk.msra.mxu0 %vm193_vm0, %v177_v17  ;;  %7806 = vmatpush3.xpose.msk.msra.mxu1 %vm193_vm0, %v177_v17  ;;  %v8173_v17 = vmov 2475754826  }
  0x54   : > { %7728 = vmatmul.mubr.msk.f32.vlgmr.msra.gmra.mxu0 %vm193_vm0, %v146_v18  ;;  %7752 = vmatmul.mubr.msk.f32.vlgmr.msra.gmra.mxu1 %vm193_vm0, %v162_v19  ;;  %v8174_v19 = vmov 2131351028  }
  0x55   : > { %7730 = vmatprep.mubr.msk.f32.mxu0 %vm193_vm0, %v147_v20  ;;  %7754 = vmatprep.mubr.msk.f32.mxu1 %vm193_vm0, %v163_v21  ;;  %v8175_v21 = vmov 2102212464  }
  0x58   : > { %7731 = vmatmul.mubr.msk.f32.gmra.mxu0 %vm193_vm0, %v148_v22  ;;  %7755 = vmatmul.mubr.msk.f32.gmra.mxu1 %vm193_vm0, %v164_v23  ;;  %v8176_v23 = vmov 920167782  }
  0x59   : > { %7733 = vmatprep.mubr.msk.f32.mxu0 %vm193_vm0, %v149_v24  ;;  %7757 = vmatprep.mubr.msk.f32.mxu1 %vm193_vm0, %v165_v25 }
  0x5c   : > { %7734 = vmatmul.mubr.msk.f32.gmra.mxu0 %vm193_vm0, %v150_v26  ;;  %7758 = vmatmul.mubr.msk.f32.gmra.mxu1 %vm193_vm0, %v166_v27 }
  0x5d   : > { %7736 = vmatprep.mubr.msk.f32.mxu0 %vm193_vm0, %v151_v28  ;;  %7760 = vmatprep.mubr.msk.f32.mxu1 %vm193_vm0, %v167_v29 }
  0x60   : > { %7737 = vmatmul.mubr.msk.f32.gmra.mxu0 %vm193_vm0, %v152_v30  ;;  %7761 = vmatmul.mubr.msk.f32.gmra.mxu1 %vm193_vm0, %v168_v31  ;;  %v8177_v30 = vmov 1326507024  }
  0x61   : > { %7739 = vmatprep.mubr.msk.f32.mxu0 %vm193_vm0, %v153_v32  ;;  %7763 = vmatprep.mubr.msk.f32.mxu1 %vm193_vm0, %v169_v33 }
  0x64   : > { %7740 = vmatmul.mubr.msk.f32.gmra.mxu0 %vm193_vm0, %v154_v34  ;;  %7764 = vmatmul.mubr.msk.f32.gmra.mxu1 %vm193_vm0, %v170_v35 }
  0x65   : > { %7742 = vmatprep.mubr.msk.f32.mxu0 %vm193_vm0, %v155_v36  ;;  %7766 = vmatprep.mubr.msk.f32.mxu1 %vm193_vm0, %v171_v37 }
  0x68   : > { %7743 = vmatmul.mubr.msk.f32.gmra.mxu0 %vm193_vm0, %v156_v38  ;;  %7767 = vmatmul.mubr.msk.f32.gmra.mxu1 %vm193_vm0, %v172_v39 }
  0x69   : > { %7745 = vmatprep.mubr.msk.f32.mxu0 %vm193_vm0, %v157_v40  ;;  %7769 = vmatprep.mubr.msk.f32.mxu1 %vm193_vm0, %v173_v41 }
  0x6c   : > { %7746 = vmatmul.mubr.msk.f32.gmra.mxu0 %vm193_vm0, %v158_v42  ;;  %7770 = vmatmul.mubr.msk.f32.gmra.mxu1 %vm193_vm0, %v174_v43 }
  0x6d   : > { %7748 = vmatprep.mubr.msk.f32.mxu0 %vm193_vm0, %v159_v44  ;;  %7772 = vmatprep.mubr.msk.f32.mxu1 %vm193_vm0, %v175_v45 }
  0x70   : > { %7749 = vmatmul.mubr.msk.f32.gmra.mxu0 %vm193_vm0, %v160_v46  ;;  %7773 = vmatmul.mubr.msk.f32.gmra.mxu1 %vm193_vm0, %v176_v47 }
 0x114   : > { %v8426_v48 = vpop.f32.mrf.mxu0  ;;  %v8428_v49 = vpop.f32.mrf.mxu1 }
 0x115   : > { %v666_v50 = vand.u32 2147483647, %v8426_v48  ;;  %v669_v51 = vand.u32 2139095040, %v8426_v48  ;;  %v2314_v52 = vand.u32 2147483647, %v8428_v49  ;;  %v2317_v53 = vand.u32 2139095040, %v8428_v49 }
 0x116   : > { %v8434_v54 = vpop.f32.mrf.mxu0  ;;  %vm668_vm14 = vcmp.lt.s32.totalorder %v8426_v48, 0 }
 0x117   : > { %v670_v55 = vshrl.u32 %v669_v51, 23  ;;  %v673_v56 = vand.u32 8388607, %v666_v50  ;;  %v2318_v57 = vshrl.u32 %v2317_v53, 23  ;;  %v2321_v58 = vand.u32 8388607, %v2314_v52 }
 0x118   : > { %v566_v59 = vand.u32 2139095040, %v8434_v54  ;;  %v563_v10 = vand.u32 2147483647, %v8434_v54 }
 0x119   : > { %v7387_v60 = vadd.s32 4294967169, %v670_v55  ;;  %v7451_v61 = vadd.s32 4294967169, %v2318_v57  ;;  %v674_v0 = vor.u32 8388608, %v673_v56  ;;  %v2322_v1 = vor.u32 8388608, %v2321_v58 }
 0x11a   : > { %v567_v62 = vshrl.u32 %v566_v59, 23 }
 0x11b   : > { %v676_v63 = vadd.s32 1, %v7387_v60  ;;  %v2324_v2 = vadd.s32 1, %v7451_v61  ;;  %v8441_v8 = vshll.u32 %v674_v0, 8  ;;  %v8443_v9 = vshll.u32 %v2322_v1, 8 }
 0x11c   : > { %v7383_v3 = vadd.s32 4294967169, %v567_v62 }
 0x11d   : > { %vm677_vm1 = vcmp.gt.s32.totalorder %v676_v63, 0  ;;  %vm2325_vm2 = vcmp.gt.s32.totalorder %v2324_v2, 0 }
 0x11e   : > { %v678_v4 = vsel %vm677_vm1, %v676_v63, 0  ;;  %v2326_v7 = vsel %vm2325_vm2, %v2324_v2, 0  ;;  %v8446_v11 = vadd.s32 1, %v7383_v3 }
 0x11f   : > { %v679_v5 = vshrl.u32 %v678_v4, 5  ;;  %v680_v6 = vand.u32 31, %v678_v4  ;;  %v8449_v15 = vshrl.u32 %v2326_v7, 5  ;;  %v2328_v16 = vand.u32 31, %v2326_v7 }
 0x120   : > { %vm574_vm7 = vcmp.gt.s32.totalorder %v8446_v11, 0 }
 0x121   : > { %v681_v12 = vsub.s32 32, %v680_v6  ;;  %v683_v14 = vshll.u32 %v8172_v13, %v680_v6  ;;  %v686_v18 = vshll.u32 %v8173_v17, %v680_v6  ;;  %v689_v20 = vshll.u32 %v8174_v19, %v680_v6 }
 0x122   : > { %v692_v22 = vshll.u32 %v8175_v21, %v680_v6  ;;  %v695_v24 = vshll.u32 %v8176_v23, %v680_v6  ;;  %vm698_vm3 = vcmp.lt.s32.totalorder %v679_v5, 1  ;;  %vm699_vm4 = vcmp.lt.s32.totalorder %v679_v5, 2 }
 0x123   : > { %v684_v25 = vshrl.u32 %v8173_v17, %v681_v12  ;;  %v687_v26 = vshrl.u32 %v8174_v19, %v681_v12  ;;  %v690_v27 = vshrl.u32 %v8175_v21, %v681_v12  ;;  %v682_v28 = vshrl.u32 %v8172_v13, %v681_v12 }
 0x124   : > { %v693_v29 = vshrl.u32 %v8176_v23, %v681_v12  ;;  %v696_v31 = vshrl.u32 %v8177_v30, %v681_v12  ;;  %v2329_v35 = vsub.s32 32, %v2328_v16  ;;  %vm700_vm5 = vcmp.lt.s32.totalorder %v679_v5, 3 }
 0x125   : > { %v685_v32 = vor.u32 %v684_v25, %v683_v14  ;;  %v688_v33 = vor.u32 %v687_v26, %v686_v18  ;;  %v691_v34 = vor.u32 %v690_v27, %v689_v20  ;;  %vm701_vm6 = vcmp.lt.s32.totalorder %v679_v5, 4 }
 0x126   : > { %v694_v36 = vor.u32 %v693_v29, %v692_v22  ;;  %v697_v37 = vor.u32 %v696_v31, %v695_v24  ;;  %v2331_v45 = vshll.u32 %v8172_v13, %v2328_v16  ;;  %v2332_v51 = vshrl.u32 %v8173_v17, %v2329_v35 }
 0x127   : > { %v702_v38 = vsel %vm698_vm3, %v682_v28, %v685_v32  ;;  %v703_v39 = vsel %vm701_vm6, %v691_v34, 2102212464  ;;  %v706_v40 = vsel %vm698_vm3, %v685_v32, %v688_v33  ;;  %v710_v41 = vsel %vm698_vm3, %v688_v33, %v691_v34 }
 0x128   : > { %v704_v42 = vsel %vm700_vm5, %v688_v33, %v703_v39  ;;  %v707_v43 = vsel %vm701_vm6, %v694_v36, 920167782  ;;  %v711_v44 = vsel %vm701_vm6, %v697_v37, 1326507024  ;;  %v2334_v53 = vshll.u32 %v8173_v17, %v2328_v16 }
 0x129   : > { %v708_v46 = vsel %vm700_vm5, %v691_v34, %v707_v43  ;;  %v712_v47 = vsel %vm700_vm5, %v694_v36, %v711_v44  ;;  %v705_v55 = vsel %vm699_vm4, %v702_v38, %v704_v42  ;;  %v2335_v58 = vshrl.u32 %v8174_v19, %v2329_v35  ;;  %v8510_v42 = vpop.f32.mrf.mxu1 }
 0x12a   : > { %v709_v56 = vsel %vm699_vm4, %v706_v40, %v708_v46  ;;  %v713_v57 = vsel %vm699_vm4, %v710_v41, %v712_v47  ;;  %v2333_v63 = vor.u32 %v2332_v51, %v2331_v45  ;;  %v2337_v1 = vshll.u32 %v8174_v19, %v2328_v16 }
 0x12b   : > { %v8473_v59 = vmul.u32.u64.low %v8441_v8, %v713_v57  ;;  %v8474_v60 = vmul.u32.u64.high %v8441_v8, %v713_v57, %v8473_v59  ;;  %v8477_v61 = vmul.u32.u64.low %v8441_v8, %v709_v56  ;;  %v8478_v62 = vmul.u32.u64.high %v8441_v8, %v709_v56, %v8477_v61 }
 0x12c   : > { %v2336_v0 = vor.u32 %v2335_v58, %v2334_v53  ;;  %v2338_v2 = vshrl.u32 %v8175_v21, %v2329_v35  ;;  %v2330_v3 = vshrl.u32 %v8172_v13, %v2329_v35  ;;  %v2340_v4 = vshll.u32 %v8175_v21, %v2328_v16 }
 0x12d   : > { %v2341_v5 = vshrl.u32 %v8176_v23, %v2329_v35  ;;  %v2344_v6 = vshrl.u32 %v8177_v30, %v2329_v35  ;;  %v721_v7 = vmul.u32 %v8441_v8, %v705_v55  ;;  %v2343_v14 = vshll.u32 %v8176_v23, %v2328_v16 }
 0x12e   : > { %v2339_v12 = vor.u32 %v2338_v2, %v2337_v1  ;;  %vm2346_vm8 = vcmp.lt.s32.totalorder %v8449_v15, 1  ;;  %vm723_vm9 = vc.u32 %v8474_v60, %v8477_v61  ;;  %v724_v18 = vadd.s32 1, %v8478_v62 }
 0x12f   : > { %v2342_v20 = vor.u32 %v2341_v5, %v2340_v4  ;;  %vm2347_vm10 = vcmp.lt.s32.totalorder %v8449_v15, 2  ;;  %v2345_v22 = vor.u32 %v2344_v6, %v2343_v14  ;;  %vm2348_vm11 = vcmp.lt.s32.totalorder %v8449_v15, 3 }
 0x130   : > { %vm2349_vm12 = vcmp.lt.s32.totalorder %v8449_v15, 4  ;;  %v2354_v24 = vsel %vm2346_vm8, %v2333_v63, %v2336_v0  ;;  %v725_v8 = vsel %vm723_vm9, %v724_v18, %v8478_v62  ;;  %v2358_v16 = vsel %vm2346_vm8, %v2336_v0, %v2339_v12 }
 0x131   : > { %v2351_v25 = vsel %vm2349_vm12, %v2339_v12, 2102212464  ;;  %v2355_v26 = vsel %vm2349_vm12, %v2342_v20, 920167782  ;;  %v726_v27 = vadd.s32 %v725_v8, %v721_v7  ;;  %v2350_v28 = vsel %vm2346_vm8, %v2330_v3, %v2333_v63 }
 0x132   : > { %v2356_v29 = vsel %vm2348_vm11, %v2339_v12, %v2355_v26  ;;  %v2359_v31 = vsel %vm2349_vm12, %v2345_v22, 1326507024  ;;  %v2352_v32 = vsel %vm2348_vm11, %v2336_v0, %v2351_v25  ;;  %v575_v35 = vsel %vm574_vm7, %v8446_v11, 0 }
 0x133   : > { %v2357_v33 = vsel %vm2347_vm10, %v2354_v24, %v2356_v29  ;;  %v2360_v34 = vsel %vm2348_vm11, %v2342_v20, %v2359_v31  ;;  %v727_v36 = vadd.s32 536870912, %v726_v27  ;;  %v2353_v44 = vsel %vm2347_vm10, %v2350_v28, %v2352_v32 }
 0x134   : > { %v2361_v37 = vsel %vm2347_vm10, %v2358_v16, %v2360_v34  ;;  %v8503_v38 = vmul.u32.u64.low %v8443_v9, %v2357_v33  ;;  %v8504_v39 = vmul.u32.u64.high %v8443_v9, %v2357_v33, %v8503_v38  ;;  %v570_v11 = vand.u32 8388607, %v563_v10 }
 0x135   : > { %v8507_v40 = vmul.u32.u64.low %v8443_v9, %v2361_v37  ;;  %v8508_v41 = vmul.u32.u64.high %v8443_v9, %v2361_v37, %v8507_v40  ;;  %v8512_v43 = vshrl.u32 %v727_v36, 30  ;;  %v577_v45 = vand.u32 31, %v575_v35 }
 0x136   : > { %v2372_v47 = vadd.s32 1, %v8504_v39  ;;  %v2214_v51 = vand.u32 2139095040, %v8510_v42  ;;  %v2369_v53 = vmul.u32 %v8443_v9, %v2353_v44  ;;  %v571_v57 = vor.u32 8388608, %v570_v11 }
 0x137   : > { %v729_v46 = vshll.u32 %v8512_v43, 30  ;;  %vm2371_vm13 = vc.u32 %v8508_v41, %v8503_v38  ;;  %v578_v58 = vsub.s32 32, %v577_v45  ;;  %v722_v0 = vadd.s32 %v8477_v61, %v8474_v60 }
 0x138   : > { %v2373_v56 = vsel %vm2371_vm13, %v2372_v47, %v8504_v39  ;;  %v2215_v62 = vshrl.u32 %v2214_v51, 23  ;;  %v8525_v2 = vshrl.u32 %v575_v35, 5  ;;  %v8527_v3 = vshll.u32 %v571_v57, 8 }
 0x139   : > { %v730_v55 = vsub.s32 %v726_v27, %v729_v46  ;;  %v2374_v15 = vadd.s32 %v2373_v56, %v2369_v53  ;;  %v581_v9 = vshrl.u32 %v8173_v17, %v578_v58  ;;  %v584_v5 = vshrl.u32 %v8174_v19, %v578_v58 }
 0x13a   : > { %v587_v6 = vshrl.u32 %v8175_v21, %v578_v58  ;;  %v589_v12 = vshll.u32 %v8175_v21, %v577_v45  ;;  %v590_v60 = vshrl.u32 %v8176_v23, %v578_v58  ;;  %v7447_v61 = vadd.s32 4294967169, %v2215_v62 }
 0x13b   : > { %v732_v59 = vsub.s32 0, %v730_v55  ;;  %v2375_v63 = vadd.s32 536870912, %v2374_v15  ;;  %v580_v18 = vshll.u32 %v8172_v13, %v577_v45  ;;  %v583_v20 = vshll.u32 %v8173_v17, %v577_v45 }
 0x13c   : > { %v586_v22 = vshll.u32 %v8174_v19, %v577_v45  ;;  %v591_v8 = vor.u32 %v590_v60, %v589_v12  ;;  %v593_v25 = vshrl.u32 %v8177_v30, %v578_v58  ;;  %vm598_vm15 = vcmp.lt.s32.totalorder %v8525_v2, 4 }
 0x13d   : > { %v7388_v1 = vmin.u32 %v732_v59, %v730_v55  ;;  %v8529_v4 = vshrl.u32 %v2375_v63, 30  ;;  %v582_v16 = vor.u32 %v581_v9, %v580_v18  ;;  %v585_v27 = vor.u32 %v584_v5, %v583_v20 }
 0x13e   : > { %v588_v28 = vor.u32 %v587_v6, %v586_v22  ;;  %v592_v29 = vshll.u32 %v8176_v23, %v577_v45  ;;  %vm595_vm1 = vcmp.lt.s32.totalorder %v8525_v2, 1  ;;  %v604_v31 = vsel %vm598_vm15, %v591_v8, 920167782 }
 0x13f   : > { %v734_v7 = vclz %v7388_v1  ;;  %v2377_v14 = vshll.u32 %v8529_v4, 30  ;;  %v752_v33 = vsub.s32 4, %v8512_v43  ;;  %vm596_vm2 = vcmp.lt.s32.totalorder %v8525_v2, 2 }
 0x140   : > { %v594_v37 = vor.u32 %v593_v25, %v592_v29  ;;  %vm597_vm3 = vcmp.lt.s32.totalorder %v8525_v2, 3  ;;  %vm8555_vm4 = vcmp.le.f32.partialorder %v666_v50, 0.7853982  ;;  %v2370_v40 = vadd.s32 %v8503_v38, %v8508_v41 }
 0x141   : > { %v7389_v24 = vadd.s32 4294967294, %v734_v7  ;;  %v8543_v26 = vsub.s32 %v2374_v15, %v2377_v14  ;;  %v603_v11 = vsel %vm595_vm1, %v582_v16, %v585_v27  ;;  %v605_v45 = vsel %vm597_vm3, %v588_v28, %v604_v31 }
 0x142   : > { %v600_v53 = vsel %vm598_vm15, %v588_v28, 2102212464  ;;  %v753_v50 = vsel %vm668_vm14, %v752_v33, %v8512_v43  ;;  %v579_v38 = vshrl.u32 %v8172_v13, %v578_v58  ;;  %v607_v41 = vsel %vm595_vm1, %v585_v27, %v588_v28 }
 0x143   : > { %vm7390_vm0 = vcmp.lt.s32.totalorder %v7389_v24, 0  ;;  %v2380_v34 = vsub.s32 0, %v8543_v26  ;;  %vm2316_vm5 = vcmp.lt.s32.totalorder %v8428_v49, 0  ;;  %v608_v59 = vsel %vm598_vm15, %v594_v37, 1326507024 }
 0x144   : > { %v737_v32 = vsel %vm7390_vm0, 0, %v7389_v24  ;;  %v2400_v63 = vsub.s32 4, %v8529_v4  ;;  %v599_v43 = vsel %vm595_vm1, %v579_v38, %v582_v16  ;;  %v601_v58 = vsel %vm597_vm3, %v585_v27, %v600_v53 }
 0x145   : > { %v738_v35 = vsub.s32 32, %v737_v32  ;;  %v742_v36 = vsub.s32 4294967266, %v737_v32  ;;  %v7452_v44 = vmin.u32 %v2380_v34, %v8543_v26  ;;  %v739_v46 = vshll.u32 %v730_v55, %v737_v32 }
 0x146   : > { %v606_v55 = vsel %vm596_vm2, %v603_v11, %v605_v45  ;;  %v609_v9 = vsel %vm597_vm3, %v591_v8, %v608_v59  ;;  %v2221_v5 = vadd.s32 1, %v7447_v61  ;;  %v602_v61 = vsel %vm596_vm2, %v599_v43, %v601_v58 }
 0x147   : > { %v740_v47 = vshrl.u32 %v722_v0, %v738_v35  ;;  %v743_v51 = vadd.s32 127, %v742_v36  ;;  %v2382_v56 = vclz %v7452_v44  ;;  %v610_v6 = vsel %vm596_vm2, %v607_v41, %v609_v9 }
 0x148   : > { %v8588_v7 = vmul.u32.u64.low %v8527_v3, %v606_v55  ;;  %v8589_v12 = vmul.u32.u64.high %v8527_v3, %v606_v55, %v8588_v7  ;;  %v8593_v18 = vmul.u32.u64.low %v8527_v3, %v610_v6  ;;  %v8594_v20 = vmul.u32.u64.high %v8527_v3, %v610_v6, %v8593_v18 }
 0x149   : > { %v741_v57 = vor.u32 %v740_v47, %v739_v46  ;;  %v744_v15 = vshll.u32 %v743_v51, 23  ;;  %v7453_v62 = vadd.s32 4294967294, %v2382_v56  ;;  %vm2222_vm7 = vcmp.gt.s32.totalorder %v2221_v5, 0 }
 0x14a   : > { %v755_v25 = vsel %vm8555_vm4, 0, %v753_v50  ;;  %v2211_v16 = vand.u32 2147483647, %v8510_v42  ;;  %v2223_v27 = vsel %vm2222_vm7, %v2221_v5, 0  ;;  %v621_v32 = vadd.s32 1, %v8589_v12 }
 0x14b   : > { %v745_v0 = vor.u32 4788187, %v744_v15  ;;  %v748_v1 = vcvt.s32.f32 %v741_v57  ;;  %vm7454_vm6 = vcmp.lt.s32.totalorder %v7453_v62, 0  ;;  %v618_v34 = vmul.u32 %v8527_v3, %v602_v61 }
 0x14c   : > { %v2385_v14 = vsel %vm7454_vm6, 0, %v7453_v62  ;;  %vm620_vm8 = vc.u32 %v8594_v20, %v8588_v7  ;;  %v2225_v2 = vand.u32 31, %v2223_v27  ;;  %v2401_v37 = vsel %vm2316_vm5, %v2400_v63, %v8529_v4 }
 0x14d   : > { %v746_v60 = vand.u32 2147483647, %v745_v0  ;;  %v2386_v22 = vsub.s32 32, %v2385_v14  ;;  %v2390_v24 = vsub.s32 4294967266, %v2385_v14  ;;  %v2387_v28 = vshll.u32 %v8543_v26, %v2385_v14 }
 0x14e   : > { %v622_v44 = vsel %vm620_vm8, %v621_v32, %v8589_v12  ;;  %v2218_v3 = vand.u32 8388607, %v2211_v16  ;;  %vm8619_vm9 = vcmp.le.f32.partialorder %v2314_v52, 0.7853982  ;;  %v2226_v47 = vsub.s32 32, %v2225_v2 }
 0x14f   : > { %v749_v8 = vmul.f32 %v748_v1, %v746_v60  ;;  %v2388_v29 = vshrl.u32 %v2370_v40, %v2386_v22  ;;  %v2391_v31 = vadd.s32 127, %v2390_v24  ;;  %v4088_v40 = vadd.s32 3, %v755_v25 }
 0x150   : > { %v623_v11 = vadd.s32 %v622_v44, %v618_v34  ;;  %v2403_v51 = vsel %vm8619_vm9, 0, %v2401_v37  ;;  %v8625_v38 = vand.u32 3, %v755_v25  ;;  %v2219_v57 = vor.u32 8388608, %v2218_v3 }
 0x151   : > { %v750_v33 = vxor.u32 2147483648, %v749_v8  ;;  %v2389_v35 = vor.u32 %v2388_v29, %v2387_v28  ;;  %v2392_v36 = vshll.u32 %v2391_v31, 23  ;;  %v8627_v39 = vand.u32 3, %v4088_v40 }
 0x152   : > { %v624_v53 = vadd.s32 536870912, %v623_v11  ;;  %v8629_v15 = vand.u32 3, %v2403_v51  ;;  %v2232_v55 = vshrl.u32 %v8174_v19, %v2226_v47  ;;  %v2238_v59 = vshrl.u32 %v8176_v23, %v2226_v47 }
 0x153   : > { %v751_v26 = vsel %vm668_vm14, %v750_v33, %v749_v8  ;;  %v2393_v4 = vor.u32 4788187, %v2392_v36  ;;  %v2396_v56 = vcvt.s32.f32 %v2389_v35  ;;  %v5752_v62 = vadd.s32 3, %v2403_v51 }
 0x154   : > { %v754_v45 = vsel %vm8555_vm4, %v8426_v48, %v751_v26  ;;  %v625_v41 = vshrl.u32 %v624_v53, 30  ;;  %vm565_vm10 = vcmp.lt.s32.totalorder %v8434_v54, 0  ;;  %v2235_v43 = vshrl.u32 %v8175_v21, %v2226_v47 }
 0x155   : > { %7982 = vcosq.f32 %v754_v45  ;;  %v2394_v50 = vand.u32 2147483647, %v2393_v4  ;;  %v2241_v58 = vshrl.u32 %v8177_v30, %v2226_v47  ;;  %v2229_v1 = vshrl.u32 %v8173_v17, %v2226_v47 }
 0x156   : > { %7984 = vsinq.f32 %v754_v45  ;;  %v626_v63 = vshll.u32 %v625_v41, 30  ;;  %v2231_v9 = vshll.u32 %v8173_v17, %v2225_v2  ;;  %v2237_v5 = vshll.u32 %v8175_v21, %v2225_v2 }
 0x157   : > { %v2397_v52 = vmul.f32 %v2396_v56, %v2394_v50  ;;  %v8641_v12 = vshrl.u32 %v2223_v27, 5  ;;  %v2234_v60 = vshll.u32 %v8174_v19, %v2225_v2  ;;  %v2240_v14 = vshll.u32 %v8176_v23, %v2225_v2 }
 0x158   : > { %v8639_v6 = vsub.s32 %v623_v11, %v626_v63  ;;  %vm764_vm11 = vcmp.eq.s32.totalorder %v8625_v38, 2  ;;  %vm4094_vm12 = vcmp.eq.s32.totalorder %v8627_v39, 2  ;;  %v2228_v22 = vshll.u32 %v8172_v13, %v2225_v2 }
 0x159   : > { %v2398_v0 = vxor.u32 2147483648, %v2397_v52  ;;  %v2233_v24 = vor.u32 %v2232_v55, %v2231_v9  ;;  %v2239_v61 = vor.u32 %v2238_v59, %v2237_v5  ;;  %vm761_vm13 = vcmp.eq.s32.totalorder %v8625_v38, 0  ;;  %v8709_v55 = vpop.f32.mrf.mxu0 }
 0x15a   : > { %vm4091_vm14 = vcmp.eq.s32.totalorder %v8627_v39, 0  ;;  %v629_v25 = vsub.s32 0, %v8639_v6  ;;  %v2236_v27 = vor.u32 %v2235_v43, %v2234_v60  ;;  %v2242_v28 = vor.u32 %v2241_v58, %v2240_v14 }
 0x15b   : > { %v2399_v18 = vsel %vm2316_vm5, %v2398_v0, %v2397_v52  ;;  %vm760_vm15 = vcmp.lt.s32.totalorder %v8625_v38, 2  ;;  %vm4090_vm0 = vcmp.lt.s32.totalorder %v8627_v39, 2  ;;  %v8658_v29 = vand.u32 3, %v5752_v62 }
 0x15c   : > { %v2402_v8 = vsel %vm8619_vm9, %v8428_v49, %v2399_v18  ;;  %v649_v31 = vsub.s32 4, %v625_v41  ;;  %v2230_v32 = vor.u32 %v2229_v1, %v2228_v22  ;;  %vm758_vm1 = vweird.f32 %v8426_v48 }
 0x15d   : > { %7986 = vcosq.f32 %v2402_v8  ;;  %v7384_v33 = vmin.u32 %v629_v25, %v8639_v6  ;;  %vm2246_vm2 = vcmp.lt.s32.totalorder %v8641_v12, 4  ;;  %v8663_v34 = vshll.u32 %v2219_v57, 8 }
 0x15e   : > { %7988 = vsinq.f32 %v2402_v8  ;;  %v619_v2 = vadd.s32 %v8588_v7, %v8594_v20  ;;  %v2227_v35 = vshrl.u32 %v8172_v13, %v2226_v47  ;;  %vm2243_vm3 = vcmp.lt.s32.totalorder %v8641_v12, 1 }
 0x15f   : > { %v2252_v36 = vsel %vm2246_vm2, %v2239_v61, 920167782  ;;  %v631_v37 = vclz %v7384_v33  ;;  %vm2245_vm4 = vcmp.lt.s32.totalorder %v8641_v12, 3  ;;  %v2255_v44 = vsel %vm2243_vm3, %v2233_v24, %v2236_v27 }
 0x160   : > { %v2256_v26 = vsel %vm2246_vm2, %v2242_v28, 1326507024  ;;  %vm8679_vm5 = vcmp.le.f32.partialorder %v563_v10, 0.7853982  ;;  %v650_v20 = vsel %vm565_vm10, %v649_v31, %v625_v41  ;;  %vm2244_vm6 = vcmp.lt.s32.totalorder %v8641_v12, 2 }
 0x161   : > { %v2251_v11 = vsel %vm2243_vm3, %v2230_v32, %v2233_v24  ;;  %v2257_v3 = vsel %vm2245_vm4, %v2239_v61, %v2256_v26  ;;  %v7385_v4 = vadd.s32 4294967294, %v631_v37  ;;  %v2253_v10 = vsel %vm2245_vm4, %v2236_v27, %v2252_v36 }
 0x162   : > { %v7983_v40 = vpop.eup %7982  ;;  %v2258_v47 = vsel %vm2244_vm6, %v2255_v44, %v2257_v3  ;;  %v2248_v53 = vsel %vm2246_vm2, %v2236_v27, 2102212464  ;;  %vm2412_vm7 = vcmp.eq.s32.totalorder %v8629_v15, 2  ;;  %v2247_v52 = vsel %vm2243_vm3, %v2227_v35, %v2230_v32 }
 0x163   : > { %v7985_v45 = vpop.eup %7984  ;;  %v765_v46 = vxor.u32 2147483648, %v7983_v40  ;;  %v8699_v50 = vmul.u32.u64.low %v8663_v34, %v2258_v47  ;;  %v8700_v56 = vmul.u32.u64.high %v8663_v34, %v2258_v47, %v8699_v50  ;;  %vm7386_vm8 = vcmp.lt.s32.totalorder %v7385_v4, 0 }
 0x164   : > { %v762_v51 = vxor.u32 2147483648, %v7985_v45  ;;  %vm2409_vm9 = vcmp.eq.s32.totalorder %v8629_v15, 0  ;;  %v634_v63 = vsel %vm7386_vm8, 0, %v7385_v4  ;;  %v2254_v43 = vsel %vm2244_vm6, %v2251_v11, %v2253_v10 }
 0x165   : > { %v766_v41 = vsel %vm764_vm11, %v765_v46, %v7985_v45  ;;  %v4096_v57 = vsel %vm4094_vm12, %v765_v46, %v7985_v45  ;;  %vm2408_vm11 = vcmp.lt.s32.totalorder %v8629_v15, 2  ;;  %v635_v1 = vsub.s32 32, %v634_v63 }
 0x166   : > { %v763_v59 = vsel %vm761_vm13, %v7983_v40, %v762_v51  ;;  %v4093_v62 = vsel %vm4091_vm14, %v7983_v40, %v762_v51  ;;  %v2249_v9 = vsel %vm2245_vm4, %v2233_v24, %v2248_v53  ;;  %vm2406_vm12 = vweird.f32 %v8428_v49 }
 0x167   : > { %v767_v58 = vsel %vm760_vm15, %v763_v59, %v766_v41  ;;  %v4097_v0 = vsel %vm4090_vm0, %v4093_v62, %v4096_v57  ;;  %v639_v14 = vsub.s32 4294967266, %v634_v63  ;;  %v875_v38 = vand.u32 2139095040, %v8709_v55 }
 0x168   : > { %v768_v5 = vsel %vm758_vm1, nan, %v767_v58  ;;  %v4098_v60 = vsel %vm758_vm1, nan, %v4097_v0  ;;  %v636_v39 = vshll.u32 %v8639_v6, %v634_v63  ;;  %v637_v18 = vshrl.u32 %v619_v2, %v635_v1 }
 0x169   : > { %3860 = vst [vmem:[%s8731_s22 + $0x10] sm:$0xff] %v768_v5  ;;  %7220 = vst [vmem:[%s8731_s22 + $0x18] sm:$0xff] %v4098_v60  ;;  %v8737_v22 = vmul.u32.u64.low %v8663_v34, %v2254_v43  ;;  %v8738_v24 = vmul.u32.u64.high %v8663_v34, %v2254_v43, %v8737_v22  ;;  %vm5754_vm13 = vcmp.lt.s32.totalorder %v8658_v29, 2  ;;  %v640_v48 = vadd.s32 127, %v639_v14  ;;  %v8777_v43 = vpop.f32.mrf.mxu1 }
 0x16a   : > { %v2250_v61 = vsel %vm2244_vm6, %v2247_v52, %v2249_v9  ;;  %v876_v8 = vshrl.u32 %v875_v38, 23  ;;  %v7987_v25 = vpop.eup %7986  ;;  %vm5755_vm14 = vcmp.eq.s32.totalorder %v8658_v29, 0  ;;  %vm5758_vm15 = vcmp.eq.s32.totalorder %v8658_v29, 2 }
 0x16b   : > { %v638_v27 = vor.u32 %v637_v18, %v636_v39  ;;  %v652_v6 = vsel %vm8679_vm5, 0, %v650_v20  ;;  %v7989_v28 = vpop.eup %7988  ;;  %v2413_v31 = vxor.u32 2147483648, %v7987_v25  ;;  %v641_v32 = vshll.u32 %v640_v48, 23 }
 0x16c   : > { %vm2268_vm0 = vc.u32 %v8700_v56, %v8737_v22  ;;  %v7395_v33 = vadd.s32 4294967169, %v876_v8  ;;  %v2410_v2 = vxor.u32 2147483648, %v7989_v28  ;;  %v2266_v12 = vmul.u32 %v8663_v34, %v2250_v61 }
 0x16d   : > { %v2269_v35 = vadd.s32 1, %v8738_v24  ;;  %v872_v36 = vand.u32 2147483647, %v8709_v55  ;;  %v2414_v37 = vsel %vm2412_vm7, %v2413_v31, %v7989_v28  ;;  %v5760_v44 = vsel %vm5758_vm15, %v2413_v31, %v7989_v28 }
 0x16e   : > { %v642_v26 = vor.u32 4788187, %v641_v32  ;;  %v882_v40 = vadd.s32 1, %v7395_v33  ;;  %v2411_v20 = vsel %vm2409_vm9, %v7987_v25, %v2410_v2  ;;  %v5757_v11 = vsel %vm5755_vm14, %v7987_v25, %v2410_v2 }
 0x16f   : > { %v645_v3 = vcvt.s32.f32 %v638_v27  ;;  %v2270_v34 = vsel %vm2268_vm0, %v2269_v35, %v8738_v24  ;;  %v2415_v45 = vsel %vm2408_vm11, %v2411_v20, %v2414_v37  ;;  %v5761_v46 = vsel %vm5754_vm13, %v5757_v11, %v5760_v44 }
 0x170   : > { %v643_v4 = vand.u32 2147483647, %v642_v26  ;;  %v2271_v10 = vadd.s32 %v2270_v34, %v2266_v12  ;;  %v2416_v47 = vsel %vm2406_vm12, nan, %v2415_v45  ;;  %v5762_v51 = vsel %vm2406_vm12, nan, %v5761_v46 }
 0x171   : > { %vm883_vm1 = vcmp.gt.s32.totalorder %v882_v40, 0  ;;  %3876 = vst [vmem:[%s8731_s22 + $0x110] sm:$0xff] %v2416_v47  ;;  %7236 = vst [vmem:[%s8731_s22 + $0x118] sm:$0xff] %v5762_v51  ;;  %v3984_v57 = vadd.s32 3, %v652_v6  ;;  %v879_v15 = vand.u32 8388607, %v872_v36  ;;  %v2267_v35 = vadd.s32 %v8737_v22, %v8700_v56 }
 0x172   : > { %v646_v53 = vmul.f32 %v645_v3, %v643_v4  ;;  %v2272_v50 = vadd.s32 536870912, %v2271_v10  ;;  %v884_v41 = vsel %vm883_vm1, %v882_v40, 0  ;;  %v8782_v0 = vand.u32 3, %v652_v6 }
 0x173   : > { %v886_v29 = vand.u32 31, %v884_v41  ;;  %v8784_v1 = vand.u32 3, %v3984_v57  ;;  %v880_v9 = vor.u32 8388608, %v879_v15  ;;  %v8790_v38 = vshrl.u32 %v884_v41, 5 }
 0x174   : > { %v647_v52 = vxor.u32 2147483648, %v646_v53  ;;  %v8772_v59 = vshrl.u32 %v2272_v50, 30  ;;  %v2523_v7 = vand.u32 2139095040, %v8777_v43  ;;  %vm658_vm6 = vcmp.eq.s32.totalorder %v8782_v0, 0 }
 0x175   : > { %v887_v62 = vsub.s32 32, %v886_v29  ;;  %v889_v24 = vshll.u32 %v8172_v13, %v886_v29  ;;  %v892_v48 = vshll.u32 %v8173_v17, %v886_v29  ;;  %v895_v61 = vshll.u32 %v8174_v19, %v886_v29 }
 0x176   : > { %v648_v63 = vsel %vm565_vm10, %v647_v52, %v646_v53  ;;  %v2274_v49 = vshll.u32 %v8772_v59, 30  ;;  %v898_v8 = vshll.u32 %v8175_v21, %v886_v29  ;;  %v901_v27 = vshll.u32 %v8176_v23, %v886_v29 }
 0x177   : > { %v651_v58 = vsel %vm8679_vm5, %v8434_v54, %v648_v63  ;;  %v890_v60 = vshrl.u32 %v8173_v17, %v887_v62  ;;  %v893_v14 = vshrl.u32 %v8174_v19, %v887_v62  ;;  %v896_v39 = vshrl.u32 %v8175_v21, %v887_v62 }
 0x178   : > { %7990 = vcosq.f32 %v651_v58  ;;  %v8786_v5 = vsub.s32 %v2271_v10, %v2274_v49  ;;  %v899_v25 = vshrl.u32 %v8176_v23, %v887_v62  ;;  %v902_v6 = vshrl.u32 %v8177_v30, %v887_v62 }
 0x179   : > { %7992 = vsinq.f32 %v651_v58  ;;  %v891_v31 = vor.u32 %v890_v60, %v889_v24  ;;  %v894_v32 = vor.u32 %v893_v14, %v892_v48  ;;  %v897_v33 = vor.u32 %v896_v39, %v895_v61 }
 0x17a   : > { %v2277_v18 = vsub.s32 0, %v8786_v5  ;;  %v900_v2 = vor.u32 %v899_v25, %v898_v8  ;;  %v903_v12 = vor.u32 %v902_v6, %v901_v27  ;;  %v8805_v44 = vshll.u32 %v880_v9, 8 }
 0x17b   : > { %v2524_v26 = vshrl.u32 %v2523_v7, 23  ;;  %vm661_vm10 = vcmp.eq.s32.totalorder %v8782_v0, 2  ;;  %vm3990_vm2 = vcmp.eq.s32.totalorder %v8784_v1, 2  ;;  %v888_v40 = vshrl.u32 %v8172_v13, %v887_v62 }
 0x17c   : > { %v7448_v28 = vmin.u32 %v2277_v18, %v8786_v5  ;;  %vm904_vm3 = vcmp.lt.s32.totalorder %v8790_v38, 1  ;;  %vm905_vm4 = vcmp.lt.s32.totalorder %v8790_v38, 2  ;;  %vm907_vm5 = vcmp.lt.s32.totalorder %v8790_v38, 4 }
 0x17d   : > { %vm3987_vm7 = vcmp.eq.s32.totalorder %v8784_v1, 0  ;;  %vm2213_vm8 = vcmp.lt.s32.totalorder %v8510_v42, 0  ;;  %vm906_vm9 = vcmp.lt.s32.totalorder %v8790_v38, 3  ;;  %v912_v22 = vsel %vm904_vm3, %v891_v31, %v894_v32 }
 0x17e   : > { %v2279_v37 = vclz %v7448_v28  ;;  %v913_v20 = vsel %vm907_vm5, %v900_v2, 920167782  ;;  %vm657_vm11 = vcmp.lt.s32.totalorder %v8782_v0, 2  ;;  %vm3986_vm12 = vcmp.lt.s32.totalorder %v8784_v1, 2 }
 0x17f   : > { %v909_v11 = vsel %vm907_vm5, %v897_v33, 2102212464  ;;  %v914_v3 = vsel %vm906_vm9, %v897_v33, %v913_v20  ;;  %v916_v34 = vsel %vm904_vm3, %v894_v32, %v897_v33  ;;  %v917_v45 = vsel %vm907_vm5, %v903_v12, 1326507024  ;;  %v8875_v12 = vpop.f32.mrf.mxu0 }
 0x180   : > { %v7449_v56 = vadd.s32 4294967294, %v2279_v37  ;;  %vm655_vm13 = vweird.f32 %v8434_v54  ;;  %v908_v46 = vsel %vm904_vm3, %v888_v40, %v891_v31  ;;  %v915_v4 = vsel %vm905_vm4, %v912_v22, %v914_v3 }
 0x181   : > { %v918_v10 = vsel %vm906_vm9, %v900_v2, %v917_v45  ;;  %v8835_v53 = vmul.u32.u64.low %v8805_v44, %v915_v4  ;;  %v8836_v50 = vmul.u32.u64.high %v8805_v44, %v915_v4, %v8835_v53  ;;  %vm8841_vm15 = vcmp.le.f32.partialorder %v2211_v16, 0.7853982 }
 0x182   : > { %vm7450_vm14 = vcmp.lt.s32.totalorder %v7449_v56, 0  ;;  %v919_v51 = vsel %vm905_vm4, %v916_v34, %v918_v10  ;;  %v910_v29 = vsel %vm906_vm9, %v894_v32, %v909_v11  ;;  %v7459_v52 = vadd.s32 4294967169, %v2524_v26 }
 0x183   : > { %v2282_v47 = vsel %vm7450_vm14, 0, %v7449_v56  ;;  %v2297_v63 = vsub.s32 4, %v8772_v59  ;;  %v8849_v49 = vmul.u32.u64.low %v8805_v44, %v919_v51  ;;  %v8850_v58 = vmul.u32.u64.high %v8805_v44, %v919_v51, %v8849_v49 }
 0x184   : > { %v2283_v57 = vsub.s32 32, %v2282_v47  ;;  %v2287_v15 = vsub.s32 4294967266, %v2282_v47  ;;  %v2520_v9 = vand.u32 2147483647, %v8777_v43  ;;  %v2284_v14 = vshll.u32 %v8786_v5, %v2282_v47 }
 0x185   : > { %v7991_v62 = vpop.eup %7990  ;;  %v911_v24 = vsel %vm905_vm4, %v908_v46, %v910_v29  ;;  %v930_v48 = vadd.s32 1, %v8836_v50  ;;  %v2530_v61 = vadd.s32 1, %v7459_v52  ;;  %v2298_v28 = vsel %vm2213_vm8, %v2297_v63, %v8772_v59 }
 0x186   : > { %v7993_v60 = vpop.eup %7992  ;;  %v662_v16 = vxor.u32 2147483648, %v7991_v62  ;;  %v2285_v39 = vshrl.u32 %v2267_v35, %v2283_v57  ;;  %v2288_v7 = vadd.s32 127, %v2287_v15  ;;  %vm929_vm0 = vc.u32 %v8850_v58, %v8835_v53 }
 0x187   : > { %v659_v18 = vxor.u32 2147483648, %v7993_v60  ;;  %v927_v2 = vmul.u32 %v8805_v44, %v911_v24  ;;  %v931_v37 = vsel %vm929_vm0, %v930_v48, %v8836_v50  ;;  %vm2531_vm1 = vcmp.gt.s32.totalorder %v2530_v61, 0 }
 0x188   : > { %v663_v8 = vsel %vm661_vm10, %v662_v16, %v7993_v60  ;;  %v3992_v25 = vsel %vm3990_vm2, %v662_v16, %v7993_v60  ;;  %v2286_v27 = vor.u32 %v2285_v39, %v2284_v14  ;;  %v2289_v6 = vshll.u32 %v2288_v7, 23 }
 0x189   : > { %v660_v5 = vsel %vm658_vm6, %v7991_v62, %v659_v18  ;;  %v3989_v38 = vsel %vm3987_vm7, %v7991_v62, %v659_v18  ;;  %v932_v1 = vadd.s32 %v931_v37, %v927_v2  ;;  %v2532_v40 = vsel %vm2531_vm1, %v2530_v61, 0 }
 0x18a   : > { %v664_v31 = vsel %vm657_vm11, %v660_v5, %v663_v8  ;;  %v3993_v32 = vsel %vm3986_vm12, %v3989_v38, %v3992_v25  ;;  %v2290_v33 = vor.u32 4788187, %v2289_v6  ;;  %v2293_v26 = vcvt.s32.f32 %v2286_v27 }
 0x18b   : > { %v665_v35 = vsel %vm655_vm13, nan, %v664_v31  ;;  %v3994_v59 = vsel %vm655_vm13, nan, %v3993_v32  ;;  %v2300_v44 = vsel %vm8841_vm15, 0, %v2298_v28  ;;  %v2534_v56 = vand.u32 31, %v2532_v40 }
 0x18c   : > { %3859 = vst [vmem:[%s8731_s22] sm:$0xff] %v665_v35  ;;  %7219 = vst [vmem:[%s8731_s22 + $0x8] sm:$0xff] %v3994_v59  ;;  %v2291_v0 = vand.u32 2147483647, %v2290_v33  ;;  %v772_v22 = vand.u32 2139095040, %v8875_v12  ;;  %v933_v11 = vadd.s32 536870912, %v932_v1  ;;  %v5648_v34 = vadd.s32 3, %v2300_v44 }
 0x18d   : > { %v2535_v3 = vsub.s32 32, %v2534_v56  ;;  %v2527_v46 = vand.u32 8388607, %v2520_v9  ;;  %v2537_v4 = vshll.u32 %v8172_v13, %v2534_v56  ;;  %v2533_v62 = vshrl.u32 %v2532_v40, 5 }
 0x18e   : > { %v2294_v20 = vmul.f32 %v2293_v26, %v2291_v0  ;;  %v8887_v45 = vshrl.u32 %v933_v11, 30  ;;  %v773_v51 = vshrl.u32 %v772_v22, 23  ;;  %v2540_v63 = vshll.u32 %v8173_v17, %v2534_v56 }
 0x18f   : > { %v2538_v10 = vshrl.u32 %v8173_v17, %v2535_v3  ;;  %v2541_v47 = vshrl.u32 %v8174_v19, %v2535_v3  ;;  %v2544_v15 = vshrl.u32 %v8175_v21, %v2535_v3  ;;  %v2547_v29 = vshrl.u32 %v8176_v23, %v2535_v3 }
 0x190   : > { %v2295_v54 = vxor.u32 2147483648, %v2294_v20  ;;  %v935_v57 = vshll.u32 %v8887_v45, 30  ;;  %v2546_v49 = vshll.u32 %v8175_v21, %v2534_v56  ;;  %v2543_v14 = vshll.u32 %v8174_v19, %v2534_v56 }
 0x191   : > { %v2539_v16 = vor.u32 %v2538_v10, %v2537_v4  ;;  %v2542_v39 = vor.u32 %v2541_v47, %v2540_v63  ;;  %v2550_v18 = vshrl.u32 %v8177_v30, %v2535_v3  ;;  %v2549_v48 = vshll.u32 %v8176_v23, %v2534_v56 }
 0x192   : > { %v2296_v50 = vsel %vm2213_vm8, %v2295_v54, %v2294_v20  ;;  %v8904_v60 = vsub.s32 %v932_v1, %v935_v57  ;;  %v2548_v7 = vor.u32 %v2547_v29, %v2546_v49  ;;  %v2545_v41 = vor.u32 %v2544_v15, %v2543_v14 }
 0x193   : > { %v2299_v52 = vsel %vm8841_vm15, %v8510_v42, %v2296_v50  ;;  %v8910_v61 = vand.u32 3, %v2300_v44  ;;  %v8912_v8 = vand.u32 3, %v5648_v34  ;;  %v2528_v25 = vor.u32 8388608, %v2527_v46 }
 0x194   : > { %7994 = vcosq.f32 %v2299_v52  ;;  %v938_v24 = vsub.s32 0, %v8904_v60  ;;  %v769_v27 = vand.u32 2147483647, %v8875_v12  ;;  %v2551_v5 = vor.u32 %v2550_v18, %v2549_v48 }
 0x195   : > { %7996 = vsinq.f32 %v2299_v52  ;;  %vm2552_vm10 = vcmp.lt.s32.totalorder %v2533_v62, 1  ;;  %vm2555_vm2 = vcmp.lt.s32.totalorder %v2533_v62, 4  ;;  %vm2554_vm3 = vcmp.lt.s32.totalorder %v2533_v62, 3 }
 0x196   : > { %v7396_v6 = vmin.u32 %v938_v24, %v8904_v60  ;;  %v2560_v38 = vsel %vm2552_vm10, %v2539_v16, %v2542_v39  ;;  %v2561_v28 = vsel %vm2555_vm2, %v2548_v7, 920167782  ;;  %v7391_v31 = vadd.s32 4294967169, %v773_v51 }
 0x197   : > { %v2536_v33 = vshrl.u32 %v8172_v13, %v2535_v3  ;;  %v2557_v2 = vsel %vm2555_vm2, %v2545_v41, 2102212464  ;;  %v2562_v35 = vsel %vm2554_vm3, %v2545_v41, %v2561_v28  ;;  %vm2309_vm4 = vcmp.eq.s32.totalorder %v8910_v61, 2 }
 0x198   : > { %v940_v32 = vclz %v7396_v6  ;;  %vm2553_vm5 = vcmp.lt.s32.totalorder %v2533_v62, 2  ;;  %v2564_v59 = vsel %vm2552_vm10, %v2542_v39, %v2545_v41  ;;  %v2568_v37 = vshll.u32 %v2528_v25, 8 }
 0x199   : > { %vm2306_vm6 = vcmp.eq.s32.totalorder %v8910_v61, 0  ;;  %v2556_v26 = vsel %vm2552_vm10, %v2536_v33, %v2539_v16  ;;  %v2563_v1 = vsel %vm2553_vm5, %v2560_v38, %v2562_v35  ;;  %v2565_v40 = vsel %vm2555_vm2, %v2551_v5, 1326507024 }
 0x19a   : > { %v7397_v0 = vadd.s32 4294967294, %v940_v32  ;;  %vm2305_vm7 = vcmp.lt.s32.totalorder %v8910_v61, 2  ;;  %vm5650_vm8 = vcmp.lt.s32.totalorder %v8912_v8, 2  ;;  %v2558_v44 = vsel %vm2554_vm3, %v2542_v39, %v2557_v2 }
 0x19b   : > { %v2566_v56 = vsel %vm2554_vm3, %v2548_v7, %v2565_v40  ;;  %v8931_v22 = vmul.u32.u64.low %v2568_v37, %v2563_v1  ;;  %v8932_v20 = vmul.u32.u64.high %v2568_v37, %v2563_v1, %v8931_v22  ;;  %vm2303_vm9 = vweird.f32 %v8510_v42 }
 0x19c   : > { %vm5651_vm11 = vcmp.eq.s32.totalorder %v8912_v8, 0  ;;  %vm7398_vm12 = vcmp.lt.s32.totalorder %v7397_v0, 0  ;;  %v2567_v11 = vsel %vm2553_vm5, %v2564_v59, %v2566_v56  ;;  %v779_v3 = vadd.s32 1, %v7391_v31 }
 0x19d   : > { %v928_v54 = vadd.s32 %v8835_v53, %v8850_v58  ;;  %v943_v34 = vsel %vm7398_vm12, 0, %v7397_v0  ;;  %v8940_v46 = vmul.u32.u64.low %v2568_v37, %v2567_v11  ;;  %v8941_v4 = vmul.u32.u64.high %v2568_v37, %v2567_v11, %v8940_v46 }
 0x19e   : > { %v944_v10 = vsub.s32 32, %v943_v34  ;;  %v948_v47 = vsub.s32 4294967266, %v943_v34  ;;  %v2559_v51 = vsel %vm2553_vm5, %v2556_v26, %v2558_v44  ;;  %vm780_vm13 = vcmp.gt.s32.totalorder %v779_v3, 0 }
 0x19f   : > { %vm5654_vm14 = vcmp.eq.s32.totalorder %v8912_v8, 2  ;;  %v958_v57 = vsub.s32 4, %v8887_v45  ;;  %v2578_v15 = vadd.s32 1, %v8932_v20  ;;  %v781_v29 = vsel %vm780_vm13, %v779_v3, 0 }
 0x1a0   : > { %v945_v53 = vshll.u32 %v8904_v60, %v943_v34  ;;  %v946_v58 = vshrl.u32 %v928_v54, %v944_v10  ;;  %v949_v49 = vadd.s32 127, %v948_v47  ;;  %v2575_v14 = vmul.u32 %v2568_v37, %v2559_v51  ;;  %v8994_v51 = vpop.f32.mrf.mxu1 }
 0x1a1   : > { %v7995_v50 = vpop.eup %7994  ;;  %vm2577_vm15 = vc.u32 %v8941_v4, %v8931_v22  ;;  %v783_v62 = vand.u32 31, %v781_v29  ;;  %vm874_vm0 = vcmp.lt.s32.totalorder %v8709_v55, 0  ;;  %vm8973_vm1 = vcmp.le.f32.partialorder %v872_v36, 0.7853982 }
 0x1a2   : > { %v7997_v52 = vpop.eup %7996  ;;  %v2310_v63 = vxor.u32 2147483648, %v7995_v50  ;;  %v947_v18 = vor.u32 %v946_v58, %v945_v53  ;;  %v950_v24 = vshll.u32 %v949_v49, 23  ;;  %v2579_v48 = vsel %vm2577_vm15, %v2578_v15, %v8932_v20 }
 0x1a3   : > { %v2307_v16 = vxor.u32 2147483648, %v7997_v52  ;;  %v784_v25 = vsub.s32 32, %v783_v62  ;;  %v959_v32 = vsel %vm874_vm0, %v958_v57, %v8887_v45  ;;  %v2580_v33 = vadd.s32 %v2579_v48, %v2575_v14 }
 0x1a4   : > { %v2311_v39 = vsel %vm2309_vm4, %v2310_v63, %v7997_v52  ;;  %v5656_v7 = vsel %vm5654_vm14, %v2310_v63, %v7997_v52  ;;  %v951_v38 = vor.u32 4788187, %v950_v24  ;;  %v954_v2 = vcvt.s32.f32 %v947_v18 }
 0x1a5   : > { %v2308_v41 = vsel %vm2306_vm6, %v7995_v50, %v2307_v16  ;;  %v5653_v60 = vsel %vm5651_vm11, %v7995_v50, %v2307_v16  ;;  %v2581_v35 = vadd.s32 536870912, %v2580_v33  ;;  %v776_v42 = vand.u32 8388607, %v769_v27 }
 0x1a6   : > { %v2312_v6 = vsel %vm2305_vm7, %v2308_v41, %v2311_v39  ;;  %v5657_v5 = vsel %vm5650_vm8, %v5653_v60, %v5656_v7  ;;  %v952_v8 = vand.u32 2147483647, %v951_v38  ;;  %v787_v59 = vshrl.u32 %v8173_v17, %v784_v25 }
 0x1a7   : > { %v2313_v28 = vsel %vm2303_vm9, nan, %v2312_v6  ;;  %v5658_v31 = vsel %vm2303_vm9, nan, %v5657_v5  ;;  %v790_v37 = vshrl.u32 %v8174_v19, %v784_v25  ;;  %v961_v0 = vsel %vm8973_vm1, 0, %v959_v32 }
 0x1a8   : > { %3875 = vst [vmem:[%s8731_s22 + $0x100] sm:$0xff] %v2313_v28  ;;  %7235 = vst [vmem:[%s8731_s22 + $0x108] sm:$0xff] %v5658_v31  ;;  %v955_v45 = vmul.f32 %v954_v2, %v952_v8  ;;  %v793_v26 = vshrl.u32 %v8175_v21, %v784_v25  ;;  %v796_v36 = vshrl.u32 %v8176_v23, %v784_v25  ;;  %v8985_v1 = vshrl.u32 %v2581_v35, 30 }
 0x1a9   : > { %v786_v40 = vshll.u32 %v8172_v13, %v783_v62  ;;  %v789_v44 = vshll.u32 %v8173_v17, %v783_v62  ;;  %v792_v56 = vshll.u32 %v8174_v19, %v783_v62  ;;  %v795_v11 = vshll.u32 %v8175_v21, %v783_v62 }
 0x1aa   : > { %v956_v20 = vxor.u32 2147483648, %v955_v45  ;;  %v798_v3 = vshll.u32 %v8176_v23, %v783_v62  ;;  %v799_v54 = vshrl.u32 %v8177_v30, %v784_v25  ;;  %v2583_v34 = vshll.u32 %v8985_v1, 30 }
 0x1ab   : > { %v782_v46 = vshrl.u32 %v781_v29, 5  ;;  %v788_v10 = vor.u32 %v787_v59, %v786_v40  ;;  %v791_v47 = vor.u32 %v790_v37, %v789_v44  ;;  %v794_v57 = vor.u32 %v793_v26, %v792_v56 }
 0x1ac   : > { %v957_v50 = vsel %vm874_vm0, %v956_v20, %v955_v45  ;;  %v797_v15 = vor.u32 %v796_v36, %v795_v11  ;;  %v800_v52 = vor.u32 %v799_v54, %v798_v3  ;;  %v9001_v53 = vsub.s32 %v2580_v33, %v2583_v34 }
 0x1ad   : > { %v960_v63 = vsel %vm8973_vm1, %v8709_v55, %v957_v50  ;;  %v777_v58 = vor.u32 8388608, %v776_v42  ;;  %v9003_v49 = vand.u32 3, %v961_v0  ;;  %v4296_v29 = vadd.s32 3, %v961_v0 }
 0x1ae   : > { %7998 = vcosq.f32 %v960_v63  ;;  %v2420_v16 = vand.u32 2139095040, %v8994_v51  ;;  %v2586_v14 = vsub.s32 0, %v9001_v53  ;;  %vm801_vm10 = vcmp.lt.s32.totalorder %v782_v46, 1 }
 0x1af   : > { %8000 = vsinq.f32 %v960_v63  ;;  %vm804_vm2 = vcmp.lt.s32.totalorder %v782_v46, 4  ;;  %v809_v62 = vsel %vm801_vm10, %v788_v10, %v791_v47  ;;  %v813_v7 = vsel %vm801_vm10, %v791_v47, %v794_v57 }
 0x1b0   : > { %v810_v39 = vsel %vm804_vm2, %v797_v15, 920167782  ;;  %v814_v18 = vsel %vm804_vm2, %v800_v52, 1326507024  ;;  %v7460_v24 = vmin.u32 %v2586_v14, %v9001_v53  ;;  %vm803_vm3 = vcmp.lt.s32.totalorder %v782_v46, 3 }
 0x1b1   : > { %v806_v41 = vsel %vm804_vm2, %v794_v57, 2102212464  ;;  %v817_v60 = vshll.u32 %v777_v58, 8  ;;  %v785_v48 = vshrl.u32 %v8172_v13, %v784_v25  ;;  %vm802_vm4 = vcmp.lt.s32.totalorder %v782_v46, 2 }
 0x1b2   : > { %v811_v6 = vsel %vm803_vm3, %v794_v57, %v810_v39  ;;  %v815_v5 = vsel %vm803_vm3, %v797_v15, %v814_v18  ;;  %v2588_v38 = vclz %v7460_v24  ;;  %v2421_v32 = vshrl.u32 %v2420_v16, 23 }
 0x1b3   : > { %v812_v28 = vsel %vm802_vm4, %v809_v62, %v811_v6  ;;  %v816_v31 = vsel %vm802_vm4, %v813_v7, %v815_v5  ;;  %v4297_v33 = vand.u32 3, %v4296_v29  ;;  %v2606_v61 = vsub.s32 4, %v8985_v1 }
 0x1b4   : > { %v805_v8 = vsel %vm801_vm10, %v785_v48, %v788_v10  ;;  %v807_v2 = vsel %vm803_vm3, %v791_v47, %v806_v41  ;;  %vm9017_vm5 = vcmp.le.f32.partialorder %v2520_v9, 0.7853982  ;;  %v7461_v25 = vadd.s32 4294967294, %v2588_v38 }
 0x1b5   : > { %v9021_v42 = vmul.u32.u64.low %v817_v60, %v816_v31  ;;  %v9022_v59 = vmul.u32.u64.high %v817_v60, %v816_v31, %v9021_v42  ;;  %v7455_v37 = vadd.s32 4294967169, %v2421_v32  ;;  %vm2522_vm6 = vcmp.lt.s32.totalorder %v8777_v43, 0 }
 0x1b6   : > { %v9025_v45 = vmul.u32.u64.low %v817_v60, %v812_v28  ;;  %v9026_v0 = vmul.u32.u64.high %v817_v60, %v812_v28, %v9025_v45  ;;  %v2417_v26 = vand.u32 2147483647, %v8994_v51  ;;  %vm966_vm7 = vcmp.lt.s32.totalorder %v9003_v49, 2  ;;  %v9060_v28 = vpop.f32.mrf.mxu0 }
 0x1b7   : > { %vm7462_vm8 = vcmp.lt.s32.totalorder %v7461_v25, 0  ;;  %v808_v9 = vsel %vm802_vm4, %v805_v8, %v807_v2  ;;  %v2427_v36 = vadd.s32 1, %v7455_v37  ;;  %vm964_vm9 = vweird.f32 %v8709_v55 }
 0x1b8   : > { %vm967_vm11 = vcmp.eq.s32.totalorder %v9003_v49, 0  ;;  %vm970_vm12 = vcmp.eq.s32.totalorder %v9003_v49, 2  ;;  %vm4298_vm13 = vcmp.lt.s32.totalorder %v4297_v33, 2  ;;  %v2591_v40 = vsel %vm7462_vm8, 0, %v7461_v25 }
 0x1b9   : > { %v2576_v44 = vadd.s32 %v8931_v22, %v8941_v4  ;;  %v2592_v56 = vsub.s32 32, %v2591_v40  ;;  %v2596_v20 = vsub.s32 4294967266, %v2591_v40  ;;  %v2607_v11 = vsel %vm2522_vm6, %v2606_v61, %v8985_v1 }
 0x1ba   : > { %v824_v3 = vmul.u32 %v817_v60, %v808_v9  ;;  %vm826_vm14 = vc.u32 %v9022_v59, %v9025_v45  ;;  %v827_v54 = vadd.s32 1, %v9026_v0  ;;  %vm2428_vm15 = vcmp.gt.s32.totalorder %v2427_v36, 0 }
 0x1bb   : > { %v7999_v34 = vpop.eup %7998  ;;  %v2593_v46 = vshll.u32 %v9001_v53, %v2591_v40  ;;  %v2594_v10 = vshrl.u32 %v2576_v44, %v2592_v56  ;;  %v2597_v47 = vadd.s32 127, %v2596_v20  ;;  %v2429_v50 = vsel %vm2428_vm15, %v2427_v36, 0 }
 0x1bc   : > { %v8001_v22 = vpop.eup %8000  ;;  %v971_v4 = vxor.u32 2147483648, %v7999_v34  ;;  %vm4302_vm0 = vcmp.eq.s32.totalorder %v4297_v33, 2  ;;  %v828_v57 = vsel %vm826_vm14, %v827_v54, %v9026_v0  ;;  %v2431_v15 = vand.u32 31, %v2429_v50 }
 0x1bd   : > { %v968_v1 = vxor.u32 2147483648, %v8001_v22  ;;  %v2595_v52 = vor.u32 %v2594_v10, %v2593_v46  ;;  %v2598_v63 = vshll.u32 %v2597_v47, 23  ;;  %v829_v58 = vadd.s32 %v828_v57, %v824_v3 }
 0x1be   : > { %v972_v29 = vsel %vm970_vm12, %v971_v4, %v8001_v22  ;;  %vm4299_vm1 = vcmp.eq.s32.totalorder %v4297_v33, 0  ;;  %v4304_v16 = vsel %vm4302_vm0, %v971_v4, %v8001_v22  ;;  %v2609_v53 = vsel %vm9017_vm5, 0, %v2607_v11 }
 0x1bf   : > { %v969_v14 = vsel %vm967_vm11, %v7999_v34, %v968_v1  ;;  %v4301_v62 = vsel %vm4299_vm1, %v7999_v34, %v968_v1  ;;  %v2599_v39 = vor.u32 4788187, %v2598_v63  ;;  %v2432_v7 = vsub.s32 32, %v2431_v15 }
 0x1c0   : > { %v973_v18 = vsel %vm966_vm7, %v969_v14, %v972_v29  ;;  %v4305_v24 = vsel %vm4298_vm13, %v4301_v62, %v4304_v16  ;;  %v830_v41 = vadd.s32 536870912, %v829_v58  ;;  %v2424_v60 = vand.u32 8388607, %v2417_v26 }
 0x1c1   : > { %v974_v48 = vsel %vm964_vm9, nan, %v973_v18  ;;  %v4306_v6 = vsel %vm964_vm9, nan, %v4305_v24  ;;  %v2600_v5 = vand.u32 2147483647, %v2599_v39  ;;  %v2602_v38 = vcvt.s32.f32 %v2595_v52 }
 0x1c2   : > { %3862 = vst [vmem:[%s8731_s22 + $0x30] sm:$0xff] %v974_v48  ;;  %7222 = vst [vmem:[%s8731_s22 + $0x38] sm:$0xff] %v4306_v6  ;;  %v5960_v49 = vadd.s32 3, %v2609_v53  ;;  %v9064_v31 = vshrl.u32 %v830_v41, 30  ;;  %v2435_v33 = vshrl.u32 %v8173_v17, %v2432_v7  ;;  %v2438_v61 = vshrl.u32 %v8174_v19, %v2432_v7 }
 0x1c3   : > { %v2603_v32 = vmul.f32 %v2602_v38, %v2600_v5  ;;  %v2441_v8 = vshrl.u32 %v8175_v21, %v2432_v7  ;;  %v2425_v55 = vor.u32 8388608, %v2424_v60  ;;  %v2444_v25 = vshrl.u32 %v8176_v23, %v2432_v7 }
 0x1c4   : > { %v832_v2 = vshll.u32 %v9064_v31, 30  ;;  %v1081_v42 = vand.u32 2139095040, %v9060_v28  ;;  %v2434_v0 = vshll.u32 %v8172_v13, %v2431_v15  ;;  %v2437_v9 = vshll.u32 %v8173_v17, %v2431_v15 }
 0x1c5   : > { %v2604_v37 = vxor.u32 2147483648, %v2603_v32  ;;  %v2440_v36 = vshll.u32 %v8174_v19, %v2431_v15  ;;  %v2430_v44 = vshrl.u32 %v2429_v50, 5  ;;  %v2443_v56 = vshll.u32 %v8175_v21, %v2431_v15 }
 0x1c6   : > { %v9075_v40 = vsub.s32 %v829_v58, %v832_v2  ;;  %v2447_v20 = vshrl.u32 %v8177_v30, %v2432_v7  ;;  %v2436_v3 = vor.u32 %v2435_v33, %v2434_v0  ;;  %v2439_v54 = vor.u32 %v2438_v61, %v2437_v9 }
 0x1c7   : > { %v2605_v11 = vsel %vm2522_vm6, %v2604_v37, %v2603_v32  ;;  %v2442_v34 = vor.u32 %v2441_v8, %v2440_v36  ;;  %v2445_v47 = vor.u32 %v2444_v25, %v2443_v56  ;;  %v2446_v22 = vshll.u32 %v8176_v23, %v2431_v15 }
 0x1c8   : > { %v2608_v46 = vsel %vm9017_vm5, %v8777_v43, %v2605_v11  ;;  %v835_v10 = vsub.s32 0, %v9075_v40  ;;  %v9086_v50 = vand.u32 3, %v2609_v53  ;;  %v9088_v4 = vand.u32 3, %v5960_v49 }
 0x1c9   : > { %8002 = vcosq.f32 %v2608_v46  ;;  %v2448_v1 = vor.u32 %v2447_v20, %v2446_v22  ;;  %v2465_v52 = vshll.u32 %v2425_v55, 8  ;;  %v2433_v63 = vshrl.u32 %v8172_v13, %v2432_v7 }
 0x1ca   : > { %8004 = vsinq.f32 %v2608_v46  ;;  %v7392_v57 = vmin.u32 %v835_v10, %v9075_v40  ;;  %vm2449_vm10 = vcmp.lt.s32.totalorder %v2430_v44, 1  ;;  %vm2452_vm2 = vcmp.lt.s32.totalorder %v2430_v44, 4 }
 0x1cb   : > { %v1082_v35 = vshrl.u32 %v1081_v42, 23  ;;  %vm771_vm3 = vcmp.lt.s32.totalorder %v8875_v12, 0  ;;  %v2454_v29 = vsel %vm2452_vm2, %v2442_v34, 2102212464  ;;  %v2457_v15 = vsel %vm2449_vm10, %v2436_v3, %v2439_v54 }
 0x1cc   : > { %v837_v58 = vclz %v7392_v57  ;;  %v2458_v16 = vsel %vm2452_vm2, %v2445_v47, 920167782  ;;  %v825_v53 = vadd.s32 %v9025_v45, %v9022_v59  ;;  %vm2450_vm4 = vcmp.lt.s32.totalorder %v2430_v44, 2 }
 0x1cd   : > { %vm2451_vm5 = vcmp.lt.s32.totalorder %v2430_v44, 3  ;;  %v2461_v14 = vsel %vm2449_vm10, %v2439_v54, %v2442_v34  ;;  %v2453_v39 = vsel %vm2449_vm10, %v2433_v63, %v2436_v3  ;;  %v2462_v24 = vsel %vm2452_vm2, %v2448_v1, 1326507024 }
 0x1ce   : > { %v7393_v62 = vadd.s32 4294967294, %v837_v58  ;;  %v2459_v18 = vsel %vm2451_vm5, %v2442_v34, %v2458_v16  ;;  %vm9097_vm6 = vcmp.le.f32.partialorder %v769_v27, 0.7853982  ;;  %v2455_v41 = vsel %vm2451_vm5, %v2439_v54, %v2454_v29 }
 0x1cf   : > { %v2460_v60 = vsel %vm2450_vm4, %v2457_v15, %v2459_v18  ;;  %v2463_v48 = vsel %vm2451_vm5, %v2445_v47, %v2462_v24  ;;  %v7403_v6 = vadd.s32 4294967169, %v1082_v35  ;;  %vm2615_vm8 = vcmp.eq.s32.totalorder %v9086_v50, 0 }
 0x1d0   : > { %vm7394_vm7 = vcmp.lt.s32.totalorder %v7393_v62, 0  ;;  %v2464_v59 = vsel %vm2450_vm4, %v2461_v14, %v2463_v48  ;;  %v9103_v45 = vmul.u32.u64.low %v2465_v52, %v2460_v60  ;;  %v9104_v5 = vmul.u32.u64.high %v2465_v52, %v2460_v60, %v9103_v45 }
 0x1d1   : > { %v840_v38 = vsel %vm7394_vm7, 0, %v7393_v62  ;;  %v855_v27 = vsub.s32 4, %v9064_v31  ;;  %v9109_v49 = vmul.u32.u64.low %v2465_v52, %v2464_v59  ;;  %v9110_v32 = vmul.u32.u64.high %v2465_v52, %v2464_v59, %v9109_v49  ;;  %v9144_v62 = vpop.f32.mrf.mxu1 }
 0x1d2   : > { %vm2614_vm9 = vcmp.lt.s32.totalorder %v9086_v50, 2  ;;  %v841_v33 = vsub.s32 32, %v840_v38  ;;  %v845_v61 = vsub.s32 4294967266, %v840_v38  ;;  %v2456_v8 = vsel %vm2450_vm4, %v2453_v39, %v2455_v41 }
 0x1d3   : > { %v1088_v2 = vadd.s32 1, %v7403_v6  ;;  %vm2618_vm11 = vcmp.eq.s32.totalorder %v9086_v50, 2  ;;  %vm5962_vm12 = vcmp.lt.s32.totalorder %v9088_v4, 2  ;;  %v842_v55 = vshll.u32 %v9075_v40, %v840_v38 }
 0x1d4   : > { %v1078_v25 = vand.u32 2147483647, %v9060_v28  ;;  %v843_v42 = vshrl.u32 %v825_v53, %v841_v33  ;;  %v846_v37 = vadd.s32 127, %v845_v61  ;;  %v2475_v0 = vadd.s32 1, %v9104_v5 }
 0x1d5   : > { %vm1089_vm13 = vcmp.gt.s32.totalorder %v1088_v2, 0  ;;  %v856_v9 = vsel %vm771_vm3, %v855_v27, %v9064_v31  ;;  %v2472_v36 = vmul.u32 %v2465_v52, %v2456_v8  ;;  %vm2474_vm14 = vc.u32 %v9110_v32, %v9103_v45 }
 0x1d6   : > { %v1090_v44 = vsel %vm1089_vm13, %v1088_v2, 0  ;;  %v8003_v56 = vpop.eup %8002  ;;  %vm5963_vm15 = vcmp.eq.s32.totalorder %v9088_v4, 0  ;;  %v844_v40 = vor.u32 %v843_v42, %v842_v55  ;;  %v847_v20 = vshll.u32 %v846_v37, 23 }
 0x1d7   : > { %v2476_v11 = vsel %vm2474_vm14, %v2475_v0, %v9104_v5  ;;  %v8005_v3 = vpop.eup %8004  ;;  %v2619_v54 = vxor.u32 2147483648, %v8003_v56  ;;  %vm5966_vm0 = vcmp.eq.s32.totalorder %v9088_v4, 2  ;;  %v1092_v46 = vand.u32 31, %v1090_v44 }
 0x1d8   : > { %v2477_v34 = vadd.s32 %v2476_v11, %v2472_v36  ;;  %v2616_v10 = vxor.u32 2147483648, %v8005_v3  ;;  %v848_v31 = vor.u32 4788187, %v847_v20  ;;  %v858_v47 = vsel %vm9097_vm6, 0, %v856_v9 }
 0x1d9   : > { %v1085_v22 = vand.u32 8388607, %v1078_v25  ;;  %v2620_v57 = vsel %vm2618_vm11, %v2619_v54, %v8005_v3  ;;  %v5968_v1 = vsel %vm5966_vm0, %v2619_v54, %v8005_v3  ;;  %v1093_v63 = vsub.s32 32, %v1092_v46 }
 0x1da   : > { %v2478_v52 = vadd.s32 536870912, %v2477_v34  ;;  %v2617_v35 = vsel %vm2615_vm8, %v8003_v56, %v2616_v10  ;;  %v5965_v58 = vsel %vm5963_vm15, %v8003_v56, %v2616_v10  ;;  %v849_v29 = vand.u32 2147483647, %v848_v31 }
 0x1db   : > { %v851_v15 = vcvt.s32.f32 %v844_v40  ;;  %vm2612_vm1 = vweird.f32 %v8777_v43  ;;  %v2621_v16 = vsel %vm2614_vm9, %v2617_v35, %v2620_v57  ;;  %v5969_v53 = vsel %vm5962_vm12, %v5965_v58, %v5968_v1 }
 0x1dc   : > { %v9142_v14 = vshrl.u32 %v2478_v52, 30  ;;  %v2622_v39 = vsel %vm2612_vm1, nan, %v2621_v16  ;;  %v5970_v18 = vsel %vm2612_vm1, nan, %v5969_v53  ;;  %v4192_v41 = vadd.s32 3, %v858_v47 }
 0x1dd   : > { %v852_v24 = vmul.f32 %v851_v15, %v849_v29  ;;  %3878 = vst [vmem:[%s8731_s22 + $0x130] sm:$0xff] %v2622_v39  ;;  %7238 = vst [vmem:[%s8731_s22 + $0x138] sm:$0xff] %v5970_v18  ;;  %v1096_v43 = vshrl.u32 %v8173_v17, %v1093_v63  ;;  %v1086_v50 = vor.u32 8388608, %v1085_v22  ;;  %v1102_v6 = vshrl.u32 %v8175_v21, %v1093_v63 }
 0x1de   : > { %v2480_v60 = vshll.u32 %v9142_v14, 30  ;;  %v2729_v4 = vand.u32 2139095040, %v9144_v62  ;;  %v1091_v5 = vshrl.u32 %v1090_v44, 5  ;;  %v1095_v38 = vshll.u32 %v8172_v13, %v1092_v46 }
 0x1df   : > { %v853_v48 = vxor.u32 2147483648, %v852_v24  ;;  %v1099_v27 = vshrl.u32 %v8174_v19, %v1093_v63  ;;  %v1098_v33 = vshll.u32 %v8173_v17, %v1092_v46  ;;  %v1101_v61 = vshll.u32 %v8174_v19, %v1092_v46 }
 0x1e0   : > { %v9152_v59 = vsub.s32 %v2477_v34, %v2480_v60  ;;  %v1105_v8 = vshrl.u32 %v8176_v23, %v1093_v63  ;;  %v1097_v42 = vor.u32 %v1096_v43, %v1095_v38  ;;  %v1104_v37 = vshll.u32 %v8175_v21, %v1092_v46 }
 0x1e1   : > { %v854_v49 = vsel %vm771_vm3, %v853_v48, %v852_v24  ;;  %v1103_v0 = vor.u32 %v1102_v6, %v1101_v61  ;;  %v1107_v9 = vshll.u32 %v8176_v23, %v1092_v46  ;;  %v1108_v36 = vshrl.u32 %v8177_v30, %v1093_v63 }
 0x1e2   : > { %v857_v2 = vsel %vm9097_vm6, %v8875_v12, %v854_v49  ;;  %v2483_v55 = vsub.s32 0, %v9152_v59  ;;  %v1100_v56 = vor.u32 %v1099_v27, %v1098_v33  ;;  %v1106_v40 = vor.u32 %v1105_v8, %v1104_v37 }
 0x1e3   : > { %8006 = vcosq.f32 %v857_v2  ;;  %v9169_v20 = vand.u32 3, %v858_v47  ;;  %v9171_v7 = vand.u32 3, %v4192_v41  ;;  %v1109_v11 = vor.u32 %v1108_v36, %v1107_v9 }
 0x1e4   : > { %8008 = vsinq.f32 %v857_v2  ;;  %v7456_v44 = vmin.u32 %v2483_v55, %v9152_v59  ;;  %vm1113_vm10 = vcmp.lt.s32.totalorder %v1091_v5, 4  ;;  %v1126_v54 = vshll.u32 %v1086_v50, 8 }
 0x1e5   : > { %v2730_v34 = vshrl.u32 %v2729_v4, 23  ;;  %v1094_v10 = vshrl.u32 %v8172_v13, %v1093_v63  ;;  %vm1110_vm2 = vcmp.lt.s32.totalorder %v1091_v5, 1  ;;  %vm1111_vm3 = vcmp.lt.s32.totalorder %v1091_v5, 2 }
 0x1e6   : > { %v2485_v3 = vclz %v7456_v44  ;;  %v1115_v46 = vsel %vm1113_vm10, %v1103_v0, 2102212464  ;;  %vm1112_vm4 = vcmp.lt.s32.totalorder %v1091_v5, 3  ;;  %v1118_v22 = vsel %vm1110_vm2, %v1097_v42, %v1100_v56 }
 0x1e7   : > { %v1119_v57 = vsel %vm1113_vm10, %v1106_v40, 920167782  ;;  %vm2419_vm5 = vcmp.lt.s32.totalorder %v8994_v51, 0  ;;  %v1114_v47 = vsel %vm1110_vm2, %v1094_v10, %v1097_v42  ;;  %v1122_v52 = vsel %vm1110_vm2, %v1100_v56, %v1103_v0 }
 0x1e8   : > { %v7457_v31 = vadd.s32 4294967294, %v2485_v3  ;;  %v1120_v1 = vsel %vm1112_vm4, %v1103_v0, %v1119_v57  ;;  %v1123_v35 = vsel %vm1113_vm10, %v1109_v11, 1326507024  ;;  %vm867_vm6 = vcmp.eq.s32.totalorder %v9169_v20, 2 }
 0x1e9   : > { %v1116_v58 = vsel %vm1112_vm4, %v1100_v56, %v1115_v46  ;;  %v1121_v29 = vsel %vm1111_vm3, %v1118_v22, %v1120_v1  ;;  %v1124_v63 = vsel %vm1112_vm4, %v1106_v40, %v1123_v35  ;;  %vm864_vm8 = vcmp.eq.s32.totalorder %v9169_v20, 0 }
 0x1ea   : > { %vm7458_vm7 = vcmp.lt.s32.totalorder %v7457_v31, 0  ;;  %v1125_v16 = vsel %vm1111_vm3, %v1122_v52, %v1124_v63  ;;  %v9179_v53 = vmul.u32.u64.low %v1126_v54, %v1121_v29  ;;  %v9180_v39 = vmul.u32.u64.high %v1126_v54, %v1121_v29, %v9179_v53 }
 0x1eb   : > { %v2488_v15 = vsel %vm7458_vm7, 0, %v7457_v31  ;;  %vm863_vm9 = vcmp.lt.s32.totalorder %v9169_v20, 2  ;;  %vm9186_vm11 = vcmp.le.f32.partialorder %v2417_v26, 0.7853982  ;;  %v2473_v24 = vadd.s32 %v9103_v45, %v9110_v32 }
 0x1ec   : > { %v2489_v41 = vsub.s32 32, %v2488_v15  ;;  %v2493_v60 = vsub.s32 4294967266, %v2488_v15  ;;  %v7467_v43 = vadd.s32 4294967169, %v2730_v34  ;;  %vm861_vm12 = vweird.f32 %v8875_v12 }
 0x1ed   : > { %v2503_v48 = vsub.s32 4, %v9142_v14  ;;  %v1117_v50 = vsel %vm1111_vm3, %v1114_v47, %v1116_v58  ;;  %v9195_v6 = vmul.u32.u64.low %v1126_v54, %v1125_v16  ;;  %v9196_v4 = vmul.u32.u64.high %v1126_v54, %v1125_v16, %v9195_v6 }
 0x1ee   : > { %v2490_v26 = vshll.u32 %v9152_v59, %v2488_v15  ;;  %v2491_v38 = vshrl.u32 %v2473_v24, %v2489_v41  ;;  %v2494_v27 = vadd.s32 127, %v2493_v60  ;;  %v2736_v49 = vadd.s32 1, %v7467_v43 }
 0x1ef   : > { %vm4194_vm13 = vcmp.lt.s32.totalorder %v9171_v7, 2  ;;  %vm4195_vm14 = vcmp.eq.s32.totalorder %v9171_v7, 0  ;;  %vm4198_vm15 = vcmp.eq.s32.totalorder %v9171_v7, 2  ;;  %v1136_v45 = vadd.s32 1, %v9180_v39 }
 0x1f0   : > { %v8007_v32 = vpop.eup %8006  ;;  %v2492_v33 = vor.u32 %v2491_v38, %v2490_v26  ;;  %v2495_v5 = vshll.u32 %v2494_v27, 23  ;;  %v2726_v61 = vand.u32 2147483647, %v9144_v62  ;;  %vm2737_vm0 = vcmp.gt.s32.totalorder %v2736_v49, 0  ;;  %v9251_v27 = vpop.f32.mrf.mxu0 }
 0x1f1   : > { %v8009_v8 = vpop.eup %8008  ;;  %v868_v2 = vxor.u32 2147483648, %v8007_v32  ;;  %v1133_v59 = vmul.u32 %v1126_v54, %v1117_v50  ;;  %vm1135_vm1 = vc.u32 %v9196_v4, %v9179_v53  ;;  %v2738_v55 = vsel %vm2737_vm0, %v2736_v49, 0 }
 0x1f2   : > { %v865_v42 = vxor.u32 2147483648, %v8009_v8  ;;  %v2496_v37 = vor.u32 4788187, %v2495_v5  ;;  %v2504_v0 = vsel %vm2419_vm5, %v2503_v48, %v9142_v14  ;;  %v1137_v9 = vsel %vm1135_vm1, %v1136_v45, %v9180_v39 }
 0x1f3   : > { %v869_v36 = vsel %vm867_vm6, %v868_v2, %v8009_v8  ;;  %v4200_v44 = vsel %vm4198_vm15, %v868_v2, %v8009_v8  ;;  %v2499_v56 = vcvt.s32.f32 %v2492_v33  ;;  %v1138_v40 = vadd.s32 %v1137_v9, %v1133_v59 }
 0x1f4   : > { %v866_v11 = vsel %vm864_vm8, %v8007_v32, %v865_v42  ;;  %v4197_v3 = vsel %vm4195_vm14, %v8007_v32, %v865_v42  ;;  %v2497_v54 = vand.u32 2147483647, %v2496_v37  ;;  %v2740_v14 = vand.u32 31, %v2738_v55 }
 0x1f5   : > { %v870_v34 = vsel %vm863_vm9, %v866_v11, %v869_v36  ;;  %v4201_v10 = vsel %vm4194_vm13, %v4197_v3, %v4200_v44  ;;  %v2506_v46 = vsel %vm9186_vm11, 0, %v2504_v0  ;;  %v1139_v31 = vadd.s32 536870912, %v1138_v40 }
 0x1f6   : > { %v871_v22 = vsel %vm861_vm12, nan, %v870_v34  ;;  %v4202_v57 = vsel %vm861_vm12, nan, %v4201_v10  ;;  %v2500_v47 = vmul.f32 %v2499_v56, %v2497_v54  ;;  %v2741_v1 = vsub.s32 32, %v2740_v14 }
 0x1f7   : > { %3861 = vst [vmem:[%s8731_s22 + $0x20] sm:$0xff] %v871_v22  ;;  %7221 = vst [vmem:[%s8731_s22 + $0x28] sm:$0xff] %v4202_v57  ;;  %v9230_v52 = vshrl.u32 %v1139_v31, 30  ;;  %v5856_v35 = vadd.s32 3, %v2506_v46  ;;  %v2733_v58 = vand.u32 8388607, %v2726_v61  ;;  %v2743_v41 = vshll.u32 %v8172_v13, %v2740_v14 }
 0x1f8   : > { %v2501_v20 = vxor.u32 2147483648, %v2500_v47  ;;  %v2744_v29 = vshrl.u32 %v8173_v17, %v2741_v1  ;;  %v2747_v12 = vshrl.u32 %v8174_v19, %v2741_v1  ;;  %v2750_v15 = vshrl.u32 %v8175_v21, %v2741_v1 }
 0x1f9   : > { %v1141_v7 = vshll.u32 %v9230_v52, 30  ;;  %v2753_v16 = vshrl.u32 %v8176_v23, %v2741_v1  ;;  %v2752_v60 = vshll.u32 %v8175_v21, %v2740_v14  ;;  %v2739_v43 = vshrl.u32 %v2738_v55, 5 }
 0x1fa   : > { %v2502_v63 = vsel %vm2419_vm5, %v2501_v20, %v2500_v47  ;;  %v2746_v48 = vshll.u32 %v8173_v17, %v2740_v14  ;;  %v2749_v50 = vshll.u32 %v8174_v19, %v2740_v14  ;;  %v2745_v26 = vor.u32 %v2744_v29, %v2743_v41 }
 0x1fb   : > { %v2505_v39 = vsel %vm9186_vm11, %v8994_v51, %v2502_v63  ;;  %v9244_v24 = vsub.s32 %v1138_v40, %v1141_v7  ;;  %v2754_v38 = vor.u32 %v2753_v16, %v2752_v60  ;;  %v2755_v45 = vshll.u32 %v8176_v23, %v2740_v14 }
 0x1fc   : > { %8010 = vcosq.f32 %v2505_v39  ;;  %v2748_v18 = vor.u32 %v2747_v12, %v2746_v48  ;;  %v2751_v49 = vor.u32 %v2750_v15, %v2749_v50  ;;  %v2756_v32 = vshrl.u32 %v8177_v30, %v2741_v1 }
 0x1fd   : > { %8012 = vsinq.f32 %v2505_v39  ;;  %v1144_v6 = vsub.s32 0, %v9244_v24  ;;  %v9255_v33 = vand.u32 3, %v2506_v46  ;;  %v9257_v5 = vand.u32 3, %v5856_v35 }
 0x1fe   : > { %v2734_v2 = vor.u32 8388608, %v2733_v58  ;;  %v2757_v59 = vor.u32 %v2756_v32, %v2755_v45  ;;  %vm2761_vm10 = vcmp.lt.s32.totalorder %v2739_v43, 4  ;;  %v978_v55 = vand.u32 2139095040, %v9251_v27 }
 0x1ff   : > { %v7404_v8 = vmin.u32 %v1144_v6, %v9244_v24  ;;  %vm1080_vm2 = vcmp.lt.s32.totalorder %v9060_v28, 0  ;;  %v2742_v37 = vshrl.u32 %v8172_v13, %v2741_v1  ;;  %vm2758_vm3 = vcmp.lt.s32.totalorder %v2739_v43, 1 }
 0x200   : > { %v2767_v0 = vsel %vm2761_vm10, %v2754_v38, 920167782  ;;  %vm2759_vm4 = vcmp.lt.s32.totalorder %v2739_v43, 2  ;;  %vm2760_vm5 = vcmp.lt.s32.totalorder %v2739_v43, 3  ;;  %v2763_v9 = vsel %vm2761_vm10, %v2751_v49, 2102212464 }
 0x201   : > { %v1146_v42 = vclz %v7404_v8  ;;  %v2766_v36 = vsel %vm2758_vm3, %v2745_v26, %v2748_v18  ;;  %vm2515_vm6 = vcmp.eq.s32.totalorder %v9255_v33, 2  ;;  %v2768_v56 = vsel %vm2760_vm5, %v2751_v49, %v2767_v0 }
 0x202   : > { %v2770_v40 = vsel %vm2758_vm3, %v2748_v18, %v2751_v49  ;;  %v2771_v11 = vsel %vm2761_vm10, %v2757_v59, 1326507024  ;;  %vm2512_vm7 = vcmp.eq.s32.totalorder %v9255_v33, 0  ;;  %vm5859_vm8 = vcmp.eq.s32.totalorder %v9257_v5, 0 }
 0x203   : > { %v7405_v44 = vadd.s32 4294967294, %v1146_v42  ;;  %v2762_v3 = vsel %vm2758_vm3, %v2742_v37, %v2745_v26  ;;  %v2772_v54 = vsel %vm2760_vm5, %v2754_v38, %v2771_v11  ;;  %v2774_v14 = vshll.u32 %v2734_v2, 8 }
 0x204   : > { %v979_v34 = vshrl.u32 %v978_v55, 23  ;;  %vm2511_vm9 = vcmp.lt.s32.totalorder %v9255_v33, 2  ;;  %vm5858_vm11 = vcmp.lt.s32.totalorder %v9257_v5, 2  ;;  %v2764_v10 = vsel %vm2760_vm5, %v2748_v18, %v2763_v9 }
 0x205   : > { %vm7406_vm12 = vcmp.lt.s32.totalorder %v7405_v44, 0  ;;  %v2769_v46 = vsel %vm2759_vm4, %v2766_v36, %v2768_v56  ;;  %v2773_v31 = vsel %vm2759_vm4, %v2770_v40, %v2772_v54  ;;  %vm2509_vm13 = vweird.f32 %v8994_v51 }
 0x206   : > { %v1149_v22 = vsel %vm7406_vm12, 0, %v7405_v44  ;;  %v1164_v57 = vsub.s32 4, %v9230_v52  ;;  %v9275_v47 = vmul.u32.u64.low %v2774_v14, %v2773_v31  ;;  %v9276_v1 = vmul.u32.u64.high %v2774_v14, %v2773_v31, %v9275_v47 }
 0x207   : > { %v1134_v20 = vadd.s32 %v9179_v53, %v9196_v4  ;;  %v1150_v35 = vsub.s32 32, %v1149_v22  ;;  %v1154_v7 = vsub.s32 4294967266, %v1149_v22  ;;  %v7399_v58 = vadd.s32 4294967169, %v979_v34 }
 0x208   : > { %vm5862_vm14 = vcmp.eq.s32.totalorder %v9257_v5, 2  ;;  %v2765_v29 = vsel %vm2759_vm4, %v2762_v3, %v2764_v10  ;;  %v9282_v63 = vmul.u32.u64.low %v2774_v14, %v2769_v46  ;;  %v9283_v12 = vmul.u32.u64.high %v2774_v14, %v2769_v46, %v9282_v63 }
 0x209   : > { %v8011_v15 = vpop.eup %8010  ;;  %v1151_v16 = vshll.u32 %v9244_v24, %v1149_v22  ;;  %v1152_v39 = vshrl.u32 %v1134_v20, %v1150_v35  ;;  %v1155_v41 = vadd.s32 127, %v1154_v7  ;;  %v985_v60 = vadd.s32 1, %v7399_v58 }
 0x20a   : > { %v8013_v48 = vpop.eup %8012  ;;  %v2516_v50 = vxor.u32 2147483648, %v8011_v15  ;;  %v1165_v53 = vsel %vm1080_vm2, %v1164_v57, %v9230_v52  ;;  %vm2783_vm15 = vc.u32 %v9276_v1, %v9282_v63  ;;  %v975_v4 = vand.u32 2147483647, %v9251_v27 }
 0x20b   : > { %v2513_v43 = vxor.u32 2147483648, %v8013_v48  ;;  %v1153_v6 = vor.u32 %v1152_v39, %v1151_v16  ;;  %v1156_v26 = vshll.u32 %v1155_v41, 23  ;;  %vm986_vm0 = vcmp.gt.s32.totalorder %v985_v60, 0 }
 0x20c   : > { %v2517_v24 = vsel %vm2515_vm6, %v2516_v50, %v8013_v48  ;;  %v5864_v38 = vsel %vm5862_vm14, %v2516_v50, %v8013_v48  ;;  %v2781_v18 = vmul.u32 %v2774_v14, %v2765_v29  ;;  %v2784_v52 = vadd.s32 1, %v9283_v12 }
 0x20d   : > { %v2514_v49 = vsel %vm2512_vm7, %v8011_v15, %v2513_v43  ;;  %v5861_v45 = vsel %vm5859_vm8, %v8011_v15, %v2513_v43  ;;  %v1157_v32 = vor.u32 4788187, %v1156_v26  ;;  %v987_v8 = vsel %vm986_vm0, %v985_v60, 0 }
 0x20e   : > { %v2518_v2 = vsel %vm2511_vm9, %v2514_v49, %v2517_v24  ;;  %v5865_v59 = vsel %vm5858_vm11, %v5861_v45, %v5864_v38  ;;  %v1160_v55 = vcvt.s32.f32 %v1153_v6  ;;  %v2785_v42 = vsel %vm2783_vm15, %v2784_v52, %v9283_v12 }
 0x20f   : > { %v2519_v37 = vsel %vm2509_vm13, nan, %v2518_v2  ;;  %v5866_v0 = vsel %vm2509_vm13, nan, %v5865_v59  ;;  %v1158_v9 = vand.u32 2147483647, %v1157_v32  ;;  %v2786_v36 = vadd.s32 %v2785_v42, %v2781_v18 }
 0x210   : > { %3877 = vst [vmem:[%s8731_s22 + $0x120] sm:$0xff] %v2519_v37  ;;  %7237 = vst [vmem:[%s8731_s22 + $0x128] sm:$0xff] %v5866_v0  ;;  %v989_v33 = vand.u32 31, %v987_v8  ;;  %vm9318_vm1 = vcmp.le.f32.partialorder %v1078_v25, 0.7853982  ;;  %v9326_v11 = vshrl.u32 %v987_v8, 5  ;;  %vm1170_vm11 = vweird.f32 %v9060_v28 }
 0x211   : > { %v1161_v44 = vmul.f32 %v1160_v55, %v1158_v9  ;;  %v2787_v56 = vadd.s32 536870912, %v2786_v36  ;;  %v1167_v40 = vsel %vm9318_vm1, 0, %v1165_v53  ;;  %v982_v51 = vand.u32 8388607, %v975_v4  ;;  %v9372_v55 = vpop.f32.mrf.mxu1 }
 0x212   : > { %v990_v3 = vsub.s32 32, %v989_v33  ;;  %v992_v34 = vshll.u32 %v8172_v13, %v989_v33  ;;  %v995_v25 = vshll.u32 %v8173_v17, %v989_v33  ;;  %v998_v31 = vshll.u32 %v8174_v19, %v989_v33 }
 0x213   : > { %v1162_v54 = vxor.u32 2147483648, %v1161_v44  ;;  %v9328_v14 = vshrl.u32 %v2787_v56, 30  ;;  %v1001_v20 = vshll.u32 %v8175_v21, %v989_v33  ;;  %v4504_v58 = vadd.s32 3, %v1167_v40 }
 0x214   : > { %v993_v10 = vshrl.u32 %v8173_v17, %v990_v3  ;;  %v996_v46 = vshrl.u32 %v8174_v19, %v990_v3  ;;  %v999_v22 = vshrl.u32 %v8175_v21, %v990_v3  ;;  %v1002_v35 = vshrl.u32 %v8176_v23, %v990_v3 }
 0x215   : > { %v1163_v57 = vsel %vm1080_vm2, %v1162_v54, %v1161_v44  ;;  %v2789_v47 = vshll.u32 %v9328_v14, 30  ;;  %v1004_v41 = vshll.u32 %v8176_v23, %v989_v33  ;;  %v1005_v60 = vshrl.u32 %v8177_v30, %v990_v3 }
 0x216   : > { %v1166_v7 = vsel %vm9318_vm1, %v9060_v28, %v1163_v57  ;;  %v994_v29 = vor.u32 %v993_v10, %v992_v34  ;;  %v997_v12 = vor.u32 %v996_v46, %v995_v25  ;;  %v1000_v16 = vor.u32 %v999_v22, %v998_v31 }
 0x217   : > { %8014 = vcosq.f32 %v1166_v7  ;;  %v9344_v15 = vsub.s32 %v2786_v36, %v2789_v47  ;;  %v1003_v39 = vor.u32 %v1002_v35, %v1001_v20  ;;  %v983_v50 = vor.u32 8388608, %v982_v51 }
 0x218   : > { %8016 = vsinq.f32 %v1166_v7  ;;  %vm1007_vm10 = vcmp.lt.s32.totalorder %v9326_v11, 1  ;;  %vm1010_vm2 = vcmp.lt.s32.totalorder %v9326_v11, 4  ;;  %v9351_v53 = vand.u32 3, %v1167_v40 }
 0x219   : > { %v2792_v48 = vsub.s32 0, %v9344_v15  ;;  %v1006_v43 = vor.u32 %v1005_v60, %v1004_v41  ;;  %v1015_v6 = vsel %vm1007_vm10, %v994_v29, %v997_v12  ;;  %v1016_v26 = vsel %vm1010_vm2, %v1003_v39, 920167782 }
 0x21a   : > { %v9357_v24 = vand.u32 3, %v4504_v58  ;;  %vm1009_vm3 = vcmp.lt.s32.totalorder %v9326_v11, 3  ;;  %v1012_v18 = vsel %vm1010_vm2, %v1000_v16, 2102212464  ;;  %v991_v52 = vshrl.u32 %v8172_v13, %v990_v3 }
 0x21b   : > { %v7468_v38 = vmin.u32 %v2792_v48, %v9344_v15  ;;  %vm1008_vm4 = vcmp.lt.s32.totalorder %v9326_v11, 2  ;;  %v1017_v49 = vsel %vm1009_vm3, %v1000_v16, %v1016_v26  ;;  %v1019_v45 = vsel %vm1007_vm10, %v997_v12, %v1000_v16 }
 0x21c   : > { %vm2728_vm5 = vcmp.lt.s32.totalorder %v9144_v62, 0  ;;  %v1018_v8 = vsel %vm1008_vm4, %v1015_v6, %v1017_v49  ;;  %v1020_v2 = vsel %vm1010_vm2, %v1006_v43, 1326507024  ;;  %v1023_v59 = vshll.u32 %v983_v50, 8 }
 0x21d   : > { %v2794_v32 = vclz %v7468_v38  ;;  %vm1176_vm6 = vcmp.eq.s32.totalorder %v9351_v53, 2  ;;  %v1011_v42 = vsel %vm1007_vm10, %v991_v52, %v994_v29  ;;  %v1013_v37 = vsel %vm1009_vm3, %v997_v12, %v1012_v18 }
 0x21e   : > { %v1021_v0 = vsel %vm1009_vm3, %v1003_v39, %v1020_v2  ;;  %vm1173_vm7 = vcmp.eq.s32.totalorder %v9351_v53, 0  ;;  %v9380_v33 = vmul.u32.u64.low %v1023_v59, %v1018_v8  ;;  %v9381_v5 = vmul.u32.u64.high %v1023_v59, %v1018_v8, %v9380_v33 }
 0x21f   : > { %v7469_v9 = vadd.s32 4294967294, %v2794_v32  ;;  %v1022_v36 = vsel %vm1008_vm4, %v1019_v45, %v1021_v0  ;;  %vm1172_vm8 = vcmp.lt.s32.totalorder %v9351_v53, 2  ;;  %vm4506_vm9 = vcmp.lt.s32.totalorder %v9357_v24, 2 }
 0x220   : > { %v9386_v44 = vmul.u32.u64.low %v1023_v59, %v1022_v36  ;;  %v9387_v56 = vmul.u32.u64.high %v1023_v59, %v1022_v36, %v9386_v44  ;;  %v2626_v40 = vand.u32 2139095040, %v9372_v55  ;;  %vm4507_vm12 = vcmp.eq.s32.totalorder %v9357_v24, 0 }
 0x221   : > { %vm4510_vm13 = vcmp.eq.s32.totalorder %v9357_v24, 2  ;;  %vm7470_vm14 = vcmp.lt.s32.totalorder %v7469_v9, 0  ;;  %v1014_v51 = vsel %vm1008_vm4, %v1011_v42, %v1013_v37  ;;  %vm9397_vm15 = vcmp.le.f32.partialorder %v2726_v61, 0.7853982  ;;  %v9435_v42 = vpop.f32.mrf.mxu0 }
 0x222   : > { %v2797_v54 = vsel %vm7470_vm14, 0, %v7469_v9  ;;  %v2812_v34 = vsub.s32 4, %v9328_v14  ;;  %v2623_v25 = vand.u32 2147483647, %v9372_v55  ;;  %v2627_v10 = vshrl.u32 %v2626_v40, 23 }
 0x223   : > { %v2782_v46 = vadd.s32 %v9282_v63, %v9276_v1  ;;  %v2798_v31 = vsub.s32 32, %v2797_v54  ;;  %v2802_v22 = vsub.s32 4294967266, %v2797_v54  ;;  %v1033_v11 = vadd.s32 1, %v9381_v5 }
 0x224   : > { %v8015_v57 = vpop.eup %8014  ;;  %v2799_v47 = vshll.u32 %v9344_v15, %v2797_v54  ;;  %v1030_v61 = vmul.u32 %v1023_v59, %v1014_v51  ;;  %vm1032_vm0 = vc.u32 %v9387_v56, %v9380_v33  ;;  %v7463_v20 = vadd.s32 4294967169, %v2627_v10 }
 0x225   : > { %v8017_v35 = vpop.eup %8016  ;;  %v1177_v7 = vxor.u32 2147483648, %v8015_v57  ;;  %v2800_v58 = vshrl.u32 %v2782_v46, %v2798_v31  ;;  %v2803_v29 = vadd.s32 127, %v2802_v22  ;;  %v1034_v12 = vsel %vm1032_vm0, %v1033_v11, %v9381_v5 }
 0x226   : > { %v1174_v16 = vxor.u32 2147483648, %v8017_v35  ;;  %v2813_v1 = vsel %vm2728_vm5, %v2812_v34, %v9328_v14  ;;  %v1035_v63 = vadd.s32 %v1034_v12, %v1030_v61  ;;  %v2633_v39 = vadd.s32 1, %v7463_v20 }
 0x227   : > { %v1178_v15 = vsel %vm1176_vm6, %v1177_v7, %v8017_v35  ;;  %v4512_v41 = vsel %vm4510_vm13, %v1177_v7, %v8017_v35  ;;  %v2801_v60 = vor.u32 %v2800_v58, %v2799_v47  ;;  %v2804_v48 = vshll.u32 %v2803_v29, 23 }
 0x228   : > { %v1175_v50 = vsel %vm1173_vm7, %v8015_v57, %v1174_v16  ;;  %v4509_v43 = vsel %vm4507_vm12, %v8015_v57, %v1174_v16  ;;  %v1036_v6 = vadd.s32 536870912, %v1035_v63  ;;  %vm2634_vm1 = vcmp.gt.s32.totalorder %v2633_v39, 0 }
 0x229   : > { %v1179_v14 = vsel %vm1172_vm8, %v1175_v50, %v1178_v15  ;;  %v4513_v26 = vsel %vm4506_vm9, %v4509_v43, %v4512_v41  ;;  %v2805_v38 = vor.u32 4788187, %v2804_v48  ;;  %v2630_v18 = vand.u32 8388607, %v2623_v25 }
 0x22a   : > { %v1180_v52 = vsel %vm1170_vm11, nan, %v1179_v14  ;;  %v4514_v49 = vsel %vm1170_vm11, nan, %v4513_v26  ;;  %v1037_v45 = vshrl.u32 %v1036_v6, 30  ;;  %v2635_v32 = vsel %vm2634_vm1, %v2633_v39, 0 }
 0x22b   : > { %3864 = vst [vmem:[%s8731_s22 + $0x50] sm:$0xff] %v1180_v52  ;;  %7224 = vst [vmem:[%s8731_s22 + $0x58] sm:$0xff] %v4514_v49  ;;  %v2806_v8 = vand.u32 2147483647, %v2805_v38  ;;  %v2808_v53 = vcvt.s32.f32 %v2801_v60  ;;  %v2815_v24 = vsel %vm9397_vm15, 0, %v2813_v1  ;;  %v2637_v2 = vand.u32 31, %v2635_v32 }
 0x22c   : > { %v1038_v59 = vshll.u32 %v1037_v45, 30  ;;  %vm977_vm10 = vcmp.lt.s32.totalorder %v9251_v27, 0  ;;  %v9438_v9 = vand.u32 3, %v2815_v24  ;;  %v6168_v28 = vadd.s32 3, %v2815_v24 }
 0x22d   : > { %v2809_v37 = vmul.f32 %v2808_v53, %v2806_v8  ;;  %v2638_v0 = vsub.s32 32, %v2637_v2  ;;  %v2631_v5 = vor.u32 8388608, %v2630_v18  ;;  %v2636_v40 = vshrl.u32 %v2635_v32, 5 }
 0x22e   : > { %v9440_v36 = vsub.s32 %v1035_v63, %v1038_v59  ;;  %v1287_v54 = vand.u32 2139095040, %v9435_v42  ;;  %v1061_v10 = vsub.s32 4, %v1037_v45  ;;  %v2640_v46 = vshll.u32 %v8172_v13, %v2637_v2 }
 0x22f   : > { %v2810_v44 = vxor.u32 2147483648, %v2809_v37  ;;  %v2641_v51 = vshrl.u32 %v8173_v17, %v2638_v0  ;;  %v2644_v31 = vshrl.u32 %v8174_v19, %v2638_v0  ;;  %v2643_v11 = vshll.u32 %v8173_v17, %v2637_v2 }
 0x230   : > { %v1041_v34 = vsub.s32 0, %v9440_v36  ;;  %v2647_v57 = vshrl.u32 %v8175_v21, %v2638_v0  ;;  %v2650_v47 = vshrl.u32 %v8176_v23, %v2638_v0  ;;  %v2646_v35 = vshll.u32 %v8174_v19, %v2637_v2 }
 0x231   : > { %v2811_v22 = vsel %vm2728_vm5, %v2810_v44, %v2809_v37  ;;  %v2649_v7 = vshll.u32 %v8175_v21, %v2637_v2  ;;  %v9458_v58 = vand.u32 3, %v6168_v28  ;;  %v2642_v29 = vor.u32 %v2641_v51, %v2640_v46 }
 0x232   : > { %v2814_v61 = vsel %vm9397_vm15, %v9144_v62, %v2811_v22  ;;  %v7400_v20 = vmin.u32 %v1041_v34, %v9440_v36  ;;  %v2645_v12 = vor.u32 %v2644_v31, %v2643_v11  ;;  %v2648_v1 = vor.u32 %v2647_v57, %v2646_v35 }
 0x233   : > { %8018 = vcosq.f32 %v2814_v61  ;;  %v2651_v63 = vor.u32 %v2650_v47, %v2649_v7  ;;  %v1031_v39 = vadd.s32 %v9380_v33, %v9387_v56  ;;  %v1062_v3 = vsel %vm977_vm10, %v1061_v10, %v1037_v45 }
 0x234   : > { %8020 = vsinq.f32 %v2814_v61  ;;  %v1043_v16 = vclz %v7400_v20  ;;  %v9464_v15 = vshll.u32 %v2631_v5, 8  ;;  %v1288_v41 = vshrl.u32 %v1287_v54, 23 }
 0x235   : > { %v2652_v48 = vshll.u32 %v8176_v23, %v2637_v2  ;;  %v2653_v50 = vshrl.u32 %v8177_v30, %v2638_v0  ;;  %vm2655_vm2 = vcmp.lt.s32.totalorder %v2636_v40, 1  ;;  %vm9470_vm3 = vcmp.le.f32.partialorder %v975_v4, 0.7853982 }
 0x236   : > { %v7401_v60 = vadd.s32 4294967294, %v1043_v16  ;;  %v2639_v33 = vshrl.u32 %v8172_v13, %v2638_v0  ;;  %vm2657_vm4 = vcmp.lt.s32.totalorder %v2636_v40, 3  ;;  %vm2658_vm5 = vcmp.lt.s32.totalorder %v2636_v40, 4 }
 0x237   : > { %v2663_v56 = vsel %vm2655_vm2, %v2642_v29, %v2645_v12  ;;  %v2654_v6 = vor.u32 %v2653_v50, %v2652_v48  ;;  %v2660_v14 = vsel %vm2658_vm5, %v2648_v1, 2102212464  ;;  %v2664_v26 = vsel %vm2658_vm5, %v2651_v63, 920167782 }
 0x238   : > { %vm7402_vm6 = vcmp.lt.s32.totalorder %v7401_v60, 0  ;;  %v2659_v18 = vsel %vm2655_vm2, %v2639_v33, %v2642_v29  ;;  %v2661_v4 = vsel %vm2657_vm4, %v2645_v12, %v2660_v14  ;;  %v2665_v52 = vsel %vm2657_vm4, %v2648_v1, %v2664_v26 }
 0x239   : > { %v1046_v38 = vsel %vm7402_vm6, 0, %v7401_v60  ;;  %vm2824_vm7 = vcmp.eq.s32.totalorder %v9438_v9, 2  ;;  %vm2656_vm8 = vcmp.lt.s32.totalorder %v2636_v40, 2  ;;  %v2667_v32 = vsel %vm2655_vm2, %v2645_v12, %v2648_v1 }
 0x23a   : > { %v1047_v49 = vsub.s32 32, %v1046_v38  ;;  %v1051_v45 = vsub.s32 4294967266, %v1046_v38  ;;  %vm2821_vm9 = vcmp.eq.s32.totalorder %v9438_v9, 0  ;;  %v1048_v8 = vshll.u32 %v9440_v36, %v1046_v38 }
 0x23b   : > { %v2666_v53 = vsel %vm2656_vm8, %v2663_v56, %v2665_v52  ;;  %v2668_v24 = vsel %vm2658_vm5, %v2654_v6, 1326507024  ;;  %v7411_v2 = vadd.s32 4294967169, %v1288_v41  ;;  %vm2820_vm11 = vcmp.lt.s32.totalorder %v9438_v9, 2 }
 0x23c   : > { %v1049_v59 = vshrl.u32 %v1031_v39, %v1047_v49  ;;  %v1052_v37 = vadd.s32 127, %v1051_v45  ;;  %v2662_v0 = vsel %vm2656_vm8, %v2659_v18, %v2661_v4  ;;  %v2669_v28 = vsel %vm2657_vm4, %v2651_v63, %v2668_v24 }
 0x23d   : > { %vm2818_vm12 = vweird.f32 %v9144_v62  ;;  %v2670_v5 = vsel %vm2656_vm8, %v2667_v32, %v2669_v28  ;;  %v9490_v44 = vmul.u32.u64.low %v9464_v15, %v2666_v53  ;;  %v9491_v51 = vmul.u32.u64.high %v9464_v15, %v2666_v53, %v9490_v44 }
 0x23e   : > { %v1294_v36 = vadd.s32 1, %v7411_v2  ;;  %v1050_v54 = vor.u32 %v1049_v59, %v1048_v8  ;;  %v1053_v34 = vshll.u32 %v1052_v37, 23  ;;  %vm6170_vm13 = vcmp.lt.s32.totalorder %v9458_v58, 2 }
 0x23f   : > { %v9495_v10 = vmul.u32.u64.low %v9464_v15, %v2670_v5  ;;  %v9496_v46 = vmul.u32.u64.high %v9464_v15, %v2670_v5, %v9495_v10  ;;  %vm6171_vm14 = vcmp.eq.s32.totalorder %v9458_v58, 0  ;;  %vm6174_vm15 = vcmp.eq.s32.totalorder %v9458_v58, 2 }
 0x240   : > { %vm1295_vm0 = vcmp.gt.s32.totalorder %v1294_v36, 0  ;;  %v8019_v40 = vpop.eup %8018  ;;  %v1054_v31 = vor.u32 4788187, %v1053_v34  ;;  %v1064_v22 = vsel %vm9470_vm3, 0, %v1062_v3  ;;  %v1284_v11 = vand.u32 2147483647, %v9435_v42 }
 0x241   : > { %v1296_v57 = vsel %vm1295_vm0, %v1294_v36, 0  ;;  %v8021_v47 = vpop.eup %8020  ;;  %v2825_v61 = vxor.u32 2147483648, %v8019_v40  ;;  %v2678_v20 = vmul.u32 %v9464_v15, %v2662_v0  ;;  %v2681_v35 = vadd.s32 1, %v9491_v51 }
 0x242   : > { %v1298_v7 = vand.u32 31, %v1296_v57  ;;  %v2822_v29 = vxor.u32 2147483648, %v8021_v47  ;;  %v1055_v12 = vand.u32 2147483647, %v1054_v31  ;;  %v1057_v16 = vcvt.s32.f32 %v1050_v54  ;;  %v9548_v54 = vpop.f32.mrf.mxu1 }
 0x243   : > { %vm2680_vm1 = vc.u32 %v9496_v46, %v9490_v44  ;;  %v2826_v1 = vsel %vm2824_vm7, %v2825_v61, %v8021_v47  ;;  %v6176_v63 = vsel %vm6174_vm15, %v2825_v61, %v8021_v47  ;;  %v4400_v56 = vadd.s32 3, %v1064_v22 }
 0x244   : > { %v2682_v39 = vsel %vm2680_vm1, %v2681_v35, %v9491_v51  ;;  %v1299_v3 = vsub.s32 32, %v1298_v7  ;;  %v2823_v15 = vsel %vm2821_vm9, %v8019_v40, %v2822_v29  ;;  %v6173_v41 = vsel %vm6171_vm14, %v8019_v40, %v2822_v29 }
 0x245   : > { %v1058_v60 = vmul.f32 %v1057_v16, %v1055_v12  ;;  %v2683_v48 = vadd.s32 %v2682_v39, %v2678_v20  ;;  %v2827_v50 = vsel %vm2820_vm11, %v2823_v15, %v2826_v1  ;;  %v6177_v33 = vsel %vm6170_vm13, %v6173_v41, %v6176_v63 }
 0x246   : > { %v1291_v6 = vand.u32 8388607, %v1284_v11  ;;  %v2828_v14 = vsel %vm2818_vm12, nan, %v2827_v50  ;;  %v6178_v26 = vsel %vm2818_vm12, nan, %v6177_v33  ;;  %v9529_v4 = vshrl.u32 %v1296_v57, 5 }
 0x247   : > { %v1059_v38 = vxor.u32 2147483648, %v1058_v60  ;;  %v2684_v18 = vadd.s32 536870912, %v2683_v48  ;;  %3880 = vst [vmem:[%s8731_s22 + $0x150] sm:$0xff] %v2828_v14  ;;  %7240 = vst [vmem:[%s8731_s22 + $0x158] sm:$0xff] %v6178_v26  ;;  %v1301_v9 = vshll.u32 %v8172_v13, %v1298_v7  ;;  %v1302_v58 = vshrl.u32 %v8173_v17, %v1299_v3 }
 0x248   : > { %v1305_v52 = vshrl.u32 %v8174_v19, %v1299_v3  ;;  %v1304_v32 = vshll.u32 %v8173_v17, %v1298_v7  ;;  %v1308_v62 = vshrl.u32 %v8175_v21, %v1299_v3  ;;  %v1307_v53 = vshll.u32 %v8174_v19, %v1298_v7 }
 0x249   : > { %v1060_v49 = vsel %vm977_vm10, %v1059_v38, %v1058_v60  ;;  %v2685_v45 = vshrl.u32 %v2684_v18, 30  ;;  %v1310_v24 = vshll.u32 %v8175_v21, %v1298_v7  ;;  %v1311_v2 = vshrl.u32 %v8176_v23, %v1299_v3 }
 0x24a   : > { %v1063_v8 = vsel %vm9470_vm3, %v9251_v27, %v1060_v49  ;;  %v1303_v37 = vor.u32 %v1302_v58, %v1301_v9  ;;  %v1306_v0 = vor.u32 %v1305_v52, %v1304_v32  ;;  %v1313_v5 = vshll.u32 %v8176_v23, %v1298_v7 }
 0x24b   : > { %8022 = vcosq.f32 %v1063_v8  ;;  %v2686_v59 = vshll.u32 %v2685_v45, 30  ;;  %v1312_v28 = vor.u32 %v1311_v2, %v1310_v24  ;;  %v1314_v51 = vshrl.u32 %v8177_v30, %v1299_v3 }
 0x24c   : > { %8024 = vsinq.f32 %v1063_v8  ;;  %v1309_v43 = vor.u32 %v1308_v62, %v1307_v53  ;;  %v9550_v34 = vand.u32 3, %v1064_v22  ;;  %v9552_v10 = vand.u32 3, %v4400_v56 }
 0x24d   : > { %v9546_v36 = vsub.s32 %v2683_v48, %v2686_v59  ;;  %vm2625_vm10 = vcmp.lt.s32.totalorder %v9372_v55, 0  ;;  %v1315_v40 = vor.u32 %v1314_v51, %v1313_v5  ;;  %vm9557_vm2 = vcmp.le.f32.partialorder %v2623_v25, 0.7853982 }
 0x24e   : > { %v1292_v47 = vor.u32 8388608, %v1291_v6  ;;  %vm1316_vm3 = vcmp.lt.s32.totalorder %v9529_v4, 1  ;;  %vm1319_vm4 = vcmp.lt.s32.totalorder %v9529_v4, 4  ;;  %v2709_v22 = vsub.s32 4, %v2685_v45 }
 0x24f   : > { %v2689_v57 = vsub.s32 0, %v9546_v36  ;;  %v1324_v61 = vsel %vm1316_vm3, %v1303_v37, %v1306_v0  ;;  %v1325_v20 = vsel %vm1319_vm4, %v1312_v28, 920167782  ;;  %v2935_v35 = vand.u32 2139095040, %v9548_v54 }
 0x250   : > { %v1300_v25 = vshrl.u32 %v8172_v13, %v1299_v3  ;;  %vm1318_vm5 = vcmp.lt.s32.totalorder %v9529_v4, 3  ;;  %v1328_v29 = vsel %vm1316_vm3, %v1306_v0, %v1309_v43  ;;  %vm1317_vm6 = vcmp.lt.s32.totalorder %v9529_v4, 2 }
 0x251   : > { %v7464_v7 = vmin.u32 %v2689_v57, %v9546_v36  ;;  %v1321_v12 = vsel %vm1319_vm4, %v1309_v43, 2102212464  ;;  %v1326_v16 = vsel %vm1318_vm5, %v1309_v43, %v1325_v20  ;;  %v1329_v1 = vsel %vm1319_vm4, %v1315_v40, 1326507024 }
 0x252   : > { %vm1070_vm7 = vcmp.eq.s32.totalorder %v9550_v34, 0  ;;  %v1327_v39 = vsel %vm1317_vm6, %v1324_v61, %v1326_v16  ;;  %v1330_v3 = vsel %vm1318_vm5, %v1312_v28, %v1329_v1  ;;  %v1332_v15 = vshll.u32 %v1292_v47, 8  ;;  %v9629_v16 = vpop.f32.mrf.mxu0 }
 0x253   : > { %v2691_v63 = vclz %v7464_v7  ;;  %vm1069_vm8 = vcmp.lt.s32.totalorder %v9550_v34, 2  ;;  %vm1073_vm9 = vcmp.eq.s32.totalorder %v9550_v34, 2  ;;  %v2710_v41 = vsel %vm2625_vm10, %v2709_v22, %v2685_v45 }
 0x254   : > { %v1320_v60 = vsel %vm1316_vm3, %v1300_v25, %v1303_v37  ;;  %v1331_v48 = vsel %vm1317_vm6, %v1328_v29, %v1330_v3  ;;  %vm1067_vm11 = vweird.f32 %v9251_v27  ;;  %v1322_v33 = vsel %vm1318_vm5, %v1306_v0, %v1321_v12 }
 0x255   : > { %v7465_v50 = vadd.s32 4294967294, %v2691_v63  ;;  %v9591_v56 = vmul.u32.u64.low %v1332_v15, %v1331_v48  ;;  %v9592_v6 = vmul.u32.u64.high %v1332_v15, %v1331_v48, %v9591_v56  ;;  %vm4402_vm12 = vcmp.lt.s32.totalorder %v9552_v10, 2 }
 0x256   : > { %v9595_v14 = vmul.u32.u64.low %v1332_v15, %v1327_v39  ;;  %v9596_v26 = vmul.u32.u64.high %v1332_v15, %v1327_v39, %v9595_v14  ;;  %v2936_v38 = vshrl.u32 %v2935_v35, 23  ;;  %vm4403_vm13 = vcmp.eq.s32.totalorder %v9552_v10, 0 }
 0x257   : > { %vm4406_vm14 = vcmp.eq.s32.totalorder %v9552_v10, 2  ;;  %vm7466_vm15 = vcmp.lt.s32.totalorder %v7465_v50, 0  ;;  %v2932_v18 = vand.u32 2147483647, %v9548_v54  ;;  %v2679_v58 = vadd.s32 %v9490_v44, %v9496_v46 }
 0x258   : > { %v8023_v9 = vpop.eup %8022  ;;  %v2694_v52 = vsel %vm7466_vm15, 0, %v7465_v50  ;;  %v2712_v49 = vsel %vm9557_vm2, 0, %v2710_v41  ;;  %v1323_v45 = vsel %vm1317_vm6, %v1320_v60, %v1322_v33  ;;  %v7475_v24 = vadd.s32 4294967169, %v2936_v38 }
 0x259   : > { %v8025_v32 = vpop.eup %8024  ;;  %v1074_v62 = vxor.u32 2147483648, %v8023_v9  ;;  %v2695_v8 = vsub.s32 32, %v2694_v52  ;;  %v2699_v53 = vsub.s32 4294967266, %v2694_v52  ;;  %v2696_v59 = vshll.u32 %v9546_v36, %v2694_v52 }
 0x25a   : > { %v1071_v2 = vxor.u32 2147483648, %v8025_v32  ;;  %vm1341_vm0 = vc.u32 %v9592_v6, %v9595_v14  ;;  %v1342_v37 = vadd.s32 1, %v9596_v26  ;;  %v1339_v51 = vmul.u32 %v1332_v15, %v1323_v45 }
 0x25b   : > { %v1075_v44 = vsel %vm1073_vm9, %v1074_v62, %v8025_v32  ;;  %v4408_v46 = vsel %vm4406_vm14, %v1074_v62, %v8025_v32  ;;  %v2697_v4 = vshrl.u32 %v2679_v58, %v2695_v8  ;;  %v2700_v0 = vadd.s32 127, %v2699_v53 }
 0x25c   : > { %v1072_v28 = vsel %vm1070_vm7, %v8023_v9, %v1071_v2  ;;  %v4405_v5 = vsel %vm4403_vm13, %v8023_v9, %v1071_v2  ;;  %v1343_v36 = vsel %vm1341_vm0, %v1342_v37, %v9596_v26  ;;  %v2942_v35 = vadd.s32 1, %v7475_v24 }
 0x25d   : > { %v1076_v43 = vsel %vm1069_vm8, %v1072_v28, %v1075_v44  ;;  %v4409_v40 = vsel %vm4402_vm12, %v4405_v5, %v4408_v46  ;;  %v2698_v57 = vor.u32 %v2697_v4, %v2696_v59  ;;  %v2701_v47 = vshll.u32 %v2700_v0, 23 }
 0x25e   : > { %v1077_v22 = vsel %vm1067_vm11, nan, %v1076_v43  ;;  %v4410_v61 = vsel %vm1067_vm11, nan, %v4409_v40  ;;  %v1344_v20 = vadd.s32 %v1343_v36, %v1339_v51  ;;  %vm2943_vm1 = vcmp.gt.s32.totalorder %v2942_v35, 0 }
 0x25f   : > { %3863 = vst [vmem:[%s8731_s22 + $0x40] sm:$0xff] %v1077_v22  ;;  %7223 = vst [vmem:[%s8731_s22 + $0x48] sm:$0xff] %v4410_v61  ;;  %v2702_v7 = vor.u32 4788187, %v2701_v47  ;;  %v2705_v29 = vcvt.s32.f32 %v2698_v57  ;;  %v6064_v12 = vadd.s32 3, %v2712_v49  ;;  %v2944_v10 = vsel %vm2943_vm1, %v2942_v35, 0 }
 0x260   : > { %v1345_v25 = vadd.s32 536870912, %v1344_v20  ;;  %v2939_v63 = vand.u32 8388607, %v2932_v18  ;;  %v2946_v39 = vand.u32 31, %v2944_v10  ;;  %vm1286_vm3 = vcmp.lt.s32.totalorder %v9435_v42, 0 }
 0x261   : > { %v2703_v34 = vand.u32 2147483647, %v2702_v7  ;;  %vm9636_vm4 = vcmp.le.f32.partialorder %v1284_v11, 0.7853982  ;;  %v1184_v60 = vand.u32 2139095040, %v9629_v16  ;;  %v9641_v50 = vand.u32 3, %v2712_v49 }
 0x262   : > { %v1346_v1 = vshrl.u32 %v1345_v25, 30  ;;  %v2947_v41 = vsub.s32 32, %v2946_v39  ;;  %v9643_v33 = vand.u32 3, %v6064_v12  ;;  %v1181_v56 = vand.u32 2147483647, %v9629_v16 }
 0x263   : > { %v2706_v27 = vmul.f32 %v2705_v29, %v2703_v34  ;;  %v1340_v26 = vadd.s32 %v9595_v14, %v9592_v6  ;;  %v2940_v11 = vor.u32 8388608, %v2939_v63  ;;  %v2945_v6 = vshrl.u32 %v2944_v10, 5 }
 0x264   : > { %v1347_v15 = vshll.u32 %v1346_v1, 30  ;;  %v1370_v9 = vsub.s32 4, %v1346_v1  ;;  %v2950_v52 = vshrl.u32 %v8173_v17, %v2947_v41  ;;  %v2953_v45 = vshrl.u32 %v8174_v19, %v2947_v41 }
 0x265   : > { %v2707_v48 = vxor.u32 2147483648, %v2706_v27  ;;  %v2956_v49 = vshrl.u32 %v8175_v21, %v2947_v41  ;;  %v1185_v14 = vshrl.u32 %v1184_v60, 23  ;;  %v2949_v8 = vshll.u32 %v8172_v13, %v2946_v39 }
 0x266   : > { %v9647_v38 = vsub.s32 %v1344_v20, %v1347_v15  ;;  %v2952_v53 = vshll.u32 %v8173_v17, %v2946_v39  ;;  %v2955_v24 = vshll.u32 %v8174_v19, %v2946_v39  ;;  %v1371_v59 = vsel %vm1286_vm3, %v1370_v9, %v1346_v1 }
 0x267   : > { %v2708_v58 = vsel %vm2625_vm10, %v2707_v48, %v2706_v27  ;;  %v2958_v31 = vshll.u32 %v8175_v21, %v2946_v39  ;;  %v2951_v37 = vor.u32 %v2950_v52, %v2949_v8  ;;  %v2959_v4 = vshrl.u32 %v8176_v23, %v2947_v41 }
 0x268   : > { %v2711_v32 = vsel %vm9557_vm2, %v9372_v55, %v2708_v58  ;;  %v1350_v62 = vsub.s32 0, %v9647_v38  ;;  %v2954_v44 = vor.u32 %v2953_v45, %v2952_v53  ;;  %v2957_v46 = vor.u32 %v2956_v49, %v2955_v24 }
 0x269   : > { %8026 = vcosq.f32 %v2711_v32  ;;  %v2961_v28 = vshll.u32 %v8176_v23, %v2946_v39  ;;  %v2962_v5 = vshrl.u32 %v8177_v30, %v2947_v41  ;;  %v9668_v51 = vshll.u32 %v2940_v11, 8 }
 0x26a   : > { %8028 = vsinq.f32 %v2711_v32  ;;  %v7412_v2 = vmin.u32 %v1350_v62, %v9647_v38  ;;  %v9672_v36 = vsel %vm9636_vm4, 0, %v1371_v59  ;;  %v2948_v43 = vshrl.u32 %v8172_v13, %v2947_v41 }
 0x26b   : > { %v2960_v40 = vor.u32 %v2959_v4, %v2958_v31  ;;  %v7407_v57 = vadd.s32 4294967169, %v1185_v14  ;;  %v2963_v22 = vor.u32 %v2962_v5, %v2961_v28  ;;  %vm2964_vm10 = vcmp.lt.s32.totalorder %v2945_v6, 1 }
 0x26c   : > { %v1352_v0 = vclz %v7412_v2  ;;  %vm2967_vm2 = vcmp.lt.s32.totalorder %v2945_v6, 4  ;;  %vm2966_vm5 = vcmp.lt.s32.totalorder %v2945_v6, 3  ;;  %v2972_v20 = vsel %vm2964_vm10, %v2951_v37, %v2954_v44 }
 0x26d   : > { %v2969_v61 = vsel %vm2967_vm2, %v2957_v46, 2102212464  ;;  %v2973_v35 = vsel %vm2967_vm2, %v2960_v40, 920167782  ;;  %vm2721_vm6 = vcmp.eq.s32.totalorder %v9641_v50, 2  ;;  %vm2965_vm8 = vcmp.lt.s32.totalorder %v2945_v6, 2 }
 0x26e   : > { %v7413_v47 = vadd.s32 4294967294, %v1352_v0  ;;  %v2974_v7 = vsel %vm2966_vm5, %v2957_v46, %v2973_v35  ;;  %v2976_v25 = vsel %vm2964_vm10, %v2954_v44, %v2957_v46  ;;  %vm2718_vm9 = vcmp.eq.s32.totalorder %v9641_v50, 0 }
 0x26f   : > { %v2968_v29 = vsel %vm2964_vm10, %v2948_v43, %v2951_v37  ;;  %v2975_v12 = vsel %vm2965_vm8, %v2972_v20, %v2974_v7  ;;  %v2977_v10 = vsel %vm2967_vm2, %v2963_v22, 1326507024  ;;  %vm2717_vm11 = vcmp.lt.s32.totalorder %v9641_v50, 2 }
 0x270   : > { %vm7414_vm7 = vcmp.lt.s32.totalorder %v7413_v47, 0  ;;  %v2970_v39 = vsel %vm2966_vm5, %v2954_v44, %v2969_v61  ;;  %v2978_v27 = vsel %vm2966_vm5, %v2960_v40, %v2977_v10  ;;  %vm6066_vm12 = vcmp.lt.s32.totalorder %v9643_v33, 2 }
 0x271   : > { %v1355_v34 = vsel %vm7414_vm7, 0, %v7413_v47  ;;  %v2979_v41 = vsel %vm2965_vm8, %v2976_v25, %v2978_v27  ;;  %v9685_v60 = vmul.u32.u64.low %v9668_v51, %v2975_v12  ;;  %v9686_v48 = vmul.u32.u64.high %v9668_v51, %v2975_v12, %v9685_v60 }
 0x272   : > { %v1356_v1 = vsub.s32 32, %v1355_v34  ;;  %v1360_v63 = vsub.s32 4294967266, %v1355_v34  ;;  %v1357_v15 = vshll.u32 %v9647_v38, %v1355_v34  ;;  %vm6067_vm13 = vcmp.eq.s32.totalorder %v9643_v33, 0 }
 0x273   : > { %v9690_v58 = vmul.u32.u64.low %v9668_v51, %v2979_v41  ;;  %v9691_v52 = vmul.u32.u64.high %v9668_v51, %v2979_v41, %v9690_v58  ;;  %v2971_v45 = vsel %vm2965_vm8, %v2968_v29, %v2970_v39  ;;  %v1191_v38 = vadd.s32 1, %v7407_v57 }
 0x274   : > { %v1358_v9 = vshrl.u32 %v1340_v26, %v1356_v1  ;;  %v1361_v11 = vadd.s32 127, %v1360_v63  ;;  %vm6070_vm14 = vcmp.eq.s32.totalorder %v9643_v33, 2  ;;  %v9699_v26 = vand.u32 8388607, %v1181_v56 }
 0x275   : > { %v4712_v53 = vadd.s32 3, %v9672_v36  ;;  %v2990_v24 = vadd.s32 1, %v9686_v48  ;;  %vm1192_vm15 = vcmp.gt.s32.totalorder %v1191_v38, 0  ;;  %v2987_v31 = vmul.u32 %v9668_v51, %v2971_v45  ;;  %v9713_v51 = vpop.f32.mrf.mxu1 }
 0x276   : > { %v8027_v49 = vpop.eup %8026  ;;  %v1359_v32 = vor.u32 %v1358_v9, %v1357_v15  ;;  %v1362_v62 = vshll.u32 %v1361_v11, 23  ;;  %vm2989_vm0 = vc.u32 %v9691_v52, %v9685_v60  ;;  %v1193_v46 = vsel %vm1192_vm15, %v1191_v38, 0 }
 0x277   : > { %v8029_v14 = vpop.eup %8028  ;;  %v2722_v8 = vxor.u32 2147483648, %v8027_v49  ;;  %v2991_v5 = vsel %vm2989_vm0, %v2990_v24, %v9686_v48  ;;  %vm2715_vm1 = vweird.f32 %v9372_v55  ;;  %v1195_v20 = vand.u32 31, %v1193_v46 }
 0x278   : > { %v2719_v2 = vxor.u32 2147483648, %v8029_v14  ;;  %v1363_v6 = vor.u32 4788187, %v1362_v62  ;;  %v1366_v59 = vcvt.s32.f32 %v1359_v32  ;;  %v2992_v57 = vadd.s32 %v2991_v5, %v2987_v31 }
 0x279   : > { %v2723_v37 = vsel %vm2721_vm6, %v2722_v8, %v8029_v14  ;;  %v6072_v44 = vsel %vm6070_vm14, %v2722_v8, %v8029_v14  ;;  %v1189_v7 = vor.u32 8388608, %v9699_v26  ;;  %v2829_v25 = vand.u32 2147483647, %v9713_v51 }
 0x27a   : > { %v2720_v4 = vsel %vm2718_vm9, %v8027_v49, %v2719_v2  ;;  %v6069_v0 = vsel %vm6067_vm13, %v8027_v49, %v2719_v2  ;;  %v1364_v28 = vand.u32 2147483647, %v1363_v6  ;;  %v2993_v35 = vadd.s32 536870912, %v2992_v57 }
 0x27b   : > { %v2724_v43 = vsel %vm2717_vm11, %v2720_v4, %v2723_v37  ;;  %v6073_v40 = vsel %vm6066_vm12, %v6069_v0, %v6072_v44  ;;  %v9725_v55 = vand.u32 3, %v9672_v36  ;;  %v9727_v50 = vand.u32 3, %v4712_v53 }
 0x27c   : > { %v2725_v47 = vsel %vm2715_vm1, nan, %v2724_v43  ;;  %v6074_v22 = vsel %vm2715_vm1, nan, %v6073_v40  ;;  %v1367_v61 = vmul.f32 %v1366_v59, %v1364_v28  ;;  %v1196_v33 = vsub.s32 32, %v1195_v20 }
 0x27d   : > { %3879 = vst [vmem:[%s8731_s22 + $0x140] sm:$0xff] %v2725_v47  ;;  %7239 = vst [vmem:[%s8731_s22 + $0x148] sm:$0xff] %v6074_v22  ;;  %v2994_v29 = vshrl.u32 %v2993_v35, 30  ;;  %v1194_v12 = vshrl.u32 %v1193_v46, 5  ;;  %v1198_v10 = vshll.u32 %v8172_v13, %v1195_v20  ;;  %v1201_v1 = vshll.u32 %v8173_v17, %v1195_v20 }
 0x27e   : > { %v1368_v34 = vxor.u32 2147483648, %v1367_v61  ;;  %v1199_v39 = vshrl.u32 %v8173_v17, %v1196_v33  ;;  %v1202_v27 = vshrl.u32 %v8174_v19, %v1196_v33  ;;  %v1204_v15 = vshll.u32 %v8174_v19, %v1195_v20 }
 0x27f   : > { %vm2934_vm10 = vcmp.lt.s32.totalorder %v9548_v54, 0  ;;  %v2995_v41 = vshll.u32 %v2994_v29, 30  ;;  %v1205_v48 = vshrl.u32 %v8175_v21, %v1196_v33  ;;  %v1207_v9 = vshll.u32 %v8175_v21, %v1195_v20 }
 0x280   : > { %v1369_v63 = vsel %vm1286_vm3, %v1368_v34, %v1367_v61  ;;  %v1200_v11 = vor.u32 %v1199_v39, %v1198_v10  ;;  %v1203_v58 = vor.u32 %v1202_v27, %v1201_v1  ;;  %v1208_v45 = vshrl.u32 %v8176_v23, %v1196_v33 }
 0x281   : > { %v1372_v36 = vsel %vm9636_vm4, %v9435_v42, %v1369_v63  ;;  %v9743_v38 = vsub.s32 %v2992_v57, %v2995_v41  ;;  %v1206_v49 = vor.u32 %v1205_v48, %v1204_v15  ;;  %v2832_v32 = vand.u32 2139095040, %v9713_v51 }
 0x282   : > { %8030 = vcosq.f32 %v1372_v36  ;;  %v1209_v3 = vor.u32 %v1208_v45, %v1207_v9  ;;  %v1210_v62 = vshll.u32 %v8176_v23, %v1195_v20  ;;  %v1211_v26 = vshrl.u32 %v8177_v30, %v1196_v33 }
 0x283   : > { %8032 = vsinq.f32 %v1372_v36  ;;  %vm1213_vm3 = vcmp.lt.s32.totalorder %v1194_v12, 1  ;;  %vm9750_vm4 = vcmp.le.f32.partialorder %v2932_v18, 0.7853982  ;;  %v2998_v8 = vsub.s32 0, %v9743_v38 }
 0x284   : > { %v3018_v53 = vsub.s32 4, %v2994_v29  ;;  %v1197_v24 = vshrl.u32 %v8172_v13, %v1196_v33  ;;  %vm1216_vm2 = vcmp.lt.s32.totalorder %v1194_v12, 4  ;;  %v1212_v2 = vor.u32 %v1211_v26, %v1210_v62 }
 0x285   : > { %v1218_v6 = vsel %vm1216_vm2, %v1206_v49, 2102212464  ;;  %v1221_v59 = vsel %vm1213_vm3, %v1200_v11, %v1203_v58  ;;  %v1222_v31 = vsel %vm1216_vm2, %v1209_v3, 920167782  ;;  %v7476_v37 = vmin.u32 %v2998_v8, %v9743_v38 }
 0x286   : > { %vm1215_vm5 = vcmp.lt.s32.totalorder %v1194_v12, 3  ;;  %v1229_v18 = vshll.u32 %v1189_v7, 8  ;;  %v2833_v44 = vshrl.u32 %v2832_v32, 23  ;;  %vm1214_vm6 = vcmp.lt.s32.totalorder %v1194_v12, 2 }
 0x287   : > { %v1217_v46 = vsel %vm1213_vm3, %v1197_v24, %v1200_v11  ;;  %v1223_v4 = vsel %vm1215_vm5, %v1206_v49, %v1222_v31  ;;  %v1225_v0 = vsel %vm1213_vm3, %v1203_v58, %v1206_v49  ;;  %v3000_v28 = vclz %v7476_v37 }
 0x288   : > { %v1219_v5 = vsel %vm1215_vm5, %v1203_v58, %v1218_v6  ;;  %v1224_v43 = vsel %vm1214_vm6, %v1221_v59, %v1223_v4  ;;  %v1226_v40 = vsel %vm1216_vm2, %v1212_v2, 1326507024  ;;  %vm1379_vm7 = vcmp.eq.s32.totalorder %v9725_v55, 0 }
 0x289   : > { %vm1382_vm8 = vcmp.eq.s32.totalorder %v9725_v55, 2  ;;  %v3019_v57 = vsel %vm2934_vm10, %v3018_v53, %v2994_v29  ;;  %v1227_v47 = vsel %vm1215_vm5, %v1209_v3, %v1226_v40  ;;  %vm1378_vm9 = vcmp.lt.s32.totalorder %v9725_v55, 2 }
 0x28a   : > { %v7477_v22 = vadd.s32 4294967294, %v3000_v28  ;;  %v1228_v61 = vsel %vm1214_vm6, %v1225_v0, %v1227_v47  ;;  %v9770_v20 = vmul.u32.u64.low %v1229_v18, %v1224_v43  ;;  %v9771_v35 = vmul.u32.u64.high %v1229_v18, %v1224_v43, %v9770_v20 }
 0x28b   : > { %v1220_v7 = vsel %vm1214_vm6, %v1217_v46, %v1219_v5  ;;  %v9775_v34 = vmul.u32.u64.low %v1229_v18, %v1228_v61  ;;  %v9776_v33 = vmul.u32.u64.high %v1229_v18, %v1228_v61, %v9775_v34  ;;  %v7471_v10 = vadd.s32 4294967169, %v2833_v44 }
 0x28c   : > { %vm4714_vm11 = vcmp.lt.s32.totalorder %v9727_v50, 2  ;;  %vm4715_vm12 = vcmp.eq.s32.totalorder %v9727_v50, 0  ;;  %vm4718_vm13 = vcmp.eq.s32.totalorder %v9727_v50, 2  ;;  %vm7478_vm14 = vcmp.lt.s32.totalorder %v7477_v22, 0 }
 0x28d   : > { %v2988_v29 = vadd.s32 %v9685_v60, %v9691_v52  ;;  %v3003_v1 = vsel %vm7478_vm14, 0, %v7477_v22  ;;  %v3021_v63 = vsel %vm9750_vm4, 0, %v3019_v57  ;;  %v2839_v12 = vadd.s32 1, %v7471_v10 }
 0x28e   : > { %v3004_v27 = vsub.s32 32, %v3003_v1  ;;  %v3008_v15 = vsub.s32 4294967266, %v3003_v1  ;;  %v1236_v36 = vmul.u32 %v1229_v18, %v1220_v7  ;;  %v1239_v41 = vadd.s32 1, %v9771_v35 }
 0x28f   : > { %v8031_v39 = vpop.eup %8030  ;;  %v3005_v11 = vshll.u32 %v9743_v38, %v3003_v1  ;;  %vm1238_vm15 = vc.u32 %v9776_v33, %v9770_v20  ;;  %vm2840_vm0 = vcmp.gt.s32.totalorder %v2839_v12, 0  ;;  %vm1376_vm1 = vweird.f32 %v9435_v42  ;;  %v9809_v42 = vpop.f32.mrf.mxu0 }
 0x290   : > { %v8033_v48 = vpop.eup %8032  ;;  %v1383_v9 = vxor.u32 2147483648, %v8031_v39  ;;  %v3006_v52 = vshrl.u32 %v2988_v29, %v3004_v27  ;;  %v3009_v58 = vadd.s32 127, %v3008_v15  ;;  %v1240_v45 = vsel %vm1238_vm15, %v1239_v41, %v9771_v35 }
 0x291   : > { %v1380_v60 = vxor.u32 2147483648, %v8033_v48  ;;  %v1241_v3 = vadd.s32 %v1240_v45, %v1236_v36  ;;  %v2841_v62 = vsel %vm2840_vm0, %v2839_v12, 0  ;;  %v6376_v18 = vadd.s32 3, %v3021_v63 }
 0x292   : > { %v1384_v49 = vsel %vm1382_vm8, %v1383_v9, %v8033_v48  ;;  %v4720_v32 = vsel %vm4718_vm13, %v1383_v9, %v8033_v48  ;;  %v3007_v8 = vor.u32 %v3006_v52, %v3005_v11  ;;  %v3010_v53 = vshll.u32 %v3009_v58, 23 }
 0x293   : > { %v1381_v38 = vsel %vm1379_vm7, %v8031_v39, %v1380_v60  ;;  %v4717_v26 = vsel %vm4715_vm12, %v8031_v39, %v1380_v60  ;;  %v1242_v6 = vadd.s32 536870912, %v1241_v3  ;;  %v2836_v46 = vand.u32 8388607, %v2829_v25 }
 0x294   : > { %v1385_v24 = vsel %vm1378_vm9, %v1381_v38, %v1384_v49  ;;  %v4721_v2 = vsel %vm4714_vm11, %v4717_v26, %v4720_v32  ;;  %v3011_v37 = vor.u32 4788187, %v3010_v53  ;;  %v2843_v4 = vand.u32 31, %v2841_v62 }
 0x295   : > { %v1386_v59 = vsel %vm1376_vm1, nan, %v1385_v24  ;;  %v4722_v31 = vsel %vm1376_vm1, nan, %v4721_v2  ;;  %v9805_v44 = vshrl.u32 %v1242_v6, 30  ;;  %v3014_v0 = vcvt.s32.f32 %v3007_v8 }
 0x296   : > { %3866 = vst [vmem:[%s8731_s22 + $0x70] sm:$0xff] %v1386_v59  ;;  %7226 = vst [vmem:[%s8731_s22 + $0x78] sm:$0xff] %v4722_v31  ;;  %v3012_v55 = vand.u32 2147483647, %v3011_v37  ;;  %v2844_v28 = vsub.s32 32, %v2843_v4  ;;  %v9812_v43 = vand.u32 3, %v3021_v63  ;;  %v1237_v1 = vadd.s32 %v9770_v20, %v9776_v33 }
 0x297   : > { %v1244_v50 = vshll.u32 %v9805_v44, 30  ;;  %v9814_v40 = vand.u32 3, %v6376_v18  ;;  %v1490_v57 = vand.u32 2147483647, %v9809_v42  ;;  %v2837_v22 = vor.u32 8388608, %v2836_v46 }
 0x298   : > { %v3015_v5 = vmul.f32 %v3014_v0, %v3012_v55  ;;  %v2847_v61 = vshrl.u32 %v8173_v17, %v2844_v28  ;;  %v1493_v35 = vand.u32 2139095040, %v9809_v42  ;;  %v2842_v34 = vshrl.u32 %v2841_v62, 5 }
 0x299   : > { %v9817_v47 = vsub.s32 %v1241_v3, %v1244_v50  ;;  %v2850_v10 = vshrl.u32 %v8174_v19, %v2844_v28  ;;  %v2853_v29 = vshrl.u32 %v8175_v21, %v2844_v28  ;;  %v2846_v12 = vshll.u32 %v8172_v13, %v2843_v4 }
 0x29a   : > { %v3016_v7 = vxor.u32 2147483648, %v3015_v5  ;;  %v2849_v39 = vshll.u32 %v8173_v17, %v2843_v4  ;;  %v2852_v15 = vshll.u32 %v8174_v19, %v2843_v4  ;;  %v2855_v36 = vshll.u32 %v8175_v21, %v2843_v4 }
 0x29b   : > { %v1247_v63 = vsub.s32 0, %v9817_v47  ;;  %v2856_v41 = vshrl.u32 %v8176_v23, %v2844_v28  ;;  %v2848_v33 = vor.u32 %v2847_v61, %v2846_v12  ;;  %vm2861_vm3 = vcmp.lt.s32.totalorder %v2842_v34, 1 }
 0x29c   : > { %v3017_v27 = vsel %vm2934_vm10, %v3016_v7, %v3015_v5  ;;  %v2851_v9 = vor.u32 %v2850_v10, %v2849_v39  ;;  %v2854_v11 = vor.u32 %v2853_v29, %v2852_v15  ;;  %vm1183_vm10 = vcmp.lt.s32.totalorder %v9629_v16, 0 }
 0x29d   : > { %v3020_v48 = vsel %vm9750_vm4, %v9548_v54, %v3017_v27  ;;  %v7408_v20 = vmin.u32 %v1247_v63, %v9817_v47  ;;  %v2857_v60 = vor.u32 %v2856_v41, %v2855_v36  ;;  %v2858_v58 = vshll.u32 %v8176_v23, %v2843_v4 }
 0x29e   : > { %8034 = vcosq.f32 %v3020_v48  ;;  %v2859_v45 = vshrl.u32 %v8177_v30, %v2844_v28  ;;  %vm2862_vm2 = vcmp.lt.s32.totalorder %v2842_v34, 2  ;;  %vm2863_vm5 = vcmp.lt.s32.totalorder %v2842_v34, 3 }
 0x29f   : > { %8036 = vsinq.f32 %v3020_v48  ;;  %v1249_v52 = vclz %v7408_v20  ;;  %vm2864_vm6 = vcmp.lt.s32.totalorder %v2842_v34, 4  ;;  %v2877_v14 = vshll.u32 %v2837_v22, 8 }
 0x2a0   : > { %v1267_v32 = vsub.s32 4, %v9805_v44  ;;  %v2860_v3 = vor.u32 %v2859_v45, %v2858_v58  ;;  %v2869_v62 = vsel %vm2861_vm3, %v2848_v33, %v2851_v9  ;;  %vm9844_vm4 = vcmp.le.f32.partialorder %v1181_v56, 0.7853982  ;;  %v9883_v58 = vpop.f32.mrf.mxu1 }
 0x2a1   : > { %v7409_v49 = vadd.s32 4294967294, %v1249_v52  ;;  %v2845_v26 = vshrl.u32 %v8172_v13, %v2844_v28  ;;  %v2866_v8 = vsel %vm2864_vm6, %v2854_v11, 2102212464  ;;  %v2870_v53 = vsel %vm2864_vm6, %v2857_v60, 920167782 }
 0x2a2   : > { %v2873_v24 = vsel %vm2861_vm3, %v2851_v9, %v2854_v11  ;;  %v2871_v2 = vsel %vm2863_vm5, %v2854_v11, %v2870_v53  ;;  %v2874_v6 = vsel %vm2864_vm6, %v2860_v3, 1326507024  ;;  %v1494_v59 = vshrl.u32 %v1493_v35, 23 }
 0x2a3   : > { %vm7410_vm7 = vcmp.lt.s32.totalorder %v7409_v49, 0  ;;  %v2865_v37 = vsel %vm2861_vm3, %v2845_v26, %v2848_v33  ;;  %v2872_v18 = vsel %vm2862_vm2, %v2869_v62, %v2871_v2  ;;  %v2875_v56 = vsel %vm2863_vm5, %v2857_v60, %v2874_v6 }
 0x2a4   : > { %v1252_v31 = vsel %vm7410_vm7, 0, %v7409_v49  ;;  %v2867_v55 = vsel %vm2863_vm5, %v2851_v9, %v2866_v8  ;;  %v2876_v0 = vsel %vm2862_vm2, %v2873_v24, %v2875_v56  ;;  %vm3026_vm8 = vcmp.lt.s32.totalorder %v9812_v43, 2 }
 0x2a5   : > { %v1253_v46 = vsub.s32 32, %v1252_v31  ;;  %v1257_v4 = vsub.s32 4294967266, %v1252_v31  ;;  %v9856_v50 = vmul.u32.u64.low %v2877_v14, %v2876_v0  ;;  %v9857_v28 = vmul.u32.u64.high %v2877_v14, %v2876_v0, %v9856_v50 }
 0x2a6   : > { %v9859_v5 = vmul.u32.u64.low %v2877_v14, %v2872_v18  ;;  %v9860_v22 = vmul.u32.u64.high %v2877_v14, %v2872_v18, %v9859_v5  ;;  %v1254_v61 = vshll.u32 %v9817_v47, %v1252_v31  ;;  %v7419_v10 = vadd.s32 4294967169, %v1494_v59 }
 0x2a7   : > { %v1255_v35 = vshrl.u32 %v1237_v1, %v1253_v46  ;;  %v1258_v7 = vadd.s32 127, %v1257_v4  ;;  %vm3024_vm9 = vweird.f32 %v9548_v54  ;;  %vm3027_vm11 = vcmp.eq.s32.totalorder %v9812_v43, 0 }
 0x2a8   : > { %vm3030_vm12 = vcmp.eq.s32.totalorder %v9812_v43, 2  ;;  %v1268_v29 = vsel %vm1183_vm10, %v1267_v32, %v9805_v44  ;;  %v2868_v63 = vsel %vm2862_vm2, %v2865_v37, %v2867_v55  ;;  %vm6378_vm13 = vcmp.lt.s32.totalorder %v9814_v40, 2 }
 0x2a9   : > { %v1256_v12 = vor.u32 %v1255_v35, %v1254_v61  ;;  %v1259_v39 = vshll.u32 %v1258_v7, 23  ;;  %v1500_v47 = vadd.s32 1, %v7419_v10  ;;  %vm6379_vm14 = vcmp.eq.s32.totalorder %v9814_v40, 0 }
 0x2aa   : > { %vm6382_vm15 = vcmp.eq.s32.totalorder %v9814_v40, 2  ;;  %vm2886_vm0 = vc.u32 %v9857_v28, %v9859_v5  ;;  %v2887_v1 = vadd.s32 1, %v9860_v22  ;;  %v1270_v44 = vsel %vm9844_vm4, 0, %v1268_v29 }
 0x2ab   : > { %v8035_v27 = vpop.eup %8034  ;;  %v1260_v15 = vor.u32 4788187, %v1259_v39  ;;  %v2884_v34 = vmul.u32 %v2877_v14, %v2868_v63  ;;  %vm1501_vm1 = vcmp.gt.s32.totalorder %v1500_v47, 0  ;;  %v1497_v20 = vand.u32 8388607, %v1490_v57 }
 0x2ac   : > { %v8037_v36 = vpop.eup %8036  ;;  %v3031_v41 = vxor.u32 2147483648, %v8035_v27  ;;  %v2888_v48 = vsel %vm2886_vm0, %v2887_v1, %v9860_v22  ;;  %v1502_v33 = vsel %vm1501_vm1, %v1500_v47, 0  ;;  %v1263_v60 = vcvt.s32.f32 %v1256_v12 }
 0x2ad   : > { %v3028_v9 = vxor.u32 2147483648, %v8037_v36  ;;  %v1261_v11 = vand.u32 2147483647, %v1260_v15  ;;  %v2889_v52 = vadd.s32 %v2888_v48, %v2884_v34  ;;  %v4608_v49 = vadd.s32 3, %v1270_v44 }
 0x2ae   : > { %v3032_v45 = vsel %vm3030_vm12, %v3031_v41, %v8037_v36  ;;  %v6384_v14 = vsel %vm6382_vm15, %v3031_v41, %v8037_v36  ;;  %v1504_v32 = vand.u32 31, %v1502_v33  ;;  %v3141_v6 = vand.u32 2139095040, %v9883_v58 }
 0x2af   : > { %v3029_v3 = vsel %vm3027_vm11, %v8035_v27, %v3028_v9  ;;  %v6381_v62 = vsel %vm6379_vm14, %v8035_v27, %v3028_v9  ;;  %v1264_v26 = vmul.f32 %v1263_v60, %v1261_v11  ;;  %v2890_v8 = vadd.s32 536870912, %v2889_v52 }
 0x2b0   : > { %v3033_v53 = vsel %vm3026_vm8, %v3029_v3, %v3032_v45  ;;  %v6385_v24 = vsel %vm6378_vm13, %v6381_v62, %v6384_v14  ;;  %v1505_v2 = vsub.s32 32, %v1504_v32  ;;  %v9908_v56 = vand.u32 3, %v1270_v44 }
 0x2b1   : > { %v3034_v59 = vsel %vm3024_vm9, nan, %v3033_v53  ;;  %v6386_v31 = vsel %vm3024_vm9, nan, %v6385_v24  ;;  %v1265_v37 = vxor.u32 2147483648, %v1264_v26  ;;  %v9902_v18 = vshrl.u32 %v2890_v8, 30 }
 0x2b2   : > { %3882 = vst [vmem:[%s8731_s22 + $0x170] sm:$0xff] %v3034_v59  ;;  %7242 = vst [vmem:[%s8731_s22 + $0x178] sm:$0xff] %v6386_v31  ;;  %v9910_v40 = vand.u32 3, %v4608_v49  ;;  %v1498_v54 = vor.u32 8388608, %v1497_v20  ;;  %v1508_v55 = vshrl.u32 %v8173_v17, %v1505_v2  ;;  %v1511_v0 = vshrl.u32 %v8174_v19, %v1505_v2 }
 0x2b3   : > { %v1266_v43 = vsel %vm1183_vm10, %v1265_v37, %v1264_v26  ;;  %v2892_v46 = vshll.u32 %v9902_v18, 30  ;;  %v1514_v22 = vshrl.u32 %v8175_v21, %v1505_v2  ;;  %v3142_v61 = vshrl.u32 %v3141_v6, 23 }
 0x2b4   : > { %v1269_v4 = vsel %vm9844_vm4, %v9629_v16, %v1266_v43  ;;  %v1507_v35 = vshll.u32 %v8172_v13, %v1504_v32  ;;  %v1510_v7 = vshll.u32 %v8173_v17, %v1504_v32  ;;  %v1517_v10 = vshrl.u32 %v8176_v23, %v1505_v2 }
 0x2b5   : > { %8038 = vcosq.f32 %v1269_v4  ;;  %v9918_v50 = vsub.s32 %v2889_v52, %v2892_v46  ;;  %v1503_v29 = vshrl.u32 %v1502_v33, 5  ;;  %v1513_v63 = vshll.u32 %v8174_v19, %v1504_v32 }
 0x2b6   : > { %8040 = vsinq.f32 %v1269_v4  ;;  %v1516_v12 = vshll.u32 %v8175_v21, %v1504_v32  ;;  %v1509_v39 = vor.u32 %v1508_v55, %v1507_v35  ;;  %v1512_v47 = vor.u32 %v1511_v0, %v1510_v7 }
 0x2b7   : > { %v2895_v38 = vsub.s32 0, %v9918_v50  ;;  %v1519_v1 = vshll.u32 %v8176_v23, %v1504_v32  ;;  %v1520_v27 = vshrl.u32 %v8177_v30, %v1505_v2  ;;  %v1515_v44 = vor.u32 %v1514_v22, %v1513_v63 }
 0x2b8   : > { %v1518_v34 = vor.u32 %v1517_v10, %v1516_v12  ;;  %v9930_v41 = vshll.u32 %v1498_v54, 8  ;;  %v3138_v48 = vand.u32 2147483647, %v9883_v58  ;;  %v2885_v20 = vadd.s32 %v9859_v5, %v9857_v28 }
 0x2b9   : > { %v7472_v15 = vmin.u32 %v2895_v38, %v9918_v50  ;;  %v1521_v36 = vor.u32 %v1520_v27, %v1519_v1  ;;  %vm1522_vm3 = vcmp.lt.s32.totalorder %v1503_v29, 1  ;;  %v7483_v9 = vadd.s32 4294967169, %v3142_v61 }
 0x2ba   : > { %vm1279_vm10 = vcmp.eq.s32.totalorder %v9908_v56, 2  ;;  %vm4614_vm2 = vcmp.eq.s32.totalorder %v9910_v40, 2  ;;  %v1506_v11 = vshrl.u32 %v8172_v13, %v1505_v2  ;;  %vm1523_vm5 = vcmp.lt.s32.totalorder %v1503_v29, 2 }
 0x2bb   : > { %v2897_v33 = vclz %v7472_v15  ;;  %vm1525_vm6 = vcmp.lt.s32.totalorder %v1503_v29, 4  ;;  %v1530_v60 = vsel %vm1522_vm3, %v1509_v39, %v1512_v47  ;;  %vm1276_vm4 = vcmp.eq.s32.totalorder %v9908_v56, 0 }
 0x2bc   : > { %vm4611_vm7 = vcmp.eq.s32.totalorder %v9910_v40, 0  ;;  %vm2831_vm8 = vcmp.lt.s32.totalorder %v9713_v51, 0  ;;  %vm1524_vm9 = vcmp.lt.s32.totalorder %v1503_v29, 3  ;;  %v1531_v5 = vsel %vm1525_vm6, %v1518_v34, 920167782 }
 0x2bd   : > { %v7473_v28 = vadd.s32 4294967294, %v2897_v33  ;;  %v1534_v52 = vsel %vm1522_vm3, %v1512_v47, %v1515_v44  ;;  %vm1275_vm11 = vcmp.lt.s32.totalorder %v9908_v56, 2  ;;  %vm4610_vm12 = vcmp.lt.s32.totalorder %v9910_v40, 2 }
 0x2be   : > { %v1526_v45 = vsel %vm1522_vm3, %v1506_v11, %v1509_v39  ;;  %v1527_v14 = vsel %vm1525_vm6, %v1515_v44, 2102212464  ;;  %v1532_v49 = vsel %vm1524_vm9, %v1515_v44, %v1531_v5  ;;  %v1535_v32 = vsel %vm1525_vm6, %v1521_v36, 1326507024 }
 0x2bf   : > { %vm1273_vm13 = vweird.f32 %v9629_v16  ;;  %vm7474_vm14 = vcmp.lt.s32.totalorder %v7473_v28, 0  ;;  %v1533_v3 = vsel %vm1523_vm5, %v1530_v60, %v1532_v49  ;;  %v1536_v62 = vsel %vm1524_vm9, %v1518_v34, %v1535_v32 }
 0x2c0   : > { %v3148_v26 = vadd.s32 1, %v7483_v9  ;;  %v2900_v8 = vsel %vm7474_vm14, 0, %v7473_v28  ;;  %v1537_v53 = vsel %vm1523_vm5, %v1534_v52, %v1536_v62  ;;  %v1528_v31 = vsel %vm1524_vm9, %v1512_v47, %v1527_v14 }
 0x2c1   : > { %v9952_v24 = vmul.u32.u64.low %v9930_v41, %v1533_v3  ;;  %v9953_v2 = vmul.u32.u64.high %v9930_v41, %v1533_v3, %v9952_v24  ;;  %v2901_v6 = vsub.s32 32, %v2900_v8  ;;  %v2905_v59 = vsub.s32 4294967266, %v2900_v8 }
 0x2c2   : > { %vm3149_vm15 = vcmp.gt.s32.totalorder %v3148_v26, 0  ;;  %v8039_v37 = vpop.eup %8038  ;;  %v2915_v43 = vsub.s32 4, %v9902_v18  ;;  %v9959_v46 = vmul.u32.u64.low %v9930_v41, %v1537_v53  ;;  %v9960_v4 = vmul.u32.u64.high %v9930_v41, %v1537_v53, %v9959_v46 }
 0x2c3   : > { %v3150_v54 = vsel %vm3149_vm15, %v3148_v26, 0  ;;  %v8041_v55 = vpop.eup %8040  ;;  %v1280_v0 = vxor.u32 2147483648, %v8039_v37  ;;  %v2902_v22 = vshll.u32 %v9918_v50, %v2900_v8  ;;  %v2903_v61 = vshrl.u32 %v2885_v20, %v2901_v6 }
 0x2c4   : > { %v2906_v35 = vadd.s32 127, %v2905_v59  ;;  %v1277_v7 = vxor.u32 2147483648, %v8041_v55  ;;  %v1529_v10 = vsel %vm1523_vm5, %v1526_v45, %v1528_v31  ;;  %v1548_v38 = vadd.s32 1, %v9953_v2 }
 0x2c5   : > { %v3152_v63 = vand.u32 31, %v3150_v54  ;;  %v1281_v12 = vsel %vm1279_vm10, %v1280_v0, %v8041_v55  ;;  %v4616_v39 = vsel %vm4614_vm2, %v1280_v0, %v8041_v55  ;;  %v2904_v47 = vor.u32 %v2903_v61, %v2902_v22 }
 0x2c6   : > { %v2907_v1 = vshll.u32 %v2906_v35, 23  ;;  %v1278_v50 = vsel %vm1276_vm4, %v8039_v37, %v1277_v7  ;;  %v4613_v29 = vsel %vm4611_vm7, %v8039_v37, %v1277_v7  ;;  %v2916_v27 = vsel %vm2831_vm8, %v2915_v43, %v9902_v18 }
 0x2c7   : > { %vm1547_vm0 = vc.u32 %v9960_v4, %v9952_v24  ;;  %v1282_v15 = vsel %vm1275_vm11, %v1278_v50, %v1281_v12  ;;  %v4617_v44 = vsel %vm4610_vm12, %v4613_v29, %v4616_v39  ;;  %v1545_v36 = vmul.u32 %v9930_v41, %v1529_v10 }
 0x2c8   : > { %v2908_v34 = vor.u32 4788187, %v2907_v1  ;;  %v1283_v20 = vsel %vm1273_vm13, nan, %v1282_v15  ;;  %v4618_v33 = vsel %vm1273_vm13, nan, %v4617_v44  ;;  %v1549_v18 = vsel %vm1547_vm0, %v1548_v38, %v9953_v2 }
 0x2c9   : > { %v3153_v9 = vsub.s32 32, %v3152_v63  ;;  %3865 = vst [vmem:[%s8731_s22 + $0x60] sm:$0xff] %v1283_v20  ;;  %7225 = vst [vmem:[%s8731_s22 + $0x68] sm:$0xff] %v4618_v33  ;;  %vm9992_vm1 = vcmp.le.f32.partialorder %v2829_v25, 0.7853982  ;;  %v2911_v11 = vcvt.s32.f32 %v2904_v47  ;;  %v1550_v41 = vadd.s32 %v1549_v18, %v1545_v36 }
 0x2ca   : > { %v2909_v40 = vand.u32 2147483647, %v2908_v34  ;;  %v2918_v60 = vsel %vm9992_vm1, 0, %v2916_v27  ;;  %v3145_v16 = vand.u32 8388607, %v3138_v48  ;;  %v10000_v28 = vshrl.u32 %v3150_v54, 5 }
 0x2cb   : > { %v3156_v5 = vshrl.u32 %v8173_v17, %v3153_v9  ;;  %v1551_v45 = vadd.s32 536870912, %v1550_v41  ;;  %v3159_v25 = vshrl.u32 %v8174_v19, %v3153_v9  ;;  %v3162_v14 = vshrl.u32 %v8175_v21, %v3153_v9 }
 0x2cc   : > { %v2912_v52 = vmul.f32 %v2911_v11, %v2909_v40  ;;  %v3155_v49 = vshll.u32 %v8172_v13, %v3152_v63  ;;  %v3158_v32 = vshll.u32 %v8173_v17, %v3152_v63  ;;  %v3164_v3 = vshll.u32 %v8175_v21, %v3152_v63 }
 0x2cd   : > { %v3165_v62 = vshrl.u32 %v8176_v23, %v3153_v9  ;;  %vm1492_vm3 = vcmp.lt.s32.totalorder %v9809_v42, 0  ;;  %v1552_v8 = vshrl.u32 %v1551_v45, 30  ;;  %v3161_v53 = vshll.u32 %v8174_v19, %v3152_v63 }
 0x2ce   : > { %v2913_v26 = vxor.u32 2147483648, %v2912_v52  ;;  %v3168_v2 = vshrl.u32 %v8177_v30, %v3153_v9  ;;  %v10012_v6 = vand.u32 3, %v2918_v60  ;;  %v3157_v59 = vor.u32 %v3156_v5, %v3155_v49 }
 0x2cf   : > { %v3166_v31 = vor.u32 %v3165_v62, %v3164_v3  ;;  %v3167_v37 = vshll.u32 %v8176_v23, %v3152_v63  ;;  %v1553_v46 = vshll.u32 %v1552_v8, 30  ;;  %v3160_v54 = vor.u32 %v3159_v25, %v3158_v32 }
 0x2d0   : > { %v2914_v43 = vsel %vm2831_vm8, %v2913_v26, %v2912_v52  ;;  %v3163_v55 = vor.u32 %v3162_v14, %v3161_v53  ;;  %v6272_v22 = vadd.s32 3, %v2918_v60  ;;  %v3146_v61 = vor.u32 8388608, %v3145_v16  ;;  %v10067_v53 = vpop.f32.mrf.mxu1 }
 0x2d1   : > { %v2917_v0 = vsel %vm9992_vm1, %v9713_v51, %v2914_v43  ;;  %v3169_v35 = vor.u32 %v3168_v2, %v3167_v37  ;;  %v10020_v7 = vsub.s32 %v1550_v41, %v1553_v46  ;;  %v3154_v10 = vshrl.u32 %v8172_v13, %v3153_v9  ;;  %v10041_v41 = vpop.f32.mrf.mxu0 }
 0x2d2   : > { %8042 = vcosq.f32 %v2917_v0  ;;  %vm3173_vm10 = vcmp.lt.s32.totalorder %v10000_v28, 4  ;;  %v1576_v38 = vsub.s32 4, %v1552_v8  ;;  %vm3170_vm2 = vcmp.lt.s32.totalorder %v10000_v28, 1 }
 0x2d3   : > { %8044 = vsinq.f32 %v2917_v0  ;;  %v3179_v63 = vsel %vm3173_vm10, %v3166_v31, 920167782  ;;  %v1556_v12 = vsub.s32 0, %v10020_v7  ;;  %vm3172_vm5 = vcmp.lt.s32.totalorder %v10000_v28, 3 }
 0x2d4   : > { %v3175_v39 = vsel %vm3173_vm10, %v3163_v55, 2102212464  ;;  %v3178_v47 = vsel %vm3170_vm2, %v3157_v59, %v3160_v54  ;;  %v10027_v1 = vand.u32 3, %v6272_v22  ;;  %v3180_v50 = vsel %vm3172_vm5, %v3163_v55, %v3179_v63 }
 0x2d5   : > { %v3182_v29 = vsel %vm3170_vm2, %v3160_v54, %v3163_v55  ;;  %v3183_v27 = vsel %vm3173_vm10, %v3169_v35, 1326507024  ;;  %v7420_v15 = vmin.u32 %v1556_v12, %v10020_v7  ;;  %vm3171_vm6 = vcmp.lt.s32.totalorder %v10000_v28, 2 }
 0x2d6   : > { %v3174_v44 = vsel %vm3170_vm2, %v3154_v10, %v3157_v59  ;;  %v3186_v34 = vshll.u32 %v3146_v61, 8  ;;  %v1577_v36 = vsel %vm1492_vm3, %v1576_v38, %v1552_v8  ;;  %v3176_v20 = vsel %vm3172_vm5, %v3160_v54, %v3175_v39 }
 0x2d7   : > { %v3181_v33 = vsel %vm3171_vm6, %v3178_v47, %v3180_v50  ;;  %v3184_v18 = vsel %vm3172_vm5, %v3166_v31, %v3183_v27  ;;  %v1558_v9 = vclz %v7420_v15  ;;  %vm10045_vm4 = vcmp.le.f32.partialorder %v1490_v57, 0.7853982 }
 0x2d8   : > { %v3185_v56 = vsel %vm3171_vm6, %v3182_v29, %v3184_v18  ;;  %v10037_v40 = vmul.u32.u64.low %v3186_v34, %v3181_v33  ;;  %v10038_v11 = vmul.u32.u64.high %v3186_v34, %v3181_v33, %v10037_v40  ;;  %vm2924_vm7 = vcmp.eq.s32.totalorder %v10012_v6, 0 }
 0x2d9   : > { %v7421_v16 = vadd.s32 4294967294, %v1558_v9  ;;  %v10050_v5 = vmul.u32.u64.low %v3186_v34, %v3185_v56  ;;  %v10051_v52 = vmul.u32.u64.high %v3186_v34, %v3185_v56, %v10050_v5  ;;  %vm2923_vm8 = vcmp.lt.s32.totalorder %v10012_v6, 2 }
 0x2da   : > { %vm2927_vm9 = vcmp.eq.s32.totalorder %v10012_v6, 2  ;;  %v1579_v45 = vsel %vm10045_vm4, 0, %v1577_v36  ;;  %v3177_v25 = vsel %vm3171_vm6, %v3174_v44, %v3176_v20  ;;  %v1390_v57 = vand.u32 2139095040, %v10041_v41 }
 0x2db   : > { %vm2921_vm11 = vweird.f32 %v9713_v51  ;;  %vm6274_vm12 = vcmp.lt.s32.totalorder %v10027_v1, 2  ;;  %vm6275_vm13 = vcmp.eq.s32.totalorder %v10027_v1, 0  ;;  %vm7422_vm14 = vcmp.lt.s32.totalorder %v7421_v16, 0 }
 0x2dc   : > { %v3196_v14 = vadd.s32 1, %v10038_v11  ;;  %vm6278_vm15 = vcmp.eq.s32.totalorder %v10027_v1, 2  ;;  %v1546_v49 = vadd.s32 %v9952_v24, %v9960_v4  ;;  %v1561_v32 = vsel %vm7422_vm14, 0, %v7421_v16 }
 0x2dd   : > { %v1391_v3 = vshrl.u32 %v1390_v57, 23  ;;  %v1562_v28 = vsub.s32 32, %v1561_v32  ;;  %v1566_v62 = vsub.s32 4294967266, %v1561_v32  ;;  %v4920_v26 = vadd.s32 3, %v1579_v45 }
 0x2de   : > { %v3193_v8 = vmul.u32 %v3186_v34, %v3177_v25  ;;  %v1563_v59 = vshll.u32 %v10020_v7, %v1561_v32  ;;  %vm3195_vm0 = vc.u32 %v10051_v52, %v10037_v40  ;;  %v1387_v31 = vand.u32 2147483647, %v10041_v41 }
 0x2df   : > { %v8043_v2 = vpop.eup %8042  ;;  %v7415_v37 = vadd.s32 4294967169, %v1391_v3  ;;  %v1564_v24 = vshrl.u32 %v1546_v49, %v1562_v28  ;;  %v1567_v4 = vadd.s32 127, %v1566_v62  ;;  %v3197_v54 = vsel %vm3195_vm0, %v3196_v14, %v10038_v11 }
 0x2e0   : > { %v8045_v43 = vpop.eup %8044  ;;  %v2928_v46 = vxor.u32 2147483648, %v8043_v2  ;;  %v3198_v0 = vadd.s32 %v3197_v54, %v3193_v8  ;;  %v3038_v61 = vand.u32 2139095040, %v10067_v53  ;;  %v1394_v27 = vand.u32 8388607, %v1387_v31 }
 0x2e1   : > { %v2925_v55 = vxor.u32 2147483648, %v8045_v43  ;;  %v1397_v22 = vadd.s32 1, %v7415_v37  ;;  %v1565_v10 = vor.u32 %v1564_v24, %v1563_v59  ;;  %v1568_v38 = vshll.u32 %v1567_v4, 23 }
 0x2e2   : > { %v2929_v35 = vsel %vm2927_vm9, %v2928_v46, %v8045_v43  ;;  %v6280_v7 = vsel %vm6278_vm15, %v2928_v46, %v8045_v43  ;;  %v3199_v39 = vadd.s32 536870912, %v3198_v0  ;;  %v3039_v18 = vshrl.u32 %v3038_v61, 23 }
 0x2e3   : > { %v2926_v63 = vsel %vm2924_vm7, %v8043_v2, %v2925_v55  ;;  %v6277_v12 = vsel %vm6275_vm13, %v8043_v2, %v2925_v55  ;;  %vm1398_vm1 = vcmp.gt.s32.totalorder %v1397_v22, 0  ;;  %v1569_v29 = vor.u32 4788187, %v1568_v38 }
 0x2e4   : > { %v2930_v47 = vsel %vm2923_vm8, %v2926_v63, %v2929_v35  ;;  %v6281_v50 = vsel %vm6274_vm12, %v6277_v12, %v6280_v7  ;;  %v3200_v34 = vshrl.u32 %v3199_v39, 30  ;;  %v1399_v36 = vsel %vm1398_vm1, %v1397_v22, 0 }
 0x2e5   : > { %v2931_v15 = vsel %vm2921_vm11, nan, %v2930_v47  ;;  %v6282_v44 = vsel %vm2921_vm11, nan, %v6281_v50  ;;  %v1570_v20 = vand.u32 2147483647, %v1569_v29  ;;  %v1572_v6 = vcvt.s32.f32 %v1565_v10 }
 0x2e6   : > { %3881 = vst [vmem:[%s8731_s22 + $0x160] sm:$0xff] %v2931_v15  ;;  %7241 = vst [vmem:[%s8731_s22 + $0x168] sm:$0xff] %v6282_v44  ;;  %v1401_v33 = vand.u32 31, %v1399_v36  ;;  %v3201_v1 = vshll.u32 %v3200_v34, 30  ;;  %v10095_v11 = vand.u32 3, %v1579_v45  ;;  %v10097_v16 = vand.u32 3, %v4920_v26 }
 0x2e7   : > { %v1573_v9 = vmul.f32 %v1572_v6, %v1570_v20  ;;  %v3035_v51 = vand.u32 2147483647, %v10067_v53  ;;  %v1395_v57 = vor.u32 8388608, %v1394_v27  ;;  %v7479_v49 = vadd.s32 4294967169, %v3039_v18 }
 0x2e8   : > { %v1402_v56 = vsub.s32 32, %v1401_v33  ;;  %v10099_v5 = vsub.s32 %v3198_v0, %v3201_v1  ;;  %vm3140_vm10 = vcmp.lt.s32.totalorder %v9883_v58, 0  ;;  %v1400_v3 = vshrl.u32 %v1399_v36, 5 }
 0x2e9   : > { %v1574_v25 = vxor.u32 2147483648, %v1573_v9  ;;  %v1404_v28 = vshll.u32 %v8172_v13, %v1401_v33  ;;  %v1407_v26 = vshll.u32 %v8173_v17, %v1401_v33  ;;  %v1410_v43 = vshll.u32 %v8174_v19, %v1401_v33 }
 0x2ea   : > { %v1405_v14 = vshrl.u32 %v8173_v17, %v1402_v56  ;;  %v3204_v32 = vsub.s32 0, %v10099_v5  ;;  %v1408_v45 = vshrl.u32 %v8174_v19, %v1402_v56  ;;  %v1411_v8 = vshrl.u32 %v8175_v21, %v1402_v56 }
 0x2eb   : > { %v1575_v62 = vsel %vm1492_vm3, %v1574_v25, %v1573_v9  ;;  %v1414_v2 = vshrl.u32 %v8176_v23, %v1402_v56  ;;  %v1413_v46 = vshll.u32 %v8175_v21, %v1401_v33  ;;  %v3194_v24 = vadd.s32 %v10037_v40, %v10051_v52 }
 0x2ec   : > { %v1578_v59 = vsel %vm10045_vm4, %v9809_v42, %v1575_v62  ;;  %v7484_v37 = vmin.u32 %v3204_v32, %v10099_v5  ;;  %v1406_v4 = vor.u32 %v1405_v14, %v1404_v28  ;;  %v1409_v54 = vor.u32 %v1408_v45, %v1407_v26 }
 0x2ed   : > { %8046 = vcosq.f32 %v1578_v59  ;;  %v1412_v0 = vor.u32 %v1411_v8, %v1410_v43  ;;  %v1415_v22 = vor.u32 %v1414_v2, %v1413_v46  ;;  %v3224_v61 = vsub.s32 4, %v3200_v34 }
 0x2ee   : > { %8048 = vsinq.f32 %v1578_v59  ;;  %v3206_v55 = vclz %v7484_v37  ;;  %v1403_v60 = vshrl.u32 %v8172_v13, %v1402_v56  ;;  %v10121_v35 = vshll.u32 %v1395_v57, 8 }
 0x2ef   : > { %v3045_v7 = vadd.s32 1, %v7479_v49  ;;  %v1416_v38 = vshll.u32 %v8176_v23, %v1401_v33  ;;  %v1417_v63 = vshrl.u32 %v8177_v30, %v1402_v56  ;;  %vm1419_vm3 = vcmp.lt.s32.totalorder %v1400_v3, 1 }
 0x2f0   : > { %v7485_v10 = vadd.s32 4294967294, %v3206_v55  ;;  %vm10127_vm2 = vcmp.le.f32.partialorder %v3138_v48, 0.7853982  ;;  %vm1421_vm5 = vcmp.lt.s32.totalorder %v1400_v3, 3  ;;  %vm1422_vm6 = vcmp.lt.s32.totalorder %v1400_v3, 4 }
 0x2f1   : > { %v1423_v52 = vsel %vm1419_vm3, %v1403_v60, %v1406_v4  ;;  %v1427_v12 = vsel %vm1419_vm3, %v1406_v4, %v1409_v54  ;;  %v1418_v39 = vor.u32 %v1417_v63, %v1416_v38  ;;  %v1424_v47 = vsel %vm1422_vm6, %v1412_v0, 2102212464 }
 0x2f2   : > { %vm7486_vm4 = vcmp.lt.s32.totalorder %v7485_v10, 0  ;;  %v1428_v50 = vsel %vm1422_vm6, %v1415_v22, 920167782  ;;  %v3225_v27 = vsel %vm3140_vm10, %v3224_v61, %v3200_v34  ;;  %v1425_v48 = vsel %vm1421_vm5, %v1409_v54, %v1424_v47 }
 0x2f3   : > { %v3209_v29 = vsel %vm7486_vm4, 0, %v7485_v10  ;;  %v1429_v15 = vsel %vm1421_vm5, %v1412_v0, %v1428_v50  ;;  %vm1420_vm7 = vcmp.lt.s32.totalorder %v1400_v3, 2  ;;  %v1431_v20 = vsel %vm1419_vm3, %v1409_v54, %v1412_v0 }
 0x2f4   : > { %v3210_v44 = vsub.s32 32, %v3209_v29  ;;  %v3214_v36 = vsub.s32 4294967266, %v3209_v29  ;;  %vm1585_vm8 = vcmp.eq.s32.totalorder %v10095_v11, 0  ;;  %v3211_v6 = vshll.u32 %v10099_v5, %v3209_v29 }
 0x2f5   : > { %v1426_v33 = vsel %vm1420_vm7, %v1423_v52, %v1425_v48  ;;  %v1430_v18 = vsel %vm1420_vm7, %v1427_v12, %v1429_v15  ;;  %v1432_v1 = vsel %vm1422_vm6, %v1418_v39, 1326507024  ;;  %vm1584_vm9 = vcmp.lt.s32.totalorder %v10095_v11, 2 }
 0x2f6   : > { %v3212_v34 = vshrl.u32 %v3194_v24, %v3210_v44  ;;  %v3215_v9 = vadd.s32 127, %v3214_v36  ;;  %v1433_v56 = vsel %vm1421_vm5, %v1415_v22, %v1432_v1  ;;  %vm3046_vm11 = vcmp.gt.s32.totalorder %v3045_v7, 0 }
 0x2f7   : > { %vm1582_vm12 = vweird.f32 %v9809_v42  ;;  %v1434_v25 = vsel %vm1420_vm7, %v1431_v20, %v1433_v56  ;;  %v10147_v57 = vmul.u32.u64.low %v10121_v35, %v1430_v18  ;;  %v10148_v14 = vmul.u32.u64.high %v10121_v35, %v1430_v18, %v10147_v57 }
 0x2f8   : > { %v3047_v5 = vsel %vm3046_vm11, %v3045_v7, 0  ;;  %v3213_v49 = vor.u32 %v3212_v34, %v3211_v6  ;;  %v3216_v32 = vshll.u32 %v3215_v9, 23  ;;  %vm1588_vm13 = vcmp.eq.s32.totalorder %v10095_v11, 2 }
 0x2f9   : > { %v10152_v28 = vmul.u32.u64.low %v10121_v35, %v1434_v25  ;;  %v10153_v45 = vmul.u32.u64.high %v10121_v35, %v1434_v25, %v10152_v28  ;;  %vm4922_vm14 = vcmp.lt.s32.totalorder %v10097_v16, 2  ;;  %vm4923_vm15 = vcmp.eq.s32.totalorder %v10097_v16, 0 }
 0x2fa   : > { %v3049_v3 = vand.u32 31, %v3047_v5  ;;  %v8047_v62 = vpop.eup %8046  ;;  %vm4926_vm0 = vcmp.eq.s32.totalorder %v10097_v16, 2  ;;  %v3217_v26 = vor.u32 4788187, %v3216_v32  ;;  %v3227_v8 = vsel %vm10127_vm2, 0, %v3225_v27 }
 0x2fb   : > { %v3042_v2 = vand.u32 8388607, %v3035_v51  ;;  %v8049_v59 = vpop.eup %8048  ;;  %v1589_v37 = vxor.u32 2147483648, %v8047_v62  ;;  %v1442_v43 = vmul.u32 %v10121_v35, %v1426_v33  ;;  %v1445_v46 = vadd.s32 1, %v10148_v14 }
 0x2fc   : > { %v3050_v24 = vsub.s32 32, %v3049_v3  ;;  %v1586_v4 = vxor.u32 2147483648, %v8049_v59  ;;  %v3218_v54 = vand.u32 2147483647, %v3217_v26  ;;  %v3220_v55 = vcvt.s32.f32 %v3213_v49 }
 0x2fd   : > { %vm1444_vm1 = vc.u32 %v10153_v45, %v10147_v57  ;;  %v1590_v0 = vsel %vm1588_vm13, %v1589_v37, %v8049_v59  ;;  %v4928_v22 = vsel %vm4926_vm0, %v1589_v37, %v8049_v59  ;;  %v6584_v61 = vadd.s32 3, %v3227_v8 }
 0x2fe   : > { %v1446_v60 = vsel %vm1444_vm1, %v1445_v46, %v10148_v14  ;;  %v1587_v35 = vsel %vm1585_vm8, %v8047_v62, %v1586_v4  ;;  %v4925_v7 = vsel %vm4923_vm15, %v8047_v62, %v1586_v4  ;;  %v3221_v10 = vmul.f32 %v3220_v55, %v3218_v54  ;;  %v10205_v62 = vpop.f32.mrf.mxu0 }
 0x2ff   : > { %v1447_v38 = vadd.s32 %v1446_v60, %v1442_v43  ;;  %v1591_v63 = vsel %vm1584_vm9, %v1587_v35, %v1590_v0  ;;  %v4929_v52 = vsel %vm4922_vm14, %v4925_v7, %v4928_v22  ;;  %v3043_v12 = vor.u32 8388608, %v3042_v2 }
 0x300   : > { %v3053_v39 = vshrl.u32 %v8173_v17, %v3050_v24  ;;  %v1592_v47 = vsel %vm1582_vm12, nan, %v1591_v63  ;;  %v4930_v50 = vsel %vm1582_vm12, nan, %v4929_v52  ;;  %v3222_v29 = vxor.u32 2147483648, %v3221_v10 }
 0x301   : > { %v1448_v27 = vadd.s32 536870912, %v1447_v38  ;;  %3868 = vst [vmem:[%s8731_s22 + $0x90] sm:$0xff] %v1592_v47  ;;  %7228 = vst [vmem:[%s8731_s22 + $0x98] sm:$0xff] %v4930_v50  ;;  %v3052_v48 = vshll.u32 %v8172_v13, %v3049_v3  ;;  %v3055_v11 = vshll.u32 %v8173_v17, %v3049_v3  ;;  %v3056_v16 = vshrl.u32 %v8174_v19, %v3050_v24 }
 0x302   : > { %v3059_v15 = vshrl.u32 %v8175_v21, %v3050_v24  ;;  %v3223_v44 = vsel %vm3140_vm10, %v3222_v29, %v3221_v10  ;;  %v3058_v20 = vshll.u32 %v8174_v19, %v3049_v3  ;;  %v3062_v42 = vshrl.u32 %v8176_v23, %v3050_v24 }
 0x303   : > { %v1449_v36 = vshrl.u32 %v1448_v27, 30  ;;  %v3226_v6 = vsel %vm10127_vm2, %v9883_v58, %v3223_v44  ;;  %v3048_v33 = vshrl.u32 %v3047_v5, 5  ;;  %v3054_v18 = vor.u32 %v3053_v39, %v3052_v48 }
 0x304   : > { %v3061_v1 = vshll.u32 %v8175_v21, %v3049_v3  ;;  %8050 = vcosq.f32 %v3226_v6  ;;  %v3057_v9 = vor.u32 %v3056_v16, %v3055_v11  ;;  %v3060_v56 = vor.u32 %v3059_v15, %v3058_v20 }
 0x305   : > { %v1450_v34 = vshll.u32 %v1449_v36, 30  ;;  %8052 = vsinq.f32 %v3226_v6  ;;  %v3064_v14 = vshll.u32 %v8176_v23, %v3049_v3  ;;  %v3065_v49 = vshrl.u32 %v8177_v30, %v3050_v24 }
 0x306   : > { %v3063_v25 = vor.u32 %v3062_v42, %v3061_v1  ;;  %v10201_v28 = vand.u32 3, %v3227_v8  ;;  %v10203_v40 = vand.u32 3, %v6584_v61  ;;  %vm1389_vm10 = vcmp.lt.s32.totalorder %v10041_v41, 0 }
 0x307   : > { %v10199_v32 = vsub.s32 %v1447_v38, %v1450_v34  ;;  %v3066_v5 = vor.u32 %v3065_v49, %v3064_v14  ;;  %vm3067_vm3 = vcmp.lt.s32.totalorder %v3048_v33, 1  ;;  %vm3070_vm2 = vcmp.lt.s32.totalorder %v3048_v33, 4 }
 0x308   : > { %v10209_v2 = vshll.u32 %v3043_v12, 8  ;;  %v3051_v3 = vshrl.u32 %v8172_v13, %v3050_v24  ;;  %v3072_v59 = vsel %vm3070_vm2, %v3060_v56, 2102212464  ;;  %v3075_v37 = vsel %vm3067_vm3, %v3054_v18, %v3057_v9 }
 0x309   : > { %v1453_v26 = vsub.s32 0, %v10199_v32  ;;  %v3076_v43 = vsel %vm3070_vm2, %v3063_v25, 920167782  ;;  %vm3069_vm5 = vcmp.lt.s32.totalorder %v3048_v33, 3  ;;  %v3079_v46 = vsel %vm3067_vm3, %v3057_v9, %v3060_v56 }
 0x30a   : > { %v1699_v4 = vand.u32 2139095040, %v10205_v62  ;;  %vm3068_vm6 = vcmp.lt.s32.totalorder %v3048_v33, 2  ;;  %v3071_v54 = vsel %vm3067_vm3, %v3051_v3, %v3054_v18  ;;  %v3077_v55 = vsel %vm3069_vm5, %v3060_v56, %v3076_v43 }
 0x30b   : > { %v7416_v8 = vmin.u32 %v1453_v26, %v10199_v32  ;;  %v3080_v0 = vsel %vm3070_vm2, %v3066_v5, 1326507024  ;;  %v3073_v61 = vsel %vm3069_vm5, %v3057_v9, %v3072_v59  ;;  %v3078_v60 = vsel %vm3068_vm6, %v3075_v37, %v3077_v55  ;;  %v10272_v55 = vpop.f32.mrf.mxu1 }
 0x30c   : > { %v3081_v35 = vsel %vm3069_vm5, %v3063_v25, %v3080_v0  ;;  %vm3232_vm4 = vcmp.lt.s32.totalorder %v10201_v28, 2  ;;  %vm3233_vm7 = vcmp.eq.s32.totalorder %v10201_v28, 0  ;;  %vm3236_vm8 = vcmp.eq.s32.totalorder %v10201_v28, 2 }
 0x30d   : > { %v1455_v22 = vclz %v7416_v8  ;;  %v1473_v24 = vsub.s32 4, %v1449_v36  ;;  %v3082_v7 = vsel %vm3068_vm6, %v3079_v46, %v3081_v35  ;;  %vm3230_vm9 = vweird.f32 %v9883_v58 }
 0x30e   : > { %v10221_v38 = vmul.u32.u64.low %v10209_v2, %v3082_v7  ;;  %v10222_v63 = vmul.u32.u64.high %v10209_v2, %v3082_v7, %v10221_v38  ;;  %v1700_v52 = vshrl.u32 %v1699_v4, 23  ;;  %vm6586_vm11 = vcmp.lt.s32.totalorder %v10203_v40, 2 }
 0x30f   : > { %v7417_v10 = vadd.s32 4294967294, %v1455_v22  ;;  %v3074_v12 = vsel %vm3068_vm6, %v3071_v54, %v3073_v61  ;;  %v10227_v39 = vmul.u32.u64.low %v10209_v2, %v3078_v60  ;;  %v10228_v47 = vmul.u32.u64.high %v10209_v2, %v3078_v60, %v10227_v39 }
 0x310   : > { %vm6587_vm12 = vcmp.eq.s32.totalorder %v10203_v40, 0  ;;  %vm6590_vm13 = vcmp.eq.s32.totalorder %v10203_v40, 2  ;;  %v1696_v50 = vand.u32 2147483647, %v10205_v62  ;;  %v1443_v27 = vadd.s32 %v10147_v57, %v10153_v45 }
 0x311   : > { %vm7418_vm14 = vcmp.lt.s32.totalorder %v7417_v10, 0  ;;  %v8051_v29 = vpop.eup %8050  ;;  %v1474_v11 = vsel %vm1389_vm10, %v1473_v24, %v1449_v36  ;;  %v7427_v16 = vadd.s32 4294967169, %v1700_v52  ;;  %v3090_v6 = vmul.u32 %v10209_v2, %v3074_v12 }
 0x312   : > { %v1458_v48 = vsel %vm7418_vm14, 0, %v7417_v10  ;;  %v8053_v15 = vpop.eup %8052  ;;  %v3237_v44 = vxor.u32 2147483648, %v8051_v29  ;;  %vm3092_vm15 = vc.u32 %v10222_v63, %v10227_v39  ;;  %v3093_v1 = vadd.s32 1, %v10228_v47 }
 0x313   : > { %v1459_v20 = vsub.s32 32, %v1458_v48  ;;  %v1463_v42 = vsub.s32 4294967266, %v1458_v48  ;;  %v3234_v33 = vxor.u32 2147483648, %v8053_v15  ;;  %v1460_v18 = vshll.u32 %v10199_v32, %v1458_v48 }
 0x314   : > { %v3238_v57 = vsel %vm3236_vm8, %v3237_v44, %v8053_v15  ;;  %v6592_v45 = vsel %vm6590_vm13, %v3237_v44, %v8053_v15  ;;  %v3094_v25 = vsel %vm3092_vm15, %v3093_v1, %v10228_v47  ;;  %v1706_v14 = vadd.s32 1, %v7427_v16 }
 0x315   : > { %v1461_v36 = vshrl.u32 %v1443_v27, %v1459_v20  ;;  %v1464_v34 = vadd.s32 127, %v1463_v42  ;;  %v3235_v9 = vsel %vm3233_vm7, %v8051_v29, %v3234_v33  ;;  %v6589_v56 = vsel %vm6587_vm12, %v8051_v29, %v3234_v33 }
 0x316   : > { %v3239_v49 = vsel %vm3232_vm4, %v3235_v9, %v3238_v57  ;;  %v6593_v32 = vsel %vm6586_vm11, %v6589_v56, %v6592_v45  ;;  %v3095_v59 = vadd.s32 %v3094_v25, %v3090_v6  ;;  %vm1707_vm0 = vcmp.gt.s32.totalorder %v1706_v14, 0 }
 0x317   : > { %v1462_v5 = vor.u32 %v1461_v36, %v1460_v18  ;;  %v1465_v26 = vshll.u32 %v1464_v34, 23  ;;  %v3240_v2 = vsel %vm3230_vm9, nan, %v3239_v49  ;;  %v6594_v3 = vsel %vm3230_vm9, nan, %v6593_v32 }
 0x318   : > { %3884 = vst [vmem:[%s8731_s22 + $0x190] sm:$0xff] %v3240_v2  ;;  %7244 = vst [vmem:[%s8731_s22 + $0x198] sm:$0xff] %v6594_v3  ;;  %v1708_v43 = vsel %vm1707_vm0, %v1706_v14, 0  ;;  %vm10264_vm1 = vcmp.le.f32.partialorder %v1387_v31, 0.7853982  ;;  %v3096_v40 = vadd.s32 536870912, %v3095_v59  ;;  %vm1479_vm12 = vweird.f32 %v10041_v41 }
 0x319   : > { %v1466_v37 = vor.u32 4788187, %v1465_v26  ;;  %v1703_v8 = vand.u32 8388607, %v1696_v50  ;;  %v1710_v46 = vand.u32 31, %v1708_v43  ;;  %v1469_v58 = vcvt.s32.f32 %v1462_v5 }
 0x31a   : > { %v1476_v54 = vsel %vm10264_vm1, 0, %v1474_v11  ;;  %v10274_v0 = vshrl.u32 %v3096_v40, 30  ;;  %v3347_v24 = vand.u32 2139095040, %v10272_v55  ;;  %v10283_v47 = vshrl.u32 %v1708_v43, 5 }
 0x31b   : > { %v1467_v4 = vand.u32 2147483647, %v1466_v37  ;;  %v1711_v22 = vsub.s32 32, %v1710_v46  ;;  %v4816_v31 = vadd.s32 3, %v1476_v54  ;;  %v1704_v35 = vor.u32 8388608, %v1703_v8 }
 0x31c   : > { %v3098_v60 = vshll.u32 %v10274_v0, 30  ;;  %v1713_v29 = vshll.u32 %v8172_v13, %v1710_v46  ;;  %v1716_v11 = vshll.u32 %v8173_v17, %v1710_v46  ;;  %v1719_v16 = vshll.u32 %v8174_v19, %v1710_v46 }
 0x31d   : > { %v1470_v61 = vmul.f32 %v1469_v58, %v1467_v4  ;;  %v1714_v10 = vshrl.u32 %v8173_v17, %v1711_v22  ;;  %v1717_v38 = vshrl.u32 %v8174_v19, %v1711_v22  ;;  %v1720_v52 = vshrl.u32 %v8175_v21, %v1711_v22 }
 0x31e   : > { %v10281_v12 = vsub.s32 %v3095_v59, %v3098_v60  ;;  %v1723_v27 = vshrl.u32 %v8176_v23, %v1711_v22  ;;  %v1726_v15 = vshrl.u32 %v8177_v30, %v1711_v22  ;;  %v1722_v42 = vshll.u32 %v8175_v21, %v1710_v46 }
 0x31f   : > { %v1471_v7 = vxor.u32 2147483648, %v1470_v61  ;;  %v1725_v6 = vshll.u32 %v8176_v23, %v1710_v46  ;;  %v1715_v33 = vor.u32 %v1714_v10, %v1713_v29  ;;  %v1718_v18 = vor.u32 %v1717_v38, %v1716_v11 }
 0x320   : > { %v3101_v20 = vsub.s32 0, %v10281_v12  ;;  %v1721_v1 = vor.u32 %v1720_v52, %v1719_v16  ;;  %v10298_v57 = vand.u32 3, %v1476_v54  ;;  %v1724_v36 = vor.u32 %v1723_v27, %v1722_v42 }
 0x321   : > { %v1472_v48 = vsel %vm1389_vm10, %v1471_v7, %v1470_v61  ;;  %v10301_v34 = vand.u32 3, %v4816_v31  ;;  %v1727_v9 = vor.u32 %v1726_v15, %v1725_v6  ;;  %v10303_v56 = vshll.u32 %v1704_v35, 8 }
 0x322   : > { %v1475_v44 = vsel %vm10264_vm1, %v10041_v41, %v1472_v48  ;;  %v7480_v45 = vmin.u32 %v3101_v20, %v10281_v12  ;;  %v3348_v25 = vshrl.u32 %v3347_v24, 23  ;;  %vm3037_vm10 = vcmp.lt.s32.totalorder %v10067_v53, 0 }
 0x323   : > { %8054 = vcosq.f32 %v1475_v44  ;;  %v3121_v49 = vsub.s32 4, %v10274_v0  ;;  %vm1728_vm3 = vcmp.lt.s32.totalorder %v10283_v47, 1  ;;  %vm1731_vm2 = vcmp.lt.s32.totalorder %v10283_v47, 4 }
 0x324   : > { %8056 = vsinq.f32 %v1475_v44  ;;  %v3103_v14 = vclz %v7480_v45  ;;  %v1712_v32 = vshrl.u32 %v8172_v13, %v1711_v22  ;;  %vm1729_vm5 = vcmp.lt.s32.totalorder %v10283_v47, 2 }
 0x325   : > { %v1733_v5 = vsel %vm1731_vm2, %v1721_v1, 2102212464  ;;  %v1736_v26 = vsel %vm1728_vm3, %v1715_v33, %v1718_v18  ;;  %vm1730_vm6 = vcmp.lt.s32.totalorder %v10283_v47, 3  ;;  %v1737_v3 = vsel %vm1731_vm2, %v1724_v36, 920167782 }
 0x326   : > { %v7481_v2 = vadd.s32 4294967294, %v3103_v14  ;;  %v1740_v59 = vsel %vm1728_vm3, %v1718_v18, %v1721_v1  ;;  %vm10314_vm4 = vcmp.le.f32.partialorder %v3035_v51, 0.7853982  ;;  %v1732_v43 = vsel %vm1728_vm3, %v1712_v32, %v1715_v33 }
 0x327   : > { %v1738_v28 = vsel %vm1730_vm6, %v1721_v1, %v1737_v3  ;;  %v1741_v40 = vsel %vm1731_vm2, %v1727_v9, 1326507024  ;;  %v7491_v8 = vadd.s32 4294967169, %v3348_v25  ;;  %v1734_v46 = vsel %vm1730_vm6, %v1718_v18, %v1733_v5 }
 0x328   : > { %vm7482_vm7 = vcmp.lt.s32.totalorder %v7481_v2, 0  ;;  %v1739_v4 = vsel %vm1729_vm5, %v1736_v26, %v1738_v28  ;;  %v1742_v58 = vsel %vm1730_vm6, %v1724_v36, %v1741_v40  ;;  %vm1482_vm8 = vcmp.eq.s32.totalorder %v10298_v57, 0 }
 0x329   : > { %v3106_v54 = vsel %vm7482_vm7, 0, %v7481_v2  ;;  %v1743_v22 = vsel %vm1729_vm5, %v1740_v59, %v1742_v58  ;;  %v10324_v51 = vmul.u32.u64.low %v10303_v56, %v1739_v4  ;;  %v10325_v61 = vmul.u32.u64.high %v10303_v56, %v1739_v4, %v10324_v51 }
 0x32a   : > { %vm1481_vm9 = vcmp.lt.s32.totalorder %v10298_v57, 2  ;;  %vm1485_vm11 = vcmp.eq.s32.totalorder %v10298_v57, 2  ;;  %v3091_v31 = vadd.s32 %v10227_v39, %v10222_v63  ;;  %v3107_v60 = vsub.s32 32, %v3106_v54 }
 0x32b   : > { %v3111_v35 = vsub.s32 4294967266, %v3106_v54  ;;  %vm4818_vm13 = vcmp.lt.s32.totalorder %v10301_v34, 2  ;;  %v10335_v24 = vmul.u32.u64.low %v10303_v56, %v1743_v22  ;;  %v10336_v7 = vmul.u32.u64.high %v10303_v56, %v1743_v22, %v10335_v24 }
 0x32c   : > { %v3354_v10 = vadd.s32 1, %v7491_v8  ;;  %v3108_v38 = vshll.u32 %v10281_v12, %v3106_v54  ;;  %v3109_v52 = vshrl.u32 %v3091_v31, %v3107_v60  ;;  %v1735_v27 = vsel %vm1729_vm5, %v1732_v43, %v1734_v46  ;;  %v10368_v43 = vpop.f32.mrf.mxu0 }
 0x32d   : > { %v3112_v29 = vadd.s32 127, %v3111_v35  ;;  %vm4819_vm14 = vcmp.eq.s32.totalorder %v10301_v34, 0  ;;  %v3122_v63 = vsel %vm3037_vm10, %v3121_v49, %v10274_v0  ;;  %v1754_v39 = vadd.s32 1, %v10325_v61 }
 0x32e   : > { %vm3355_vm15 = vcmp.gt.s32.totalorder %v3354_v10, 0  ;;  %vm4822_vm0 = vcmp.eq.s32.totalorder %v10301_v34, 2  ;;  %v3110_v11 = vor.u32 %v3109_v52, %v3108_v38  ;;  %v1751_v47 = vmul.u32 %v10303_v56, %v1735_v27 }
 0x32f   : > { %v3113_v16 = vshll.u32 %v3112_v29, 23  ;;  %v3356_v12 = vsel %vm3355_vm15, %v3354_v10, 0  ;;  %vm1753_vm1 = vc.u32 %v10336_v7, %v10324_v51  ;;  %v3344_v20 = vand.u32 2147483647, %v10272_v55 }
 0x330   : > { %v8055_v48 = vpop.eup %8054  ;;  %v3124_v6 = vsel %vm10314_vm4, 0, %v3122_v63  ;;  %v1755_v33 = vsel %vm1753_vm1, %v1754_v39, %v10325_v61  ;;  %v3358_v36 = vand.u32 31, %v3356_v12  ;;  %v3117_v14 = vcvt.s32.f32 %v3110_v11 }
 0x331   : > { %v8057_v15 = vpop.eup %8056  ;;  %v1486_v44 = vxor.u32 2147483648, %v8055_v48  ;;  %v3114_v0 = vor.u32 4788187, %v3113_v16  ;;  %v1756_v45 = vadd.s32 %v1755_v33, %v1751_v47  ;;  %v3351_v57 = vand.u32 8388607, %v3344_v20 }
 0x332   : > { %v1483_v42 = vxor.u32 2147483648, %v8057_v15  ;;  %v3359_v26 = vsub.s32 32, %v3358_v36  ;;  %v6480_v8 = vadd.s32 3, %v3124_v6  ;;  %v3357_v58 = vshrl.u32 %v3356_v12, 5 }
 0x333   : > { %v1487_v18 = vsel %vm1485_vm11, %v1486_v44, %v8057_v15  ;;  %v4824_v1 = vsel %vm4822_vm0, %v1486_v44, %v8057_v15  ;;  %v3115_v25 = vand.u32 2147483647, %v3114_v0  ;;  %v1757_v5 = vadd.s32 536870912, %v1756_v45 }
 0x334   : > { %v1484_v9 = vsel %vm1482_vm8, %v8055_v48, %v1483_v42  ;;  %v4821_v56 = vsel %vm4819_vm14, %v8055_v48, %v1483_v42  ;;  %v3362_v34 = vshrl.u32 %v8173_v17, %v3359_v26  ;;  %v3365_v46 = vshrl.u32 %v8174_v19, %v3359_v26 }
 0x335   : > { %v1488_v49 = vsel %vm1481_vm9, %v1484_v9, %v1487_v18  ;;  %v4825_v32 = vsel %vm4818_vm13, %v4821_v56, %v4824_v1  ;;  %v3118_v59 = vmul.f32 %v3117_v14, %v3115_v25  ;;  %v10372_v28 = vshrl.u32 %v1757_v5, 30 }
 0x336   : > { %v1489_v2 = vsel %vm1479_vm12, nan, %v1488_v49  ;;  %v4826_v3 = vsel %vm1479_vm12, nan, %v4825_v32  ;;  %v3368_v4 = vshrl.u32 %v8175_v21, %v3359_v26  ;;  %v3361_v54 = vshll.u32 %v8172_v13, %v3358_v36 }
 0x337   : > { %3867 = vst [vmem:[%s8731_s22 + $0x80] sm:$0xff] %v1489_v2  ;;  %7227 = vst [vmem:[%s8731_s22 + $0x88] sm:$0xff] %v4826_v3  ;;  %v3119_v40 = vxor.u32 2147483648, %v3118_v59  ;;  %v1759_v41 = vshll.u32 %v10372_v28, 30  ;;  %v1596_v22 = vand.u32 2139095040, %v10368_v43  ;;  %v3364_v31 = vshll.u32 %v8173_v17, %v3358_v36 }
 0x338   : > { %v3367_v60 = vshll.u32 %v8174_v19, %v3358_v36  ;;  %v3371_v35 = vshrl.u32 %v8176_v23, %v3359_v26  ;;  %v3363_v38 = vor.u32 %v3362_v34, %v3361_v54  ;;  %v3370_v52 = vshll.u32 %v8175_v21, %v3358_v36 }
 0x339   : > { %v3120_v61 = vsel %vm3037_vm10, %v3119_v40, %v3118_v59  ;;  %v10390_v10 = vsub.s32 %v1756_v45, %v1759_v41  ;;  %v3366_v29 = vor.u32 %v3365_v46, %v3364_v31  ;;  %v3374_v63 = vshrl.u32 %v8177_v30, %v3359_v26 }
 0x33a   : > { %v3123_v24 = vsel %vm10314_vm4, %v10067_v53, %v3120_v61  ;;  %v3369_v27 = vor.u32 %v3368_v4, %v3367_v60  ;;  %v3372_v48 = vor.u32 %v3371_v35, %v3370_v52  ;;  %v3373_v11 = vshll.u32 %v8176_v23, %v3358_v36 }
 0x33b   : > { %8058 = vcosq.f32 %v3123_v24  ;;  %v1762_v39 = vsub.s32 0, %v10390_v10  ;;  %v3352_v16 = vor.u32 8388608, %v3351_v57  ;;  %v10396_v12 = vand.u32 3, %v3124_v6 }
 0x33c   : > { %8060 = vsinq.f32 %v3123_v24  ;;  %v10398_v37 = vand.u32 3, %v6480_v8  ;;  %v3375_v44 = vor.u32 %v3374_v63, %v3373_v11  ;;  %v3360_v47 = vshrl.u32 %v8172_v13, %v3359_v26 }
 0x33d   : > { %v7428_v15 = vmin.u32 %v1762_v39, %v10390_v10  ;;  %vm3376_vm10 = vcmp.lt.s32.totalorder %v3357_v58, 1  ;;  %vm3379_vm3 = vcmp.lt.s32.totalorder %v3357_v58, 4  ;;  %v1597_v42 = vshrl.u32 %v1596_v22, 23 }
 0x33e   : > { %v3381_v33 = vsel %vm3379_vm3, %v3369_v27, 2102212464  ;;  %v3384_v18 = vsel %vm3376_vm10, %v3363_v38, %v3366_v29  ;;  %v3385_v1 = vsel %vm3379_vm3, %v3372_v48, 920167782  ;;  %vm3377_vm2 = vcmp.lt.s32.totalorder %v3357_v58, 2 }
 0x33f   : > { %v1764_v0 = vclz %v7428_v15  ;;  %vm3378_vm5 = vcmp.lt.s32.totalorder %v3357_v58, 3  ;;  %v3388_v45 = vsel %vm3376_vm10, %v3366_v29, %v3369_v27  ;;  %v3392_v36 = vshll.u32 %v3352_v16, 8 }
 0x340   : > { %vm3133_vm6 = vcmp.eq.s32.totalorder %v10396_v12, 2  ;;  %v3380_v9 = vsel %vm3376_vm10, %v3360_v47, %v3363_v38  ;;  %v3386_v56 = vsel %vm3378_vm5, %v3369_v27, %v3385_v1  ;;  %v3389_v25 = vsel %vm3379_vm3, %v3375_v44, 1326507024 }
 0x341   : > { %v7429_v6 = vadd.s32 4294967294, %v1764_v0  ;;  %vm3130_vm4 = vcmp.eq.s32.totalorder %v10396_v12, 0  ;;  %vm6483_vm7 = vcmp.eq.s32.totalorder %v10398_v37, 0  ;;  %vm1698_vm8 = vcmp.lt.s32.totalorder %v10205_v62, 0 }
 0x342   : > { %v3382_v14 = vsel %vm3378_vm5, %v3366_v29, %v3381_v33  ;;  %v3387_v49 = vsel %vm3377_vm2, %v3384_v18, %v3386_v56  ;;  %v3390_v32 = vsel %vm3378_vm5, %v3372_v48, %v3389_v25  ;;  %v7423_v5 = vadd.s32 4294967169, %v1597_v42 }
 0x343   : > { %vm3129_vm9 = vcmp.lt.s32.totalorder %v10396_v12, 2  ;;  %vm6482_vm11 = vcmp.lt.s32.totalorder %v10398_v37, 2  ;;  %vm7430_vm12 = vcmp.lt.s32.totalorder %v7429_v6, 0  ;;  %v3391_v26 = vsel %vm3377_vm2, %v3388_v45, %v3390_v32 }
 0x344   : > { %v10410_v2 = vmul.u32.u64.low %v3392_v36, %v3387_v49  ;;  %v10411_v3 = vmul.u32.u64.high %v3392_v36, %v3387_v49, %v10410_v2  ;;  %vm3127_vm13 = vweird.f32 %v10067_v53  ;;  %v1767_v59 = vsel %vm7430_vm12, 0, %v7429_v6 }
 0x345   : > { %v10415_v57 = vmul.u32.u64.low %v3392_v36, %v3391_v26  ;;  %v10416_v34 = vmul.u32.u64.high %v3392_v36, %v3391_v26, %v10415_v57  ;;  %v1603_v40 = vadd.s32 1, %v7423_v5  ;;  %v1752_v8 = vadd.s32 %v10324_v51, %v10336_v7 }
 0x346   : > { %v1768_v46 = vsub.s32 32, %v1767_v59  ;;  %v1772_v4 = vsub.s32 4294967266, %v1767_v59  ;;  %v3383_v41 = vsel %vm3377_vm2, %v3380_v9, %v3382_v14  ;;  %vm6486_vm14 = vcmp.eq.s32.totalorder %v10398_v37, 2 }
 0x347   : > { %v1769_v54 = vshll.u32 %v10390_v10, %v1767_v59  ;;  %v1782_v22 = vsub.s32 4, %v10372_v28  ;;  %vm1604_vm15 = vcmp.gt.s32.totalorder %v1603_v40, 0  ;;  %v3402_v35 = vadd.s32 1, %v10411_v3 }
 0x348   : > { %v8059_v61 = vpop.eup %8058  ;;  %v1770_v31 = vshrl.u32 %v1752_v8, %v1768_v46  ;;  %v1773_v60 = vadd.s32 127, %v1772_v4  ;;  %v1605_v24 = vsel %vm1604_vm15, %v1603_v40, 0  ;;  %v3399_v51 = vmul.u32 %v3392_v36, %v3383_v41 }
 0x349   : > { %v8061_v38 = vpop.eup %8060  ;;  %v3134_v52 = vxor.u32 2147483648, %v8059_v61  ;;  %vm3401_vm0 = vc.u32 %v10416_v34, %v10410_v2  ;;  %v1593_v7 = vand.u32 2147483647, %v10368_v43  ;;  %v1607_v11 = vand.u32 31, %v1605_v24 }
 0x34a   : > { %v3131_v58 = vxor.u32 2147483648, %v8061_v38  ;;  %v1771_v29 = vor.u32 %v1770_v31, %v1769_v54  ;;  %v1774_v10 = vshll.u32 %v1773_v60, 23  ;;  %v3403_v27 = vsel %vm3401_vm0, %v3402_v35, %v10411_v3 }
 0x34b   : > { %v3135_v63 = vsel %vm3133_vm6, %v3134_v52, %v8061_v38  ;;  %v6488_v39 = vsel %vm6486_vm14, %v3134_v52, %v8061_v38  ;;  %v3404_v48 = vadd.s32 %v3403_v27, %v3399_v51  ;;  %v1783_v47 = vsel %vm1698_vm8, %v1782_v22, %v10372_v28 }
 0x34c   : > { %v3132_v16 = vsel %vm3130_vm4, %v8059_v61, %v3131_v58  ;;  %v6485_v15 = vsel %vm6483_vm7, %v8059_v61, %v3131_v58  ;;  %v1775_v44 = vor.u32 4788187, %v1774_v10  ;;  %v1608_v18 = vsub.s32 32, %v1607_v11 }
 0x34d   : > { %v3136_v42 = vsel %vm3129_vm9, %v3132_v16, %v3135_v63  ;;  %v6489_v0 = vsel %vm6482_vm11, %v6485_v15, %v6488_v39  ;;  %v3405_v33 = vadd.s32 536870912, %v3404_v48  ;;  %v1778_v6 = vcvt.s32.f32 %v1771_v29 }
 0x34e   : > { %v3137_v1 = vsel %vm3127_vm13, nan, %v3136_v42  ;;  %v6490_v45 = vsel %vm3127_vm13, nan, %v6489_v0  ;;  %v1776_v36 = vand.u32 2147483647, %v1775_v44  ;;  %vm10454_vm1 = vcmp.le.f32.partialorder %v1696_v50, 0.7853982 }
 0x34f   : > { %3883 = vst [vmem:[%s8731_s22 + $0x180] sm:$0xff] %v3137_v1  ;;  %7243 = vst [vmem:[%s8731_s22 + $0x188] sm:$0xff] %v6490_v45  ;;  %v10450_v9 = vshrl.u32 %v3405_v33, 30  ;;  %v1611_v37 = vshrl.u32 %v8173_v17, %v1608_v18  ;;  %v1614_v56 = vshrl.u32 %v8174_v19, %v1608_v18  ;;  %v1785_v53 = vsel %vm10454_vm1, 0, %v1783_v47  ;;  %v10497_v47 = vpop.f32.mrf.mxu1 }
 0x350   : > { %v1779_v12 = vmul.f32 %v1778_v6, %v1776_v36  ;;  %v1600_v14 = vand.u32 8388607, %v1593_v7  ;;  %v1617_v49 = vshrl.u32 %v8175_v21, %v1608_v18  ;;  %v1610_v50 = vshll.u32 %v8172_v13, %v1607_v11 }
 0x351   : > { %v3407_v25 = vshll.u32 %v10450_v9, 30  ;;  %v1613_v5 = vshll.u32 %v8173_v17, %v1607_v11  ;;  %v1620_v26 = vshrl.u32 %v8176_v23, %v1608_v18  ;;  %v1606_v59 = vshrl.u32 %v1605_v24, 5 }
 0x352   : > { %v1780_v32 = vxor.u32 2147483648, %v1779_v12  ;;  %v1616_v57 = vshll.u32 %v8174_v19, %v1607_v11  ;;  %v1619_v40 = vshll.u32 %v8175_v21, %v1607_v11  ;;  %v1612_v46 = vor.u32 %v1611_v37, %v1610_v50 }
 0x353   : > { %v10469_v3 = vsub.s32 %v3404_v48, %v3407_v25  ;;  %v1615_v4 = vor.u32 %v1614_v56, %v1613_v5  ;;  %v1623_v41 = vshrl.u32 %v8177_v30, %v1608_v18  ;;  %v1601_v60 = vor.u32 8388608, %v1600_v14 }
 0x354   : > { %v1781_v8 = vsel %vm1698_vm8, %v1780_v32, %v1779_v12  ;;  %v1618_v61 = vor.u32 %v1617_v49, %v1616_v57  ;;  %v1621_v31 = vor.u32 %v1620_v26, %v1619_v40  ;;  %v1622_v35 = vshll.u32 %v8176_v23, %v1607_v11 }
 0x355   : > { %v1784_v54 = vsel %vm10454_vm1, %v10205_v62, %v1781_v8  ;;  %v3410_v22 = vsub.s32 0, %v10469_v3  ;;  %v10481_v24 = vand.u32 3, %v1785_v53  ;;  %vm3346_vm10 = vcmp.lt.s32.totalorder %v10272_v55, 0 }
 0x356   : > { %8062 = vcosq.f32 %v1784_v54  ;;  %v5128_v52 = vadd.s32 3, %v1785_v53  ;;  %v1624_v51 = vor.u32 %v1623_v41, %v1622_v35  ;;  %vm1625_vm3 = vcmp.lt.s32.totalorder %v1606_v59, 1 }
 0x357   : > { %8064 = vsinq.f32 %v1784_v54  ;;  %v7492_v38 = vmin.u32 %v3410_v22, %v10469_v3  ;;  %vm1628_vm2 = vcmp.lt.s32.totalorder %v1606_v59, 4  ;;  %v1633_v10 = vsel %vm1625_vm3, %v1612_v46, %v1615_v4 }
 0x358   : > { %v1630_v29 = vsel %vm1628_vm2, %v1618_v61, 2102212464  ;;  %v1634_v27 = vsel %vm1628_vm2, %v1621_v31, 920167782  ;;  %vm10490_vm5 = vcmp.le.f32.partialorder %v3344_v20, 0.7853982  ;;  %v1609_v48 = vshrl.u32 %v8172_v13, %v1608_v18 }
 0x359   : > { %v3412_v58 = vclz %v7492_v38  ;;  %v3430_v39 = vsub.s32 4, %v10450_v9  ;;  %vm1627_vm6 = vcmp.lt.s32.totalorder %v1606_v59, 3  ;;  %v1641_v11 = vshll.u32 %v1601_v60, 8 }
 0x35a   : > { %vm1626_vm4 = vcmp.lt.s32.totalorder %v1606_v59, 2  ;;  %v1635_v15 = vsel %vm1627_vm6, %v1618_v61, %v1634_v27  ;;  %v1637_v44 = vsel %vm1625_vm3, %v1615_v4, %v1618_v61  ;;  %v1629_v42 = vsel %vm1625_vm3, %v1609_v48, %v1612_v46 }
 0x35b   : > { %v7493_v16 = vadd.s32 4294967294, %v3412_v58  ;;  %v1631_v0 = vsel %vm1627_vm6, %v1615_v4, %v1630_v29  ;;  %v1636_v20 = vsel %vm1626_vm4, %v1633_v10, %v1635_v15  ;;  %v1638_v33 = vsel %vm1628_vm2, %v1624_v51, 1326507024 }
 0x35c   : > { %vm1794_vm7 = vcmp.eq.s32.totalorder %v10481_v24, 2  ;;  %v1639_v18 = vsel %vm1627_vm6, %v1621_v31, %v1638_v33  ;;  %v10503_v1 = vmul.u32.u64.low %v1641_v11, %v1636_v20  ;;  %v10504_v45 = vmul.u32.u64.high %v1641_v11, %v1636_v20, %v10503_v1 }
 0x35d   : > { %vm7494_vm8 = vcmp.lt.s32.totalorder %v7493_v16, 0  ;;  %vm1791_vm9 = vcmp.eq.s32.totalorder %v10481_v24, 0  ;;  %v5129_v36 = vand.u32 3, %v5128_v52  ;;  %v1640_v28 = vsel %vm1626_vm4, %v1637_v44, %v1639_v18 }
 0x35e   : > { %v3415_v6 = vsel %vm7494_vm8, 0, %v7493_v16  ;;  %v3244_v12 = vand.u32 2139095040, %v10497_v47  ;;  %vm1790_vm11 = vcmp.lt.s32.totalorder %v10481_v24, 2  ;;  %v3400_v37 = vadd.s32 %v10410_v2, %v10416_v34 }
 0x35f   : > { %v3416_v56 = vsub.s32 32, %v3415_v6  ;;  %v3420_v53 = vsub.s32 4294967266, %v3415_v6  ;;  %v3431_v25 = vsel %vm3346_vm10, %v3430_v39, %v10450_v9  ;;  %vm1788_vm12 = vweird.f32 %v10205_v62 }
 0x360   : > { %v1632_v14 = vsel %vm1626_vm4, %v1629_v42, %v1631_v0  ;;  %v10518_v49 = vmul.u32.u64.low %v1641_v11, %v1640_v28  ;;  %v10519_v32 = vmul.u32.u64.high %v1641_v11, %v1640_v28, %v10518_v49  ;;  %v3245_v50 = vshrl.u32 %v3244_v12, 23 }
 0x361   : > { %v3417_v5 = vshll.u32 %v10469_v3, %v3415_v6  ;;  %v3418_v26 = vshrl.u32 %v3400_v37, %v3416_v56  ;;  %v3421_v57 = vadd.s32 127, %v3420_v53  ;;  %v1651_v2 = vadd.s32 1, %v10504_v45 }
 0x362   : > { %vm5130_vm13 = vcmp.lt.s32.totalorder %v5129_v36, 2  ;;  %vm5131_vm14 = vcmp.eq.s32.totalorder %v5129_v36, 0  ;;  %vm5134_vm15 = vcmp.eq.s32.totalorder %v5129_v36, 2  ;;  %v7487_v34 = vadd.s32 4294967169, %v3245_v50 }
 0x363   : > { %v8063_v40 = vpop.eup %8062  ;;  %v3419_v9 = vor.u32 %v3418_v26, %v3417_v5  ;;  %v3422_v8 = vshll.u32 %v3421_v57, 23  ;;  %v3433_v59 = vsel %vm10490_vm5, 0, %v3431_v25  ;;  %v3241_v46 = vand.u32 2147483647, %v10497_v47  ;;  %v10564_v57 = vpop.f32.mrf.mxu0 }
 0x364   : > { %v8065_v4 = vpop.eup %8064  ;;  %v1795_v41 = vxor.u32 2147483648, %v8063_v40  ;;  %v1648_v54 = vmul.u32 %v1641_v11, %v1632_v14  ;;  %vm1650_vm0 = vc.u32 %v10519_v32, %v10503_v1  ;;  %v3251_v3 = vadd.s32 1, %v7487_v34 }
 0x365   : > { %v1792_v22 = vxor.u32 2147483648, %v8065_v4  ;;  %v3423_v61 = vor.u32 4788187, %v3422_v8  ;;  %v3426_v31 = vcvt.s32.f32 %v3419_v9  ;;  %v1652_v60 = vsel %vm1650_vm0, %v1651_v2, %v10504_v45 }
 0x366   : > { %v1796_v35 = vsel %vm1794_vm7, %v1795_v41, %v8065_v4  ;;  %v5136_v38 = vsel %vm5134_vm15, %v1795_v41, %v8065_v4  ;;  %v1653_v52 = vadd.s32 %v1652_v60, %v1648_v54  ;;  %vm3252_vm1 = vcmp.gt.s32.totalorder %v3251_v3, 0 }
 0x367   : > { %v1793_v51 = vsel %vm1791_vm9, %v8063_v40, %v1792_v22  ;;  %v5133_v58 = vsel %vm5131_vm14, %v8063_v40, %v1792_v22  ;;  %v3424_v29 = vand.u32 2147483647, %v3423_v61  ;;  %v3253_v10 = vsel %vm3252_vm1, %v3251_v3, 0 }
 0x368   : > { %v1797_v27 = vsel %vm1790_vm11, %v1793_v51, %v1796_v35  ;;  %v5137_v39 = vsel %vm5130_vm13, %v5133_v58, %v5136_v38  ;;  %v1654_v48 = vadd.s32 536870912, %v1653_v52  ;;  %v3248_v11 = vand.u32 8388607, %v3241_v46 }
 0x369   : > { %v1798_v16 = vsel %vm1788_vm12, nan, %v1797_v27  ;;  %v5138_v15 = vsel %vm1788_vm12, nan, %v5137_v39  ;;  %v3427_v44 = vmul.f32 %v3426_v31, %v3424_v29  ;;  %v3255_v42 = vand.u32 31, %v3253_v10 }
 0x36a   : > { %3870 = vst [vmem:[%s8731_s22 + $0xb0] sm:$0xff] %v1798_v16  ;;  %7230 = vst [vmem:[%s8731_s22 + $0xb8] sm:$0xff] %v5138_v15  ;;  %v10546_v0 = vshrl.u32 %v1654_v48, 30  ;;  %v6792_v33 = vadd.s32 3, %v3433_v59  ;;  %v3249_v45 = vor.u32 8388608, %v3248_v11  ;;  %v3254_v25 = vshrl.u32 %v3253_v10, 5 }
 0x36b   : > { %v3428_v24 = vxor.u32 2147483648, %v3427_v44  ;;  %v3256_v20 = vsub.s32 32, %v3255_v42  ;;  %v3258_v6 = vshll.u32 %v8172_v13, %v3255_v42  ;;  %v3261_v56 = vshll.u32 %v8173_v17, %v3255_v42 }
 0x36c   : > { %v1656_v18 = vshll.u32 %v10546_v0, 30  ;;  %v3264_v14 = vshll.u32 %v8174_v19, %v3255_v42  ;;  %v3267_v49 = vshll.u32 %v8175_v21, %v3255_v42  ;;  %v3270_v34 = vshll.u32 %v8176_v23, %v3255_v42 }
 0x36d   : > { %v3429_v36 = vsel %vm3346_vm10, %v3428_v24, %v3427_v44  ;;  %v3259_v62 = vshrl.u32 %v8173_v17, %v3256_v20  ;;  %v3262_v28 = vshrl.u32 %v8174_v19, %v3256_v20  ;;  %v3265_v53 = vshrl.u32 %v8175_v21, %v3256_v20 }
 0x36e   : > { %v3432_v12 = vsel %vm10490_vm5, %v10272_v55, %v3429_v36  ;;  %v10557_v37 = vsub.s32 %v1653_v52, %v1656_v18  ;;  %v3268_v2 = vshrl.u32 %v8176_v23, %v3256_v20  ;;  %v3271_v40 = vshrl.u32 %v8177_v30, %v3256_v20 }
 0x36f   : > { %8066 = vcosq.f32 %v3432_v12  ;;  %v3260_v5 = vor.u32 %v3259_v62, %v3258_v6  ;;  %v3263_v26 = vor.u32 %v3262_v28, %v3261_v56  ;;  %v3266_v63 = vor.u32 %v3265_v53, %v3264_v14 }
 0x370   : > { %8068 = vsinq.f32 %v3432_v12  ;;  %v1659_v50 = vsub.s32 0, %v10557_v37  ;;  %v10569_v9 = vand.u32 3, %v3433_v59  ;;  %v10571_v8 = vand.u32 3, %v6792_v33 }
 0x371   : > { %v3269_v41 = vor.u32 %v3268_v2, %v3267_v49  ;;  %v3272_v54 = vor.u32 %v3271_v40, %v3270_v34  ;;  %v10574_v3 = vshll.u32 %v3249_v45, 8  ;;  %v1905_v22 = vand.u32 2139095040, %v10564_v57 }
 0x372   : > { %v7424_v4 = vmin.u32 %v1659_v50, %v10557_v37  ;;  %vm1595_vm10 = vcmp.lt.s32.totalorder %v10368_v43, 0  ;;  %vm3273_vm3 = vcmp.lt.s32.totalorder %v3254_v25, 1  ;;  %vm3274_vm2 = vcmp.lt.s32.totalorder %v3254_v25, 2 }
 0x373   : > { %vm3276_vm5 = vcmp.lt.s32.totalorder %v3254_v25, 4  ;;  %v3257_v31 = vshrl.u32 %v8172_v13, %v3256_v20  ;;  %vm3275_vm6 = vcmp.lt.s32.totalorder %v3254_v25, 3  ;;  %v3281_v60 = vsel %vm3273_vm3, %v3260_v5, %v3263_v26 }
 0x374   : > { %v1661_v61 = vclz %v7424_v4  ;;  %v3278_v59 = vsel %vm3276_vm5, %v3266_v63, 2102212464  ;;  %vm3442_vm4 = vcmp.eq.s32.totalorder %v10569_v9, 2  ;;  %v1679_v38 = vsub.s32 4, %v10546_v0 }
 0x375   : > { %v3282_v52 = vsel %vm3276_vm5, %v3269_v41, 920167782  ;;  %v3285_v51 = vsel %vm3273_vm3, %v3263_v26, %v3266_v63  ;;  %vm3439_vm7 = vcmp.eq.s32.totalorder %v10569_v9, 0  ;;  %vm6795_vm8 = vcmp.eq.s32.totalorder %v10571_v8, 0 }
 0x376   : > { %v7425_v35 = vadd.s32 4294967294, %v1661_v61  ;;  %v3277_v58 = vsel %vm3273_vm3, %v3257_v31, %v3260_v5  ;;  %v3283_v29 = vsel %vm3275_vm6, %v3266_v63, %v3282_v52  ;;  %v3286_v10 = vsel %vm3276_vm5, %v3272_v54, 1326507024 }
 0x377   : > { %v1906_v27 = vshrl.u32 %v1905_v22, 23  ;;  %vm3438_vm9 = vcmp.lt.s32.totalorder %v10569_v9, 2  ;;  %vm6794_vm11 = vcmp.lt.s32.totalorder %v10571_v8, 2  ;;  %v3279_v39 = vsel %vm3275_vm6, %v3263_v26, %v3278_v59 }
 0x378   : > { %vm7426_vm12 = vcmp.lt.s32.totalorder %v7425_v35, 0  ;;  %v3284_v48 = vsel %vm3274_vm2, %v3281_v60, %v3283_v29  ;;  %v3287_v11 = vsel %vm3275_vm6, %v3269_v41, %v3286_v10  ;;  %vm3436_vm13 = vweird.f32 %v10272_v55 }
 0x379   : > { %v1664_v16 = vsel %vm7426_vm12, 0, %v7425_v35  ;;  %v3288_v15 = vsel %vm3274_vm2, %v3285_v51, %v3287_v11  ;;  %v10592_v44 = vmul.u32.u64.low %v10574_v3, %v3284_v48  ;;  %v10593_v42 = vmul.u32.u64.high %v10574_v3, %v3284_v48, %v10592_v44 }
 0x37a   : > { %vm10598_vm14 = vcmp.le.f32.partialorder %v1593_v7, 0.7853982  ;;  %v1649_v20 = vadd.s32 %v10503_v1, %v10519_v32  ;;  %v1665_v33 = vsub.s32 32, %v1664_v16  ;;  %v1669_v18 = vsub.s32 4294967266, %v1664_v16 }
 0x37b   : > { %v7435_v45 = vadd.s32 4294967169, %v1906_v27  ;;  %vm6798_vm15 = vcmp.eq.s32.totalorder %v10571_v8, 2  ;;  %v3280_v36 = vsel %vm3274_vm2, %v3277_v58, %v3279_v39  ;;  %v1666_v7 = vshll.u32 %v10557_v37, %v1664_v16 }
 0x37c   : > { %v10607_v6 = vmul.u32.u64.low %v10574_v3, %v3288_v15  ;;  %v10608_v62 = vmul.u32.u64.high %v10574_v3, %v3288_v15, %v10607_v6  ;;  %v8067_v28 = vpop.eup %8066  ;;  %v1667_v12 = vshrl.u32 %v1649_v20, %v1665_v33  ;;  %v1670_v56 = vadd.s32 127, %v1669_v18 }
 0x37d   : > { %v1912_v53 = vadd.s32 1, %v7435_v45  ;;  %v8069_v14 = vpop.eup %8068  ;;  %v3443_v49 = vxor.u32 2147483648, %v8067_v28  ;;  %v1680_v1 = vsel %vm1595_vm10, %v1679_v38, %v10546_v0  ;;  %v3299_v32 = vadd.s32 1, %v10593_v42  ;;  %v10640_v38 = vpop.f32.mrf.mxu1 }
 0x37e   : > { %v1902_v25 = vand.u32 2147483647, %v10564_v57  ;;  %v3440_v50 = vxor.u32 2147483648, %v8069_v14  ;;  %v1668_v5 = vor.u32 %v1667_v12, %v1666_v7  ;;  %v1671_v26 = vshll.u32 %v1670_v56, 23 }
 0x37f   : > { %vm1913_vm0 = vcmp.gt.s32.totalorder %v1912_v53, 0  ;;  %v3444_v37 = vsel %vm3442_vm4, %v3443_v49, %v8069_v14  ;;  %v6800_v63 = vsel %vm6798_vm15, %v3443_v49, %v8069_v14  ;;  %v3296_v2 = vmul.u32 %v10574_v3, %v3280_v36 }
 0x380   : > { %vm3298_vm1 = vc.u32 %v10608_v62, %v10592_v44  ;;  %v3441_v0 = vsel %vm3439_vm7, %v8067_v28, %v3440_v50  ;;  %v6797_v34 = vsel %vm6795_vm8, %v8067_v28, %v3440_v50  ;;  %v1672_v40 = vor.u32 4788187, %v1671_v26 }
 0x381   : > { %v1675_v4 = vcvt.s32.f32 %v1668_v5  ;;  %v3445_v41 = vsel %vm3438_vm9, %v3441_v0, %v3444_v37  ;;  %v6801_v54 = vsel %vm6794_vm11, %v6797_v34, %v6800_v63  ;;  %v3300_v22 = vsel %vm3298_vm1, %v3299_v32, %v10593_v42 }
 0x382   : > { %v1914_v3 = vsel %vm1913_vm0, %v1912_v53, 0  ;;  %v3446_v61 = vsel %vm3436_vm13, nan, %v3445_v41  ;;  %v6802_v31 = vsel %vm3436_vm13, nan, %v6801_v54  ;;  %v1673_v59 = vand.u32 2147483647, %v1672_v40 }
 0x383   : > { %v3301_v60 = vadd.s32 %v3300_v22, %v3296_v2  ;;  %3886 = vst [vmem:[%s8731_s22 + $0x1b0] sm:$0xff] %v3446_v61  ;;  %7246 = vst [vmem:[%s8731_s22 + $0x1b8] sm:$0xff] %v6802_v31  ;;  %v1682_v9 = vsel %vm10598_vm14, 0, %v1680_v1  ;;  %v1916_v35 = vand.u32 31, %v1914_v3  ;;  %v1909_v51 = vand.u32 8388607, %v1902_v25 }
 0x384   : > { %v1676_v8 = vmul.f32 %v1675_v4, %v1673_v59  ;;  %v5024_v10 = vadd.s32 3, %v1682_v9  ;;  %v3553_v27 = vand.u32 2139095040, %v10640_v38  ;;  %v1915_v45 = vshrl.u32 %v1914_v3, 5 }
 0x385   : > { %v3302_v52 = vadd.s32 536870912, %v3301_v60  ;;  %v1917_v58 = vsub.s32 32, %v1916_v35  ;;  %v1919_v39 = vshll.u32 %v8172_v13, %v1916_v35  ;;  %v1922_v20 = vshll.u32 %v8173_v17, %v1916_v35 }
 0x386   : > { %v1677_v29 = vxor.u32 2147483648, %v1676_v8  ;;  %v1925_v36 = vshll.u32 %v8174_v19, %v1916_v35  ;;  %v1928_v6 = vshll.u32 %v8175_v21, %v1916_v35  ;;  %v10664_v49 = vand.u32 3, %v1682_v9 }
 0x387   : > { %v10644_v55 = vshrl.u32 %v3302_v52, 30  ;;  %v1920_v48 = vshrl.u32 %v8173_v17, %v1917_v58  ;;  %v1923_v11 = vshrl.u32 %v8174_v19, %v1917_v58  ;;  %v1926_v16 = vshrl.u32 %v8175_v21, %v1917_v58 }
 0x388   : > { %v1678_v15 = vsel %vm1595_vm10, %v1677_v29, %v1676_v8  ;;  %v1929_v33 = vshrl.u32 %v8176_v23, %v1917_v58  ;;  %v1932_v14 = vshrl.u32 %v8177_v30, %v1917_v58  ;;  %v1931_v1 = vshll.u32 %v8176_v23, %v1916_v35 }
 0x389   : > { %v3304_v42 = vshll.u32 %v10644_v55, 30  ;;  %v1681_v18 = vsel %vm10598_vm14, %v10368_v43, %v1678_v15  ;;  %v1921_v7 = vor.u32 %v1920_v48, %v1919_v39  ;;  %v1924_v12 = vor.u32 %v1923_v11, %v1922_v20 }
 0x38a   : > { %8070 = vcosq.f32 %v1681_v18  ;;  %v1927_v56 = vor.u32 %v1926_v16, %v1925_v36  ;;  %v1930_v53 = vor.u32 %v1929_v33, %v1928_v6  ;;  %v10668_v32 = vand.u32 3, %v5024_v10 }
 0x38b   : > { %v10661_v28 = vsub.s32 %v3301_v60, %v3304_v42  ;;  %8072 = vsinq.f32 %v1681_v18  ;;  %v1910_v50 = vor.u32 8388608, %v1909_v51  ;;  %v1918_v5 = vshrl.u32 %v8172_v13, %v1917_v58 }
 0x38c   : > { %v3554_v26 = vshrl.u32 %v3553_v27, 23  ;;  %v1933_v63 = vor.u32 %v1932_v14, %v1931_v1  ;;  %vm1934_vm10 = vcmp.lt.s32.totalorder %v1915_v45, 1  ;;  %vm1937_vm3 = vcmp.lt.s32.totalorder %v1915_v45, 4 }
 0x38d   : > { %v3307_v24 = vsub.s32 0, %v10661_v28  ;;  %vm1936_vm2 = vcmp.lt.s32.totalorder %v1915_v45, 3  ;;  %v1939_v2 = vsel %vm1937_vm3, %v1927_v56, 2102212464  ;;  %v1942_v0 = vsel %vm1934_vm10, %v1921_v7, %v1924_v12 }
 0x38e   : > { %v1943_v34 = vsel %vm1937_vm3, %v1930_v53, 920167782  ;;  %vm1691_vm5 = vcmp.eq.s32.totalorder %v10664_v49, 2  ;;  %vm1935_vm6 = vcmp.lt.s32.totalorder %v1915_v45, 2  ;;  %v1938_v41 = vsel %vm1934_vm10, %v1918_v5, %v1921_v7 }
 0x38f   : > { %v7488_v37 = vmin.u32 %v3307_v24, %v10661_v28  ;;  %v1944_v4 = vsel %vm1936_vm2, %v1927_v56, %v1943_v34  ;;  %v1946_v54 = vsel %vm1934_vm10, %v1924_v12, %v1927_v56  ;;  %v1950_v22 = vshll.u32 %v1910_v50, 8 }
 0x390   : > { %vm1688_vm4 = vcmp.eq.s32.totalorder %v10664_v49, 0  ;;  %v1940_v61 = vsel %vm1936_vm2, %v1924_v12, %v1939_v2  ;;  %v1945_v31 = vsel %vm1935_vm6, %v1942_v0, %v1944_v4  ;;  %v1947_v59 = vsel %vm1937_vm3, %v1933_v63, 1326507024 }
 0x391   : > { %v3309_v40 = vclz %v7488_v37  ;;  %vm1687_vm7 = vcmp.lt.s32.totalorder %v10664_v49, 2  ;;  %vm5026_vm8 = vcmp.lt.s32.totalorder %v10668_v32, 2  ;;  %vm3243_vm9 = vcmp.lt.s32.totalorder %v10497_v47, 0 }
 0x392   : > { %v1948_v60 = vsel %vm1936_vm2, %v1930_v53, %v1947_v59  ;;  %v10684_v9 = vmul.u32.u64.low %v1950_v22, %v1945_v31  ;;  %v10685_v35 = vmul.u32.u64.high %v1950_v22, %v1945_v31, %v10684_v9  ;;  %v7499_v8 = vadd.s32 4294967169, %v3554_v26 }
 0x393   : > { %v7489_v3 = vadd.s32 4294967294, %v3309_v40  ;;  %vm1685_vm11 = vweird.f32 %v10368_v43  ;;  %vm5027_vm12 = vcmp.eq.s32.totalorder %v10668_v32, 0  ;;  %vm5030_vm13 = vcmp.eq.s32.totalorder %v10668_v32, 2 }
 0x394   : > { %v1949_v52 = vsel %vm1935_vm6, %v1946_v54, %v1948_v60  ;;  %v3560_v10 = vadd.s32 1, %v7499_v8  ;;  %v3297_v27 = vadd.s32 %v10592_v44, %v10608_v62  ;;  %v1941_v11 = vsel %vm1935_vm6, %v1938_v41, %v1940_v61 }
 0x395   : > { %vm7490_vm14 = vcmp.lt.s32.totalorder %v7489_v3, 0  ;;  %v10692_v58 = vmul.u32.u64.low %v1950_v22, %v1949_v52  ;;  %v10693_v29 = vmul.u32.u64.high %v1950_v22, %v1949_v52, %v10692_v58  ;;  %v3327_v42 = vsub.s32 4, %v10644_v55 }
 0x396   : > { %v3312_v51 = vsel %vm7490_vm14, 0, %v7489_v3  ;;  %v1960_v20 = vadd.s32 1, %v10685_v35  ;;  %vm3561_vm15 = vcmp.gt.s32.totalorder %v3560_v10, 0  ;;  %v1957_v56 = vmul.u32 %v1950_v22, %v1941_v11 }
 0x397   : > { %v3313_v39 = vsub.s32 32, %v3312_v51  ;;  %v3317_v48 = vsub.s32 4294967266, %v3312_v51  ;;  %v8071_v16 = vpop.eup %8070  ;;  %v3314_v15 = vshll.u32 %v10661_v28, %v3312_v51  ;;  %v3562_v7 = vsel %vm3561_vm15, %v3560_v10, 0 }
 0x398   : > { %v8073_v33 = vpop.eup %8072  ;;  %v1692_v18 = vxor.u32 2147483648, %v8071_v16  ;;  %vm1959_vm0 = vc.u32 %v10693_v29, %v10684_v9  ;;  %v3550_v44 = vand.u32 2147483647, %v10640_v38  ;;  %v3564_v50 = vand.u32 31, %v3562_v7 }
 0x399   : > { %v3315_v36 = vshrl.u32 %v3297_v27, %v3313_v39  ;;  %v3318_v6 = vadd.s32 127, %v3317_v48  ;;  %v1689_v12 = vxor.u32 2147483648, %v8073_v33  ;;  %v1961_v1 = vsel %vm1959_vm0, %v1960_v20, %v10685_v35 }
 0x39a   : > { %v1693_v62 = vsel %vm1691_vm5, %v1692_v18, %v8073_v33  ;;  %v5032_v45 = vsel %vm5030_vm13, %v1692_v18, %v8073_v33  ;;  %v3328_v63 = vsel %vm3243_vm9, %v3327_v42, %v10644_v55  ;;  %v1962_v34 = vadd.s32 %v1961_v1, %v1957_v56 }
 0x39b   : > { %v3316_v28 = vor.u32 %v3315_v36, %v3314_v15  ;;  %v3319_v53 = vshll.u32 %v3318_v6, 23  ;;  %v1690_v14 = vsel %vm1688_vm4, %v8071_v16, %v1689_v12  ;;  %v5029_v24 = vsel %vm5027_vm12, %v8071_v16, %v1689_v12 }
 0x39c   : > { %v1694_v5 = vsel %vm1687_vm7, %v1690_v14, %v1693_v62  ;;  %v5033_v26 = vsel %vm5026_vm8, %v5029_v24, %v5032_v45  ;;  %v3565_v40 = vsub.s32 32, %v3564_v50  ;;  %vm10728_vm1 = vcmp.le.f32.partialorder %v3241_v46, 0.7853982  ;;  %v10765_v24 = vpop.f32.mrf.mxu0 }
 0x39d   : > { %v3320_v37 = vor.u32 4788187, %v3319_v53  ;;  %v1695_v2 = vsel %vm1685_vm11, nan, %v1694_v5  ;;  %v5034_v0 = vsel %vm1685_vm11, nan, %v5033_v26  ;;  %v3323_v4 = vcvt.s32.f32 %v3316_v28 }
 0x39e   : > { %3869 = vst [vmem:[%s8731_s22 + $0xa0] sm:$0xff] %v1695_v2  ;;  %7229 = vst [vmem:[%s8731_s22 + $0xa8] sm:$0xff] %v5034_v0  ;;  %v1963_v41 = vadd.s32 536870912, %v1962_v34  ;;  %v3557_v55 = vand.u32 8388607, %v3550_v44  ;;  %v3568_v54 = vshrl.u32 %v8173_v17, %v3565_v40  ;;  %v3571_v43 = vshrl.u32 %v8174_v19, %v3565_v40 }
 0x39f   : > { %v3321_v32 = vand.u32 2147483647, %v3320_v37  ;;  %v3330_v3 = vsel %vm10728_vm1, 0, %v3328_v63  ;;  %v3574_v61 = vshrl.u32 %v8175_v21, %v3565_v40  ;;  %v3577_v46 = vshrl.u32 %v8176_v23, %v3565_v40 }
 0x3a0   : > { %v10740_v31 = vshrl.u32 %v1963_v41, 30  ;;  %v3567_v59 = vshll.u32 %v8172_v13, %v3564_v50  ;;  %v3570_v60 = vshll.u32 %v8173_v17, %v3564_v50  ;;  %v3573_v35 = vshll.u32 %v8174_v19, %v3564_v50 }
 0x3a1   : > { %v3324_v22 = vmul.f32 %v3323_v4, %v3321_v32  ;;  %v3576_v52 = vshll.u32 %v8175_v21, %v3564_v50  ;;  %v3579_v51 = vshll.u32 %v8176_v23, %v3564_v50  ;;  %v3580_v58 = vshrl.u32 %v8177_v30, %v3565_v40 }
 0x3a2   : > { %v1965_v10 = vshll.u32 %v10740_v31, 30  ;;  %v3563_v27 = vshrl.u32 %v3562_v7, 5  ;;  %v3569_v39 = vor.u32 %v3568_v54, %v3567_v59  ;;  %v3572_v48 = vor.u32 %v3571_v43, %v3570_v60 }
 0x3a3   : > { %v3325_v8 = vxor.u32 2147483648, %v3324_v22  ;;  %v3575_v16 = vor.u32 %v3574_v61, %v3573_v35  ;;  %v3578_v15 = vor.u32 %v3577_v46, %v3576_v52  ;;  %v3581_v42 = vor.u32 %v3580_v58, %v3579_v51 }
 0x3a4   : > { %v6688_v33 = vadd.s32 3, %v3330_v3  ;;  %v10754_v18 = vsub.s32 %v1962_v34, %v1965_v10  ;;  %v10756_v36 = vand.u32 3, %v3330_v3  ;;  %v3558_v6 = vor.u32 8388608, %v3557_v55 }
 0x3a5   : > { %v3326_v11 = vsel %vm3243_vm9, %v3325_v8, %v3324_v22  ;;  %vm3582_vm10 = vcmp.lt.s32.totalorder %v3563_v27, 1  ;;  %vm3585_vm3 = vcmp.lt.s32.totalorder %v3563_v27, 4  ;;  %v3566_v14 = vshrl.u32 %v8172_v13, %v3565_v40 }
 0x3a6   : > { %v3329_v20 = vsel %vm10728_vm1, %v10497_v47, %v3326_v11  ;;  %v1968_v7 = vsub.s32 0, %v10754_v18  ;;  %v3590_v12 = vsel %vm3582_vm10, %v3569_v39, %v3572_v48  ;;  %v3591_v56 = vsel %vm3585_vm3, %v3578_v15, 920167782 }
 0x3a7   : > { %8074 = vcosq.f32 %v3329_v20  ;;  %v3594_v62 = vsel %vm3582_vm10, %v3572_v48, %v3575_v16  ;;  %v3595_v45 = vsel %vm3585_vm3, %v3581_v42, 1326507024  ;;  %v10761_v28 = vand.u32 3, %v6688_v33 }
 0x3a8   : > { %8076 = vsinq.f32 %v3329_v20  ;;  %v7436_v53 = vmin.u32 %v1968_v7, %v10754_v18  ;;  %vm3584_vm2 = vcmp.lt.s32.totalorder %v3563_v27, 3  ;;  %vm3583_vm5 = vcmp.lt.s32.totalorder %v3563_v27, 2 }
 0x3a9   : > { %v3587_v1 = vsel %vm3585_vm3, %v3575_v16, 2102212464  ;;  %v3592_v50 = vsel %vm3584_vm2, %v3575_v16, %v3591_v56  ;;  %v3596_v5 = vsel %vm3584_vm2, %v3578_v15, %v3595_v45  ;;  %v3598_v2 = vshll.u32 %v3558_v6, 8  ;;  %v10815_v45 = vpop.f32.mrf.mxu1 }
 0x3aa   : > { %v1970_v26 = vclz %v7436_v53  ;;  %v3593_v37 = vsel %vm3583_vm5, %v3590_v12, %v3592_v50  ;;  %v3597_v63 = vsel %vm3583_vm5, %v3594_v62, %v3596_v5  ;;  %vm1904_vm6 = vcmp.lt.s32.totalorder %v10564_v57, 0 }
 0x3ab   : > { %v3586_v0 = vsel %vm3582_vm10, %v3566_v14, %v3569_v39  ;;  %v1802_v34 = vand.u32 2139095040, %v10765_v24  ;;  %vm10774_vm4 = vcmp.le.f32.partialorder %v1902_v25, 0.7853982  ;;  %v3588_v32 = vsel %vm3584_vm2, %v3572_v48, %v3587_v1 }
 0x3ac   : > { %v7437_v49 = vadd.s32 4294967294, %v1970_v26  ;;  %v10778_v4 = vmul.u32.u64.low %v3598_v2, %v3597_v63  ;;  %v10779_v41 = vmul.u32.u64.high %v3598_v2, %v3597_v63, %v10778_v4  ;;  %v1988_v55 = vsub.s32 4, %v10740_v31 }
 0x3ad   : > { %v10782_v54 = vmul.u32.u64.low %v3598_v2, %v3593_v37  ;;  %v10783_v43 = vmul.u32.u64.high %v3598_v2, %v3593_v37, %v10782_v54  ;;  %v1803_v22 = vshrl.u32 %v1802_v34, 23  ;;  %vm3335_vm7 = vcmp.lt.s32.totalorder %v10756_v36, 2 }
 0x3ae   : > { %vm3336_vm8 = vcmp.eq.s32.totalorder %v10756_v36, 0  ;;  %vm3339_vm9 = vcmp.eq.s32.totalorder %v10756_v36, 2  ;;  %vm6690_vm11 = vcmp.lt.s32.totalorder %v10761_v28, 2  ;;  %vm7438_vm12 = vcmp.lt.s32.totalorder %v7437_v49, 0 }
 0x3af   : > { %vm3333_vm13 = vweird.f32 %v10497_v47  ;;  %vm6691_vm14 = vcmp.eq.s32.totalorder %v10761_v28, 0  ;;  %v1973_v25 = vsel %vm7438_vm12, 0, %v7437_v49  ;;  %v3589_v3 = vsel %vm3583_vm5, %v3586_v0, %v3588_v32 }
 0x3b0   : > { %v7431_v61 = vadd.s32 4294967169, %v1803_v22  ;;  %v1958_v46 = vadd.s32 %v10684_v9, %v10693_v29  ;;  %v1974_v59 = vsub.s32 32, %v1973_v25  ;;  %v1978_v60 = vsub.s32 4294967266, %v1973_v25 }
 0x3b1   : > { %v1799_v35 = vand.u32 2147483647, %v10765_v24  ;;  %v1989_v8 = vsel %vm1904_vm6, %v1988_v55, %v10740_v31  ;;  %vm3607_vm15 = vc.u32 %v10779_v41, %v10782_v54  ;;  %v3608_v52 = vadd.s32 1, %v10783_v43 }
 0x3b2   : > { %v1809_v51 = vadd.s32 1, %v7431_v61  ;;  %v1975_v10 = vshll.u32 %v10754_v18, %v1973_v25  ;;  %v1976_v27 = vshrl.u32 %v1958_v46, %v1974_v59  ;;  %v1979_v39 = vadd.s32 127, %v1978_v60 }
 0x3b3   : > { %v3605_v9 = vmul.u32 %v3598_v2, %v3589_v3  ;;  %vm6694_vm0 = vcmp.eq.s32.totalorder %v10761_v28, 2  ;;  %v3609_v11 = vsel %vm3607_vm15, %v3608_v52, %v10783_v43  ;;  %v1991_v18 = vsel %vm10774_vm4, 0, %v1989_v8 }
 0x3b4   : > { %v8075_v58 = vpop.eup %8074  ;;  %vm1810_vm1 = vcmp.gt.s32.totalorder %v1809_v51, 0  ;;  %v1977_v16 = vor.u32 %v1976_v27, %v1975_v10  ;;  %v1980_v15 = vshll.u32 %v1979_v39, 23  ;;  %v1806_v62 = vand.u32 8388607, %v1799_v35 }
 0x3b5   : > { %v8077_v29 = vpop.eup %8076  ;;  %v3340_v48 = vxor.u32 2147483648, %v8075_v58  ;;  %v3610_v42 = vadd.s32 %v3609_v11, %v3605_v9  ;;  %v1811_v6 = vsel %vm1810_vm1, %v1809_v51, 0  ;;  %v3450_v36 = vand.u32 2139095040, %v10815_v45 }
 0x3b6   : > { %v3337_v31 = vxor.u32 2147483648, %v8077_v29  ;;  %v1981_v56 = vor.u32 4788187, %v1980_v15  ;;  %v1984_v1 = vcvt.s32.f32 %v1977_v16  ;;  %v1813_v63 = vand.u32 31, %v1811_v6 }
 0x3b7   : > { %v3341_v20 = vsel %vm3339_vm9, %v3340_v48, %v8077_v29  ;;  %v6696_v33 = vsel %vm6694_vm0, %v3340_v48, %v8077_v29  ;;  %v3611_v50 = vadd.s32 536870912, %v3610_v42  ;;  %v5336_v28 = vadd.s32 3, %v1991_v18 }
 0x3b8   : > { %v3338_v7 = vsel %vm3336_vm8, %v8075_v58, %v3337_v31  ;;  %v6693_v12 = vsel %vm6691_vm14, %v8075_v58, %v3337_v31  ;;  %v1982_v37 = vand.u32 2147483647, %v1981_v56  ;;  %v1814_v34 = vsub.s32 32, %v1813_v63 }
 0x3b9   : > { %v3342_v53 = vsel %vm3335_vm7, %v3338_v7, %v3341_v20  ;;  %v6697_v14 = vsel %vm6690_vm11, %v6693_v12, %v6696_v33  ;;  %v10827_v2 = vshrl.u32 %v3611_v50, 30  ;;  %v1807_v4 = vor.u32 8388608, %v1806_v62 }
 0x3ba   : > { %v3343_v5 = vsel %vm3333_vm13, nan, %v3342_v53  ;;  %v6698_v26 = vsel %vm3333_vm13, nan, %v6697_v14  ;;  %v1985_v0 = vmul.f32 %v1984_v1, %v1982_v37  ;;  %v1817_v55 = vshrl.u32 %v8173_v17, %v1814_v34 }
 0x3bb   : > { %3885 = vst [vmem:[%s8731_s22 + $0x1a0] sm:$0xff] %v3343_v5  ;;  %7245 = vst [vmem:[%s8731_s22 + $0x1a8] sm:$0xff] %v6698_v26  ;;  %v3613_v49 = vshll.u32 %v10827_v2, 30  ;;  %v1820_v47 = vshrl.u32 %v8174_v19, %v1814_v34  ;;  %v1823_v22 = vshrl.u32 %v8175_v21, %v1814_v34  ;;  %v1826_v25 = vshrl.u32 %v8176_v23, %v1814_v34 }
 0x3bc   : > { %v1986_v32 = vxor.u32 2147483648, %v1985_v0  ;;  %v3451_v3 = vshrl.u32 %v3450_v36, 23  ;;  %v1816_v46 = vshll.u32 %v8172_v13, %v1813_v63  ;;  %v1819_v59 = vshll.u32 %v8173_v17, %v1813_v63 }
 0x3bd   : > { %v10833_v43 = vsub.s32 %v3610_v42, %v3613_v49  ;;  %v1822_v60 = vshll.u32 %v8174_v19, %v1813_v63  ;;  %v1812_v51 = vshrl.u32 %v1811_v6, 5  ;;  %v1825_v58 = vshll.u32 %v8175_v21, %v1813_v63 }
 0x3be   : > { %v1987_v61 = vsel %vm1904_vm6, %v1986_v32, %v1985_v0  ;;  %v1818_v10 = vor.u32 %v1817_v55, %v1816_v46  ;;  %v1821_v27 = vor.u32 %v1820_v47, %v1819_v59  ;;  %v10847_v9 = vand.u32 3, %v1991_v18 }
 0x3bf   : > { %v1990_v8 = vsel %vm10774_vm4, %v10564_v57, %v1987_v61  ;;  %v3616_v52 = vsub.s32 0, %v10833_v43  ;;  %v1824_v39 = vor.u32 %v1823_v22, %v1822_v60  ;;  %v1827_v48 = vor.u32 %v1826_v25, %v1825_v58 }
 0x3c0   : > { %8078 = vcosq.f32 %v1990_v8  ;;  %v10850_v11 = vand.u32 3, %v5336_v28  ;;  %v1828_v40 = vshll.u32 %v8176_v23, %v1813_v63  ;;  %v1829_v31 = vshrl.u32 %v8177_v30, %v1814_v34 }
 0x3c1   : > { %8080 = vsinq.f32 %v1990_v8  ;;  %v7500_v29 = vmin.u32 %v3616_v52, %v10833_v43  ;;  %v1847_v16 = vshll.u32 %v1807_v4, 8  ;;  %vm1831_vm10 = vcmp.lt.s32.totalorder %v1812_v51, 1 }
 0x3c2   : > { %vm1834_vm3 = vcmp.lt.s32.totalorder %v1812_v51, 4  ;;  %v7495_v42 = vadd.s32 4294967169, %v3451_v3  ;;  %v1815_v20 = vshrl.u32 %v8172_v13, %v1814_v34  ;;  %v1830_v33 = vor.u32 %v1829_v31, %v1828_v40 }
 0x3c3   : > { %v3618_v15 = vclz %v7500_v29  ;;  %v1836_v6 = vsel %vm1834_vm3, %v1824_v39, 2102212464  ;;  %v1839_v18 = vsel %vm1831_vm10, %v1818_v10, %v1821_v27  ;;  %vm1833_vm2 = vcmp.lt.s32.totalorder %v1812_v51, 3 }
 0x3c4   : > { %v1840_v12 = vsel %vm1834_vm3, %v1827_v48, 920167782  ;;  %v1843_v56 = vsel %vm1831_vm10, %v1821_v27, %v1824_v39  ;;  %vm3552_vm5 = vcmp.lt.s32.totalorder %v10640_v38, 0  ;;  %vm1832_vm6 = vcmp.lt.s32.totalorder %v1812_v51, 2 }
 0x3c5   : > { %v7501_v7 = vadd.s32 4294967294, %v3618_v15  ;;  %v1835_v62 = vsel %vm1831_vm10, %v1815_v20, %v1818_v10  ;;  %v1841_v53 = vsel %vm1833_vm2, %v1824_v39, %v1840_v12  ;;  %v1844_v14 = vsel %vm1834_vm3, %v1830_v33, 1326507024 }
 0x3c6   : > { %vm2000_vm4 = vcmp.eq.s32.totalorder %v10847_v9, 2  ;;  %v1837_v1 = vsel %vm1833_vm2, %v1821_v27, %v1836_v6  ;;  %v1842_v50 = vsel %vm1832_vm6, %v1839_v18, %v1841_v53  ;;  %v1845_v5 = vsel %vm1833_vm2, %v1827_v48, %v1844_v14  ;;  %v10895_v18 = vpop.f32.mrf.mxu0 }
 0x3c7   : > { %vm7502_vm7 = vcmp.lt.s32.totalorder %v7501_v7, 0  ;;  %vm1997_vm8 = vcmp.eq.s32.totalorder %v10847_v9, 0  ;;  %v1846_v37 = vsel %vm1832_vm6, %v1843_v56, %v1845_v5  ;;  %vm1996_vm9 = vcmp.lt.s32.totalorder %v10847_v9, 2 }
 0x3c8   : > { %v3621_v26 = vsel %vm7502_vm7, 0, %v7501_v7  ;;  %v10860_v63 = vmul.u32.u64.low %v1847_v16, %v1842_v50  ;;  %v10861_v36 = vmul.u32.u64.high %v1847_v16, %v1842_v50, %v10860_v63  ;;  %v3606_v0 = vadd.s32 %v10782_v54, %v10779_v41 }
 0x3c9   : > { %v3622_v34 = vsub.s32 32, %v3621_v26  ;;  %v3626_v28 = vsub.s32 4294967266, %v3621_v26  ;;  %v3457_v49 = vadd.s32 1, %v7495_v42  ;;  %v3636_v32 = vsub.s32 4, %v10827_v2 }
 0x3ca   : > { %v1838_v4 = vsel %vm1832_vm6, %v1835_v62, %v1837_v1  ;;  %v10869_v55 = vmul.u32.u64.low %v1847_v16, %v1846_v37  ;;  %v10870_v47 = vmul.u32.u64.high %v1847_v16, %v1846_v37, %v10869_v55  ;;  %v3623_v22 = vshll.u32 %v10833_v43, %v3621_v26 }
 0x3cb   : > { %v3624_v25 = vshrl.u32 %v3606_v0, %v3622_v34  ;;  %v3627_v3 = vadd.s32 127, %v3626_v28  ;;  %vm3458_vm11 = vcmp.gt.s32.totalorder %v3457_v49, 0  ;;  %vm5338_vm12 = vcmp.lt.s32.totalorder %v10850_v11, 2 }
 0x3cc   : > { %vm5339_vm13 = vcmp.eq.s32.totalorder %v10850_v11, 0  ;;  %v1857_v41 = vadd.s32 1, %v10861_v36  ;;  %v3459_v54 = vsel %vm3458_vm11, %v3457_v49, 0  ;;  %vm5342_vm14 = vcmp.eq.s32.totalorder %v10850_v11, 2 }
 0x3cd   : > { %v8079_v61 = vpop.eup %8078  ;;  %v3625_v46 = vor.u32 %v3624_v25, %v3623_v22  ;;  %v3628_v59 = vshll.u32 %v3627_v3, 23  ;;  %v3461_v60 = vand.u32 31, %v3459_v54  ;;  %v1854_v51 = vmul.u32 %v1847_v16, %v1838_v4 }
 0x3ce   : > { %v8081_v8 = vpop.eup %8080  ;;  %v2001_v52 = vxor.u32 2147483648, %v8079_v61  ;;  %vm1856_vm15 = vc.u32 %v10870_v47, %v10860_v63  ;;  %v3447_v43 = vand.u32 2147483647, %v10815_v45  ;;  %v3637_v27 = vsel %vm3552_vm5, %v3636_v32, %v10827_v2 }
 0x3cf   : > { %v1998_v58 = vxor.u32 2147483648, %v8081_v8  ;;  %v3629_v10 = vor.u32 4788187, %v3628_v59  ;;  %v1858_v39 = vsel %vm1856_vm15, %v1857_v41, %v10861_v36  ;;  %v3462_v31 = vsub.s32 32, %v3461_v60 }
 0x3d0   : > { %v2002_v29 = vsel %vm2000_vm4, %v2001_v52, %v8081_v8  ;;  %v5344_v48 = vsel %vm5342_vm14, %v2001_v52, %v8081_v8  ;;  %v1859_v40 = vadd.s32 %v1858_v39, %v1854_v51  ;;  %v3632_v20 = vcvt.s32.f32 %v3625_v46 }
 0x3d1   : > { %v1999_v16 = vsel %vm1997_vm8, %v8079_v61, %v1998_v58  ;;  %v5341_v15 = vsel %vm5339_vm13, %v8079_v61, %v1998_v58  ;;  %v3630_v42 = vand.u32 2147483647, %v3629_v10  ;;  %vm1994_vm0 = vweird.f32 %v10564_v57 }
 0x3d2   : > { %v2003_v2 = vsel %vm1996_vm9, %v1999_v16, %v2002_v29  ;;  %v5345_v33 = vsel %vm5338_vm12, %v5341_v15, %v5344_v48  ;;  %v1860_v6 = vadd.s32 536870912, %v1859_v40  ;;  %vm10899_vm1 = vcmp.le.f32.partialorder %v3550_v44, 0.7853982 }
 0x3d3   : > { %v2004_v7 = vsel %vm1994_vm0, nan, %v2003_v2  ;;  %v5346_v12 = vsel %vm1994_vm0, nan, %v5345_v33  ;;  %v3633_v62 = vmul.f32 %v3632_v20, %v3630_v42  ;;  %v3639_v57 = vsel %vm10899_vm1, 0, %v3637_v27 }
 0x3d4   : > { %3872 = vst [vmem:[%s8731_s22 + $0xd0] sm:$0xff] %v2004_v7  ;;  %7232 = vst [vmem:[%s8731_s22 + $0xd8] sm:$0xff] %v5346_v12  ;;  %v10907_v9 = vshrl.u32 %v1860_v6, 30  ;;  %v3454_v11 = vand.u32 8388607, %v3447_v43  ;;  %v3465_v53 = vshrl.u32 %v8173_v17, %v3462_v31  ;;  %v3468_v1 = vshrl.u32 %v8174_v19, %v3462_v31 }
 0x3d5   : > { %v3634_v14 = vxor.u32 2147483648, %v3633_v62  ;;  %v3471_v44 = vshrl.u32 %v8175_v21, %v3462_v31  ;;  %v2111_v50 = vand.u32 2139095040, %v10895_v18  ;;  %v10916_v26 = vshrl.u32 %v3459_v54, 5 }
 0x3d6   : > { %v1862_v5 = vshll.u32 %v10907_v9, 30  ;;  %v3464_v37 = vshll.u32 %v8172_v13, %v3461_v60  ;;  %v3474_v36 = vshrl.u32 %v8176_v23, %v3462_v31  ;;  %v3467_v34 = vshll.u32 %v8173_v17, %v3461_v60 }
 0x3d7   : > { %v3635_v0 = vsel %vm3552_vm5, %v3634_v14, %v3633_v62  ;;  %v3470_v28 = vshll.u32 %v8174_v19, %v3461_v60  ;;  %v3473_v49 = vshll.u32 %v8175_v21, %v3461_v60  ;;  %v3477_v22 = vshrl.u32 %v8177_v30, %v3462_v31 }
 0x3d8   : > { %v3638_v32 = vsel %vm10899_vm1, %v10640_v38, %v3635_v0  ;;  %v10928_v4 = vsub.s32 %v1859_v40, %v1862_v5  ;;  %v3466_v55 = vor.u32 %v3465_v53, %v3464_v37  ;;  %v3469_v25 = vor.u32 %v3468_v1, %v3467_v34 }
 0x3d9   : > { %8082 = vcosq.f32 %v3638_v32  ;;  %v3472_v3 = vor.u32 %v3471_v44, %v3470_v28  ;;  %v3475_v41 = vor.u32 %v3474_v36, %v3473_v49  ;;  %v7000_v54 = vadd.s32 3, %v3639_v57 }
 0x3da   : > { %8084 = vsinq.f32 %v3638_v32  ;;  %v1865_v61 = vsub.s32 0, %v10928_v4  ;;  %v3476_v46 = vshll.u32 %v8176_v23, %v3461_v60  ;;  %v10933_v59 = vand.u32 3, %v3639_v57 }
 0x3db   : > { %v3455_v8 = vor.u32 8388608, %v3454_v11  ;;  %v3463_v52 = vshrl.u32 %v8172_v13, %v3462_v31  ;;  %v2112_v51 = vshrl.u32 %v2111_v50, 23  ;;  %vm3479_vm10 = vcmp.lt.s32.totalorder %v10916_v26, 1 }
 0x3dc   : > { %v7432_v58 = vmin.u32 %v1865_v61, %v10928_v4  ;;  %v3478_v10 = vor.u32 %v3477_v22, %v3476_v46  ;;  %vm3482_vm3 = vcmp.lt.s32.totalorder %v10916_v26, 4  ;;  %vm3481_vm2 = vcmp.lt.s32.totalorder %v10916_v26, 3 }
 0x3dd   : > { %v3484_v27 = vsel %vm3482_vm3, %v3472_v3, 2102212464  ;;  %v3487_v39 = vsel %vm3479_vm10, %v3466_v55, %v3469_v25  ;;  %v3488_v60 = vsel %vm3482_vm3, %v3475_v41, 920167782  ;;  %v7001_v29 = vand.u32 3, %v7000_v54 }
 0x3de   : > { %v1867_v48 = vclz %v7432_v58  ;;  %v3489_v40 = vsel %vm3481_vm2, %v3472_v3, %v3488_v60  ;;  %vm3480_vm5 = vcmp.lt.s32.totalorder %v10916_v26, 2  ;;  %v3483_v31 = vsel %vm3479_vm10, %v3463_v52, %v3466_v55 }
 0x3df   : > { %v3491_v16 = vsel %vm3479_vm10, %v3469_v25, %v3472_v3  ;;  %v3495_v15 = vshll.u32 %v3455_v8, 8  ;;  %vm3648_vm6 = vcmp.eq.s32.totalorder %v10933_v59, 2  ;;  %v3485_v20 = vsel %vm3481_vm2, %v3469_v25, %v3484_v27 }
 0x3e0   : > { %v7433_v42 = vadd.s32 4294967294, %v1867_v48  ;;  %v3490_v2 = vsel %vm3480_vm5, %v3487_v39, %v3489_v40  ;;  %v3492_v33 = vsel %vm3482_vm3, %v3478_v10, 1326507024  ;;  %vm3645_vm4 = vcmp.eq.s32.totalorder %v10933_v59, 0 }
 0x3e1   : > { %vm1801_vm7 = vcmp.lt.s32.totalorder %v10765_v24, 0  ;;  %v3493_v6 = vsel %vm3481_vm2, %v3475_v41, %v3492_v33  ;;  %v10958_v7 = vmul.u32.u64.low %v3495_v15, %v3490_v2  ;;  %v10959_v12 = vmul.u32.u64.high %v3495_v15, %v3490_v2, %v10958_v7 }
 0x3e2   : > { %v7443_v56 = vadd.s32 4294967169, %v2112_v51  ;;  %vm3644_vm8 = vcmp.lt.s32.totalorder %v10933_v59, 2  ;;  %vm7002_vm9 = vcmp.lt.s32.totalorder %v7001_v29, 2  ;;  %vm7003_vm11 = vcmp.eq.s32.totalorder %v7001_v29, 0 }
 0x3e3   : > { %vm7434_vm12 = vcmp.lt.s32.totalorder %v7433_v42, 0  ;;  %v3494_v62 = vsel %vm3480_vm5, %v3491_v16, %v3493_v6  ;;  %vm3642_vm13 = vweird.f32 %v10640_v38  ;;  %v1855_v1 = vadd.s32 %v10860_v63, %v10870_v47 }
 0x3e4   : > { %v1870_v57 = vsel %vm7434_vm12, 0, %v7433_v42  ;;  %v10966_v11 = vmul.u32.u64.low %v3495_v15, %v3494_v62  ;;  %v10967_v53 = vmul.u32.u64.high %v3495_v15, %v3494_v62, %v10966_v11  ;;  %v2118_v14 = vadd.s32 1, %v7443_v56 }
 0x3e5   : > { %v1871_v44 = vsub.s32 32, %v1870_v57  ;;  %v1875_v50 = vsub.s32 4294967266, %v1870_v57  ;;  %v3486_v5 = vsel %vm3480_vm5, %v3483_v31, %v3485_v20  ;;  %vm7006_vm14 = vcmp.eq.s32.totalorder %v7001_v29, 2 }
 0x3e6   : > { %v1885_v37 = vsub.s32 4, %v10907_v9  ;;  %v3505_v36 = vadd.s32 1, %v10959_v12  ;;  %vm2119_vm15 = vcmp.gt.s32.totalorder %v2118_v14, 0  ;;  %v8083_v0 = vpop.eup %8082  ;;  %v1872_v34 = vshll.u32 %v10928_v4, %v1870_v57 }
 0x3e7   : > { %v1873_v28 = vshrl.u32 %v1855_v1, %v1871_v44  ;;  %v1876_v49 = vadd.s32 127, %v1875_v50  ;;  %v2120_v32 = vsel %vm2119_vm15, %v2118_v14, 0  ;;  %v8085_v55 = vpop.eup %8084  ;;  %v3649_v22 = vxor.u32 2147483648, %v8083_v0 }
 0x3e8   : > { %v3502_v63 = vmul.u32 %v3495_v15, %v3486_v5  ;;  %vm3504_vm0 = vc.u32 %v10967_v53, %v10958_v7  ;;  %v2108_v47 = vand.u32 2147483647, %v10895_v18  ;;  %v3646_v26 = vxor.u32 2147483648, %v8085_v55 }
 0x3e9   : > { %v1874_v25 = vor.u32 %v1873_v28, %v1872_v34  ;;  %v1877_v3 = vshll.u32 %v1876_v49, 23  ;;  %v3506_v41 = vsel %vm3504_vm0, %v3505_v36, %v10959_v12  ;;  %v3650_v54 = vsel %vm3648_vm6, %v3649_v22, %v8085_v55 }
 0x3ea   : > { %v7008_v4 = vsel %vm7006_vm14, %v3649_v22, %v8085_v55  ;;  %v3507_v61 = vadd.s32 %v3506_v41, %v3502_v63  ;;  %v2122_v46 = vand.u32 31, %v2120_v32  ;;  %v3647_v8 = vsel %vm3645_vm4, %v8083_v0, %v3646_v26 }
 0x3eb   : > { %v7005_v52 = vsel %vm7003_vm11, %v8083_v0, %v3646_v26  ;;  %v1878_v51 = vor.u32 4788187, %v1877_v3  ;;  %v1886_v58 = vsel %vm1801_vm7, %v1885_v37, %v10907_v9  ;;  %v3651_v10 = vsel %vm3644_vm8, %v3647_v8, %v3650_v54 }
 0x3ec   : > { %v7009_v27 = vsel %vm7002_vm9, %v7005_v52, %v7008_v4  ;;  %v3508_v39 = vadd.s32 536870912, %v3507_v61  ;;  %v2123_v60 = vsub.s32 32, %v2122_v46  ;;  %v3652_v48 = vsel %vm3642_vm13, nan, %v3651_v10 }
 0x3ed   : > { %v7010_v40 = vsel %vm3642_vm13, nan, %v7009_v27  ;;  %v1879_v31 = vand.u32 2147483647, %v1878_v51  ;;  %v1881_v16 = vcvt.s32.f32 %v1874_v25  ;;  %3888 = vst [vmem:[%s8731_s22 + $0x1d0] sm:$0xff] %v3652_v48  ;;  %vm11002_vm1 = vcmp.le.f32.partialorder %v1799_v35, 0.7853982 }
 0x3ee   : > { %7248 = vst [vmem:[%s8731_s22 + $0x1d8] sm:$0xff] %v7010_v40  ;;  %v10998_v15 = vshrl.u32 %v3508_v39, 30  ;;  %v2126_v29 = vshrl.u32 %v8173_v17, %v2123_v60  ;;  %v2129_v42 = vshrl.u32 %v8174_v19, %v2123_v60  ;;  %v1888_v38 = vsel %vm11002_vm1, 0, %v1886_v58  ;;  %v11045_v58 = vpop.f32.mrf.mxu1 }
 0x3ef   : > { %v1882_v59 = vmul.f32 %v1881_v16, %v1879_v31  ;;  %v2115_v2 = vand.u32 8388607, %v2108_v47  ;;  %v2132_v33 = vshrl.u32 %v8175_v21, %v2123_v60  ;;  %v2125_v35 = vshll.u32 %v8172_v13, %v2122_v46 }
 0x3f0   : > { %v3510_v20 = vshll.u32 %v10998_v15, 30  ;;  %v2128_v12 = vshll.u32 %v8173_v17, %v2122_v46  ;;  %v2135_v56 = vshrl.u32 %v8176_v23, %v2123_v60  ;;  %v2121_v57 = vshrl.u32 %v2120_v32, 5 }
 0x3f1   : > { %v1883_v6 = vxor.u32 2147483648, %v1882_v59  ;;  %v2131_v11 = vshll.u32 %v8174_v19, %v2122_v46  ;;  %v2134_v14 = vshll.u32 %v8175_v21, %v2122_v46  ;;  %v2127_v44 = vor.u32 %v2126_v29, %v2125_v35 }
 0x3f2   : > { %v11017_v62 = vsub.s32 %v3507_v61, %v3510_v20  ;;  %v2130_v50 = vor.u32 %v2129_v42, %v2128_v12  ;;  %v2138_v5 = vshrl.u32 %v8177_v30, %v2123_v60  ;;  %v2116_v28 = vor.u32 8388608, %v2115_v2 }
 0x3f3   : > { %v1884_v1 = vsel %vm1801_vm7, %v1883_v6, %v1882_v59  ;;  %v2133_v0 = vor.u32 %v2132_v33, %v2131_v11  ;;  %v2136_v34 = vor.u32 %v2135_v56, %v2134_v14  ;;  %v2137_v49 = vshll.u32 %v8176_v23, %v2122_v46 }
 0x3f4   : > { %v1887_v37 = vsel %vm11002_vm1, %v10765_v24, %v1884_v1  ;;  %v3513_v36 = vsub.s32 0, %v11017_v62  ;;  %v11029_v32 = vand.u32 3, %v1888_v38  ;;  %vm3449_vm10 = vcmp.lt.s32.totalorder %v10815_v45, 0 }
 0x3f5   : > { %8086 = vcosq.f32 %v1887_v37  ;;  %v5232_v22 = vadd.s32 3, %v1888_v38  ;;  %v2139_v63 = vor.u32 %v2138_v5, %v2137_v49  ;;  %vm2140_vm3 = vcmp.lt.s32.totalorder %v2121_v57, 1 }
 0x3f6   : > { %8088 = vsinq.f32 %v1887_v37  ;;  %v7496_v55 = vmin.u32 %v3513_v36, %v11017_v62  ;;  %vm2143_vm2 = vcmp.lt.s32.totalorder %v2121_v57, 4  ;;  %v2148_v3 = vsel %vm2140_vm3, %v2127_v44, %v2130_v50 }
 0x3f7   : > { %v2145_v25 = vsel %vm2143_vm2, %v2133_v0, 2102212464  ;;  %v2149_v41 = vsel %vm2143_vm2, %v2136_v34, 920167782  ;;  %vm11038_vm5 = vcmp.le.f32.partialorder %v3447_v43, 0.7853982  ;;  %v2124_v61 = vshrl.u32 %v8172_v13, %v2123_v60 }
 0x3f8   : > { %v3515_v26 = vclz %v7496_v55  ;;  %v3533_v4 = vsub.s32 4, %v10998_v15  ;;  %vm2142_vm6 = vcmp.lt.s32.totalorder %v2121_v57, 3  ;;  %v2156_v46 = vshll.u32 %v2116_v28, 8 }
 0x3f9   : > { %vm2141_vm4 = vcmp.lt.s32.totalorder %v2121_v57, 2  ;;  %v2150_v52 = vsel %vm2142_vm6, %v2133_v0, %v2149_v41  ;;  %v2152_v51 = vsel %vm2140_vm3, %v2130_v50, %v2133_v0  ;;  %v2144_v10 = vsel %vm2140_vm3, %v2124_v61, %v2127_v44 }
 0x3fa   : > { %v7497_v8 = vadd.s32 4294967294, %v3515_v26  ;;  %v2146_v27 = vsel %vm2142_vm6, %v2130_v50, %v2145_v25  ;;  %v2151_v43 = vsel %vm2141_vm4, %v2148_v3, %v2150_v52  ;;  %v2153_v39 = vsel %vm2143_vm2, %v2139_v63, 1326507024 }
 0x3fb   : > { %vm1897_vm7 = vcmp.eq.s32.totalorder %v11029_v32, 2  ;;  %v2154_v60 = vsel %vm2142_vm6, %v2136_v34, %v2153_v39  ;;  %v11051_v48 = vmul.u32.u64.low %v2156_v46, %v2151_v43  ;;  %v11052_v40 = vmul.u32.u64.high %v2156_v46, %v2151_v43, %v11051_v48 }
 0x3fc   : > { %vm7498_vm8 = vcmp.lt.s32.totalorder %v7497_v8, 0  ;;  %vm1894_vm9 = vcmp.eq.s32.totalorder %v11029_v32, 0  ;;  %v5233_v31 = vand.u32 3, %v5232_v22  ;;  %v2155_v9 = vsel %vm2141_vm4, %v2152_v51, %v2154_v60 }
 0x3fd   : > { %v3518_v16 = vsel %vm7498_vm8, 0, %v7497_v8  ;;  %v3759_v59 = vand.u32 2139095040, %v11045_v58  ;;  %vm1893_vm11 = vcmp.lt.s32.totalorder %v11029_v32, 2  ;;  %v3503_v29 = vadd.s32 %v10958_v7, %v10967_v53 }
 0x3fe   : > { %v3519_v42 = vsub.s32 32, %v3518_v16  ;;  %v3523_v38 = vsub.s32 4294967266, %v3518_v16  ;;  %v3534_v20 = vsel %vm3449_vm10, %v3533_v4, %v10998_v15  ;;  %vm1891_vm12 = vweird.f32 %v10765_v24 }
 0x3ff   : > { %v2147_v2 = vsel %vm2141_vm4, %v2144_v10, %v2146_v27  ;;  %v11066_v33 = vmul.u32.u64.low %v2156_v46, %v2155_v9  ;;  %v11067_v6 = vmul.u32.u64.high %v2156_v46, %v2155_v9, %v11066_v33  ;;  %v3760_v35 = vshrl.u32 %v3759_v59, 23 }
 0x400   : > { %v3520_v12 = vshll.u32 %v11017_v62, %v3518_v16  ;;  %v3521_v56 = vshrl.u32 %v3503_v29, %v3519_v42  ;;  %v3524_v11 = vadd.s32 127, %v3523_v38  ;;  %v2166_v7 = vadd.s32 1, %v11052_v40 }
 0x401   : > { %vm5234_vm13 = vcmp.lt.s32.totalorder %v5233_v31, 2  ;;  %vm5235_vm14 = vcmp.eq.s32.totalorder %v5233_v31, 0  ;;  %vm5238_vm15 = vcmp.eq.s32.totalorder %v5233_v31, 2  ;;  %v7507_v53 = vadd.s32 4294967169, %v3760_v35 }
 0x402   : > { %v8087_v14 = vpop.eup %8086  ;;  %v3522_v15 = vor.u32 %v3521_v56, %v3520_v12  ;;  %v3525_v1 = vshll.u32 %v3524_v11, 23  ;;  %v3536_v57 = vsel %vm11038_vm5, 0, %v3534_v20  ;;  %v3756_v44 = vand.u32 2147483647, %v11045_v58  ;;  %v11112_v11 = vpop.f32.mrf.mxu0 }
 0x403   : > { %v8089_v50 = vpop.eup %8088  ;;  %v1898_v5 = vxor.u32 2147483648, %v8087_v14  ;;  %v2163_v37 = vmul.u32 %v2156_v46, %v2147_v2  ;;  %vm2165_vm0 = vc.u32 %v11067_v6, %v11051_v48  ;;  %v3766_v62 = vadd.s32 1, %v7507_v53 }
 0x404   : > { %v1895_v36 = vxor.u32 2147483648, %v8089_v50  ;;  %v3526_v0 = vor.u32 4788187, %v3525_v1  ;;  %v3529_v34 = vcvt.s32.f32 %v3522_v15  ;;  %v2167_v28 = vsel %vm2165_vm0, %v2166_v7, %v11052_v40 }
 0x405   : > { %v1899_v49 = vsel %vm1897_vm7, %v1898_v5, %v8089_v50  ;;  %v5240_v55 = vsel %vm5238_vm15, %v1898_v5, %v8089_v50  ;;  %v2168_v22 = vadd.s32 %v2167_v28, %v2163_v37  ;;  %vm3767_vm1 = vcmp.gt.s32.totalorder %v3766_v62, 0 }
 0x406   : > { %v1896_v63 = vsel %vm1894_vm9, %v8087_v14, %v1895_v36  ;;  %v5237_v26 = vsel %vm5235_vm14, %v8087_v14, %v1895_v36  ;;  %v3527_v25 = vand.u32 2147483647, %v3526_v0  ;;  %v3768_v3 = vsel %vm3767_vm1, %v3766_v62, 0 }
 0x407   : > { %v1900_v41 = vsel %vm1893_vm11, %v1896_v63, %v1899_v49  ;;  %v5241_v4 = vsel %vm5234_vm13, %v5237_v26, %v5240_v55  ;;  %v2169_v61 = vadd.s32 536870912, %v2168_v22  ;;  %v3763_v46 = vand.u32 8388607, %v3756_v44 }
 0x408   : > { %v1901_v8 = vsel %vm1891_vm12, nan, %v1900_v41  ;;  %v5242_v52 = vsel %vm1891_vm12, nan, %v5241_v4  ;;  %v3530_v51 = vmul.f32 %v3529_v34, %v3527_v25  ;;  %v3770_v10 = vand.u32 31, %v3768_v3 }
 0x409   : > { %3871 = vst [vmem:[%s8731_s22 + $0xc0] sm:$0xff] %v1901_v8  ;;  %7231 = vst [vmem:[%s8731_s22 + $0xc8] sm:$0xff] %v5242_v52  ;;  %v11094_v27 = vshrl.u32 %v2169_v61, 30  ;;  %v6896_v39 = vadd.s32 3, %v3536_v57  ;;  %v3764_v40 = vor.u32 8388608, %v3763_v46  ;;  %v3769_v20 = vshrl.u32 %v3768_v3, 5 }
 0x40a   : > { %v3531_v32 = vxor.u32 2147483648, %v3530_v51  ;;  %v3771_v43 = vsub.s32 32, %v3770_v10  ;;  %v3773_v16 = vshll.u32 %v8172_v13, %v3770_v10  ;;  %v3776_v42 = vshll.u32 %v8173_v17, %v3770_v10 }
 0x40b   : > { %v2171_v60 = vshll.u32 %v11094_v27, 30  ;;  %v3779_v2 = vshll.u32 %v8174_v19, %v3770_v10  ;;  %v3782_v33 = vshll.u32 %v8175_v21, %v3770_v10  ;;  %v3785_v53 = vshll.u32 %v8176_v23, %v3770_v10 }
 0x40c   : > { %v3532_v31 = vsel %vm3449_vm10, %v3531_v32, %v3530_v51  ;;  %v3774_v24 = vshrl.u32 %v8173_v17, %v3771_v43  ;;  %v3777_v9 = vshrl.u32 %v8174_v19, %v3771_v43  ;;  %v3780_v38 = vshrl.u32 %v8175_v21, %v3771_v43 }
 0x40d   : > { %v3535_v59 = vsel %vm11038_vm5, %v10815_v45, %v3532_v31  ;;  %v11105_v29 = vsub.s32 %v2168_v22, %v2171_v60  ;;  %v3783_v7 = vshrl.u32 %v8176_v23, %v3771_v43  ;;  %v3786_v14 = vshrl.u32 %v8177_v30, %v3771_v43 }
 0x40e   : > { %8090 = vcosq.f32 %v3535_v59  ;;  %v3775_v12 = vor.u32 %v3774_v24, %v3773_v16  ;;  %v3778_v56 = vor.u32 %v3777_v9, %v3776_v42  ;;  %v3781_v54 = vor.u32 %v3780_v38, %v3779_v2 }
 0x40f   : > { %8092 = vsinq.f32 %v3535_v59  ;;  %v2174_v35 = vsub.s32 0, %v11105_v29  ;;  %v11117_v15 = vand.u32 3, %v3536_v57  ;;  %v11120_v50 = vand.u32 3, %v6896_v39 }
 0x410   : > { %v3784_v5 = vor.u32 %v3783_v7, %v3782_v33  ;;  %v3787_v37 = vor.u32 %v3786_v14, %v3785_v53  ;;  %v2008_v62 = vand.u32 2139095040, %v11112_v11  ;;  %vm3788_vm10 = vcmp.lt.s32.totalorder %v3769_v20, 1 }
 0x411   : > { %v7444_v1 = vmin.u32 %v2174_v35, %v11105_v29  ;;  %vm3791_vm3 = vcmp.lt.s32.totalorder %v3769_v20, 4  ;;  %v11123_v0 = vshll.u32 %v3764_v40, 8  ;;  %v3772_v34 = vshrl.u32 %v8172_v13, %v3771_v43 }
 0x412   : > { %vm3789_vm2 = vcmp.lt.s32.totalorder %v3769_v20, 2  ;;  %v3793_v28 = vsel %vm3791_vm3, %v3781_v54, 2102212464  ;;  %v3796_v49 = vsel %vm3788_vm10, %v3775_v12, %v3778_v56  ;;  %vm3545_vm5 = vcmp.eq.s32.totalorder %v11117_v15, 2 }
 0x413   : > { %v2176_v36 = vclz %v7444_v1  ;;  %vm3790_vm6 = vcmp.lt.s32.totalorder %v3769_v20, 3  ;;  %v3797_v55 = vsel %vm3791_vm3, %v3784_v5, 920167782  ;;  %v3800_v22 = vsel %vm3788_vm10, %v3778_v56, %v3781_v54 }
 0x414   : > { %vm3542_vm4 = vcmp.eq.s32.totalorder %v11117_v15, 0  ;;  %vm6899_vm7 = vcmp.eq.s32.totalorder %v11120_v50, 0  ;;  %v3792_v63 = vsel %vm3788_vm10, %v3772_v34, %v3775_v12  ;;  %v3798_v26 = vsel %vm3790_vm6, %v3781_v54, %v3797_v55 }
 0x415   : > { %v7445_v57 = vadd.s32 4294967294, %v2176_v36  ;;  %v3801_v25 = vsel %vm3791_vm3, %v3787_v37, 1326507024  ;;  %v2009_v3 = vshrl.u32 %v2008_v62, 23  ;;  %vm3541_vm8 = vcmp.lt.s32.totalorder %v11117_v15, 2 }
 0x416   : > { %vm6898_vm9 = vcmp.lt.s32.totalorder %v11120_v50, 2  ;;  %v3794_v41 = vsel %vm3790_vm6, %v3778_v56, %v3793_v28  ;;  %v3799_v4 = vsel %vm3789_vm2, %v3796_v49, %v3798_v26  ;;  %v3802_v61 = vsel %vm3790_vm6, %v3784_v5, %v3801_v25 }
 0x417   : > { %vm7446_vm11 = vcmp.lt.s32.totalorder %v7445_v57, 0  ;;  %vm3539_vm12 = vweird.f32 %v10815_v45  ;;  %v3803_v8 = vsel %vm3789_vm2, %v3800_v22, %v3802_v61  ;;  %vm2110_vm13 = vcmp.lt.s32.totalorder %v10895_v18, 0 }
 0x418   : > { %v2179_v46 = vsel %vm7446_vm11, 0, %v7445_v57  ;;  %v11135_v52 = vmul.u32.u64.low %v11123_v0, %v3799_v4  ;;  %v11136_v51 = vmul.u32.u64.high %v11123_v0, %v3799_v4, %v11135_v52  ;;  %v2164_v10 = vadd.s32 %v11051_v48, %v11067_v6 }
 0x419   : > { %v2180_v32 = vsub.s32 32, %v2179_v46  ;;  %v2184_v43 = vsub.s32 4294967266, %v2179_v46  ;;  %v7439_v39 = vadd.s32 4294967169, %v2009_v3  ;;  %vm6902_vm14 = vcmp.eq.s32.totalorder %v11120_v50, 2  ;;  %v11177_v50 = vpop.f32.mrf.mxu1 }
 0x41a   : > { %v3795_v60 = vsel %vm3789_vm2, %v3792_v63, %v3794_v41  ;;  %v11145_v40 = vmul.u32.u64.low %v11123_v0, %v3803_v8  ;;  %v11146_v31 = vmul.u32.u64.high %v11123_v0, %v3803_v8, %v11145_v40  ;;  %v2181_v24 = vshll.u32 %v11105_v29, %v2179_v46 }
 0x41b   : > { %v8091_v16 = vpop.eup %8090  ;;  %v2182_v9 = vshrl.u32 %v2164_v10, %v2180_v32  ;;  %v2185_v59 = vadd.s32 127, %v2184_v43  ;;  %v2015_v42 = vadd.s32 1, %v7439_v39  ;;  %v2194_v48 = vsub.s32 4, %v11094_v27 }
 0x41c   : > { %v8093_v38 = vpop.eup %8092  ;;  %v3546_v2 = vxor.u32 2147483648, %v8091_v16  ;;  %v3814_v6 = vadd.s32 1, %v11136_v51  ;;  %v2005_v33 = vand.u32 2147483647, %v11112_v11  ;;  %v3811_v54 = vmul.u32 %v11123_v0, %v3795_v60 }
 0x41d   : > { %v3543_v20 = vxor.u32 2147483648, %v8093_v38  ;;  %v2183_v35 = vor.u32 %v2182_v9, %v2181_v24  ;;  %v2186_v12 = vshll.u32 %v2185_v59, 23  ;;  %vm2016_vm15 = vcmp.gt.s32.totalorder %v2015_v42, 0 }
 0x41e   : > { %v3547_v56 = vsel %vm3545_vm5, %v3546_v2, %v8093_v38  ;;  %v6904_v29 = vsel %vm6902_vm14, %v3546_v2, %v8093_v38  ;;  %vm3813_vm0 = vc.u32 %v11146_v31, %v11135_v52  ;;  %v2017_v36 = vsel %vm2016_vm15, %v2015_v42, 0 }
 0x41f   : > { %v3544_v7 = vsel %vm3542_vm4, %v8091_v16, %v3543_v20  ;;  %v6901_v53 = vsel %vm6899_vm7, %v8091_v16, %v3543_v20  ;;  %v2187_v14 = vor.u32 4788187, %v2186_v12  ;;  %v2190_v1 = vcvt.s32.f32 %v2183_v35 }
 0x420   : > { %v3548_v5 = vsel %vm3541_vm8, %v3544_v7, %v3547_v56  ;;  %v6905_v37 = vsel %vm6898_vm9, %v6901_v53, %v6904_v29  ;;  %v3815_v62 = vsel %vm3813_vm0, %v3814_v6, %v11136_v51  ;;  %v2195_v15 = vsel %vm2110_vm13, %v2194_v48, %v11094_v27 }
 0x421   : > { %v3549_v0 = vsel %vm3539_vm12, nan, %v3548_v5  ;;  %v6906_v34 = vsel %vm3539_vm12, nan, %v6905_v37  ;;  %v2188_v28 = vand.u32 2147483647, %v2187_v14  ;;  %v3816_v49 = vadd.s32 %v3815_v62, %v3811_v54 }
 0x422   : > { %3887 = vst [vmem:[%s8731_s22 + $0x1c0] sm:$0xff] %v3549_v0  ;;  %7247 = vst [vmem:[%s8731_s22 + $0x1c8] sm:$0xff] %v6906_v34  ;;  %v2019_v57 = vand.u32 31, %v2017_v36  ;;  %vm2109_vm1 = vcmp.le.f32.partialorder %v2108_v47, 0.7853982  ;;  %v3656_v41 = vand.u32 2139095040, %v11177_v50  ;;  %vm2200_vm15 = vweird.f32 %v10895_v18 }
 0x423   : > { %v2191_v55 = vmul.f32 %v2190_v1, %v2188_v28  ;;  %v3817_v22 = vadd.s32 536870912, %v3816_v49  ;;  %v2012_v45 = vand.u32 8388607, %v2005_v33  ;;  %v2197_v25 = vsel %vm2109_vm1, 0, %v2195_v15 }
 0x424   : > { %v2020_v63 = vsub.s32 32, %v2019_v57  ;;  %v2022_v27 = vshll.u32 %v8172_v13, %v2019_v57  ;;  %v2025_v51 = vshll.u32 %v8173_v17, %v2019_v57  ;;  %v2018_v43 = vshrl.u32 %v2017_v36, 5 }
 0x425   : > { %v2192_v26 = vxor.u32 2147483648, %v2191_v55  ;;  %v11183_v3 = vshrl.u32 %v3817_v22, 30  ;;  %v2028_v39 = vshll.u32 %v8174_v19, %v2019_v57  ;;  %v2031_v60 = vshll.u32 %v8175_v21, %v2019_v57 }
 0x426   : > { %v2023_v4 = vshrl.u32 %v8173_v17, %v2020_v63  ;;  %v2026_v61 = vshrl.u32 %v8174_v19, %v2020_v63  ;;  %v2029_v46 = vshrl.u32 %v8175_v21, %v2020_v63  ;;  %v2032_v10 = vshrl.u32 %v8176_v23, %v2020_v63 }
 0x427   : > { %v2193_v47 = vsel %vm2110_vm13, %v2192_v26, %v2191_v55  ;;  %v3819_v8 = vshll.u32 %v11183_v3, 30  ;;  %v2035_v42 = vshrl.u32 %v8177_v30, %v2020_v63  ;;  %v5544_v38 = vadd.s32 3, %v2197_v25 }
 0x428   : > { %v2196_v32 = vsel %vm2109_vm1, %v10895_v18, %v2193_v47  ;;  %v2024_v16 = vor.u32 %v2023_v4, %v2022_v27  ;;  %v2027_v24 = vor.u32 %v2026_v61, %v2025_v51  ;;  %v2030_v9 = vor.u32 %v2029_v46, %v2028_v39 }
 0x429   : > { %8094 = vcosq.f32 %v2196_v32  ;;  %v11198_v40 = vsub.s32 %v3816_v49, %v3819_v8  ;;  %v2033_v59 = vor.u32 %v2032_v10, %v2031_v60  ;;  %v2034_v48 = vshll.u32 %v8176_v23, %v2019_v57 }
 0x42a   : > { %8096 = vsinq.f32 %v2196_v32  ;;  %v11203_v6 = vand.u32 3, %v2197_v25  ;;  %v2013_v20 = vor.u32 8388608, %v2012_v45  ;;  %v2021_v35 = vshrl.u32 %v8172_v13, %v2020_v63 }
 0x42b   : > { %v3822_v2 = vsub.s32 0, %v11198_v40  ;;  %v3657_v12 = vshrl.u32 %v3656_v41, 23  ;;  %v2036_v29 = vor.u32 %v2035_v42, %v2034_v48  ;;  %vm2037_vm10 = vcmp.lt.s32.totalorder %v2018_v43, 1 }
 0x42c   : > { %vm2040_vm3 = vcmp.lt.s32.totalorder %v2018_v43, 4  ;;  %vm2039_vm2 = vcmp.lt.s32.totalorder %v2018_v43, 3  ;;  %v2045_v7 = vsel %vm2037_vm10, %v2024_v16, %v2027_v24  ;;  %v5545_v14 = vand.u32 3, %v5544_v38 }
 0x42d   : > { %v7508_v56 = vmin.u32 %v3822_v2, %v11198_v40  ;;  %v2042_v54 = vsel %vm2040_vm3, %v2030_v9, 2102212464  ;;  %v2046_v53 = vsel %vm2040_vm3, %v2033_v59, 920167782  ;;  %vm2206_vm5 = vcmp.eq.s32.totalorder %v11203_v6, 2 }
 0x42e   : > { %v2047_v5 = vsel %vm2039_vm2, %v2030_v9, %v2046_v53  ;;  %vm2038_vm6 = vcmp.lt.s32.totalorder %v2018_v43, 2  ;;  %v2041_v37 = vsel %vm2037_vm10, %v2021_v35, %v2024_v16  ;;  %v2049_v62 = vsel %vm2037_vm10, %v2027_v24, %v2030_v9 }
 0x42f   : > { %v3824_v1 = vclz %v7508_v56  ;;  %v2053_v36 = vshll.u32 %v2013_v20, 8  ;;  %vm2203_vm4 = vcmp.eq.s32.totalorder %v11203_v6, 0  ;;  %v2043_v34 = vsel %vm2039_vm2, %v2027_v24, %v2042_v54 }
 0x430   : > { %v2048_v28 = vsel %vm2038_vm6, %v2045_v7, %v2047_v5  ;;  %v2050_v49 = vsel %vm2040_vm3, %v2036_v29, 1326507024  ;;  %vm2202_vm7 = vcmp.lt.s32.totalorder %v11203_v6, 2  ;;  %v7503_v22 = vadd.s32 4294967169, %v3657_v12 }
 0x431   : > { %v7509_v0 = vadd.s32 4294967294, %v3824_v1  ;;  %v2051_v15 = vsel %vm2039_vm2, %v2033_v59, %v2050_v49  ;;  %v11217_v57 = vmul.u32.u64.low %v2053_v36, %v2048_v28  ;;  %v11218_v55 = vmul.u32.u64.high %v2053_v36, %v2048_v28, %v11217_v57 }
 0x432   : > { %vm5546_vm8 = vcmp.lt.s32.totalorder %v5545_v14, 2  ;;  %vm5547_vm9 = vcmp.eq.s32.totalorder %v5545_v14, 0  ;;  %v2052_v45 = vsel %vm2038_vm6, %v2049_v62, %v2051_v15  ;;  %v3663_v41 = vadd.s32 1, %v7503_v22 }
 0x433   : > { %vm7510_vm11 = vcmp.lt.s32.totalorder %v7509_v0, 0  ;;  %v11222_v26 = vmul.u32.u64.low %v2053_v36, %v2052_v45  ;;  %v11223_v25 = vmul.u32.u64.high %v2053_v36, %v2052_v45, %v11222_v26  ;;  %v3812_v27 = vadd.s32 %v11135_v52, %v11146_v31 }
 0x434   : > { %v3827_v63 = vsel %vm7510_vm11, 0, %v7509_v0  ;;  %v2044_v46 = vsel %vm2038_vm6, %v2041_v37, %v2043_v34  ;;  %vm5550_vm12 = vcmp.eq.s32.totalorder %v5545_v14, 2  ;;  %v2063_v51 = vadd.s32 1, %v11218_v55 }
 0x435   : > { %v3828_v4 = vsub.s32 32, %v3827_v63  ;;  %v3832_v61 = vsub.s32 4294967266, %v3827_v63  ;;  %v3829_v8 = vshll.u32 %v11198_v40, %v3827_v63  ;;  %vm3664_vm13 = vcmp.gt.s32.totalorder %v3663_v41, 0 }
 0x436   : > { %v8095_v47 = vpop.eup %8094  ;;  %v3665_v16 = vsel %vm3664_vm13, %v3663_v41, 0  ;;  %v2060_v9 = vmul.u32 %v2053_v36, %v2044_v46  ;;  %vm2062_vm14 = vc.u32 %v11223_v25, %v11217_v57  ;;  %v3653_v52 = vand.u32 2147483647, %v11177_v50 }
 0x437   : > { %v8097_v10 = vpop.eup %8096  ;;  %v2207_v32 = vxor.u32 2147483648, %v8095_v47  ;;  %v3830_v39 = vshrl.u32 %v3812_v27, %v3828_v4  ;;  %v3833_v60 = vadd.s32 127, %v3832_v61  ;;  %v2064_v2 = vsel %vm2062_vm14, %v2063_v51, %v11218_v55 }
 0x438   : > { %v2204_v24 = vxor.u32 2147483648, %v8097_v10  ;;  %v3667_v48 = vand.u32 31, %v3665_v16  ;;  %v2065_v54 = vadd.s32 %v2064_v2, %v2060_v9  ;;  %vm11247_vm0 = vcmp.le.f32.partialorder %v3756_v44, 0.7853982 }
 0x439   : > { %v2208_v31 = vsel %vm2206_vm5, %v2207_v32, %v8097_v10  ;;  %v5552_v43 = vsel %vm5550_vm12, %v2207_v32, %v8097_v10  ;;  %v3831_v40 = vor.u32 %v3830_v39, %v3829_v8  ;;  %v3834_v59 = vshll.u32 %v3833_v60, 23 }
 0x43a   : > { %v2205_v42 = vsel %vm2203_vm4, %v8095_v47, %v2204_v24  ;;  %v5549_v38 = vsel %vm5547_vm9, %v8095_v47, %v2204_v24  ;;  %v3668_v7 = vsub.s32 32, %v3667_v48  ;;  %vm3758_vm1 = vcmp.lt.s32.totalorder %v11045_v58, 0 }
 0x43b   : > { %v2209_v20 = vsel %vm2202_vm7, %v2205_v42, %v2208_v31  ;;  %v5553_v35 = vsel %vm5546_vm8, %v5549_v38, %v5552_v43  ;;  %v3835_v12 = vor.u32 4788187, %v3834_v59  ;;  %v3838_v6 = vcvt.s32.f32 %v3831_v40 }
 0x43c   : > { %v2210_v56 = vsel %vm2200_vm15, nan, %v2209_v20  ;;  %v5554_v29 = vsel %vm2200_vm15, nan, %v5553_v35  ;;  %v2066_v1 = vadd.s32 536870912, %v2065_v54  ;;  %v3660_v14 = vand.u32 8388607, %v3653_v52 }
 0x43d   : > { %3874 = vst [vmem:[%s8731_s22 + $0xf0] sm:$0xff] %v2210_v56  ;;  %7234 = vst [vmem:[%s8731_s22 + $0xf8] sm:$0xff] %v5554_v29  ;;  %v3836_v18 = vand.u32 2147483647, %v3835_v12  ;;  %v3671_v5 = vshrl.u32 %v8173_v17, %v3668_v7  ;;  %v3674_v37 = vshrl.u32 %v8174_v19, %v3668_v7  ;;  %v3842_v36 = vsub.s32 4, %v11183_v3 }
 0x43e   : > { %v3677_v44 = vshrl.u32 %v8175_v21, %v3668_v7  ;;  %v3680_v0 = vshrl.u32 %v8176_v23, %v3668_v7  ;;  %v11259_v34 = vshrl.u32 %v2066_v1, 30  ;;  %v3670_v28 = vshll.u32 %v8172_v13, %v3667_v48 }
 0x43f   : > { %v3839_v62 = vmul.f32 %v3838_v6, %v3836_v18  ;;  %v3673_v49 = vshll.u32 %v8173_v17, %v3667_v48  ;;  %v3676_v15 = vshll.u32 %v8174_v19, %v3667_v48  ;;  %v3679_v22 = vshll.u32 %v8175_v21, %v3667_v48 }
 0x440   : > { %v3682_v45 = vshll.u32 %v8176_v23, %v3667_v48  ;;  %v3683_v63 = vshrl.u32 %v8177_v30, %v3668_v7  ;;  %v2068_v26 = vshll.u32 %v11259_v34, 30  ;;  %v3666_v41 = vshrl.u32 %v3665_v16, 5 }
 0x441   : > { %v3840_v55 = vxor.u32 2147483648, %v3839_v62  ;;  %v3672_v27 = vor.u32 %v3671_v5, %v3670_v28  ;;  %v3675_v4 = vor.u32 %v3674_v37, %v3673_v49  ;;  %v3678_v46 = vor.u32 %v3677_v44, %v3676_v15 }
 0x442   : > { %v3681_v47 = vor.u32 %v3680_v0, %v3679_v22  ;;  %v3684_v17 = vor.u32 %v3683_v63, %v3682_v45  ;;  %v2069_v21 = vsub.s32 %v2065_v54, %v2068_v26  ;;  %v3843_v23 = vsel %vm3758_vm1, %v3842_v36, %v11183_v3 }
 0x443   : > { %v3841_v61 = vsel %vm3758_vm1, %v3840_v55, %v3839_v62  ;;  %v3661_v30 = vor.u32 8388608, %v3660_v14  ;;  %vm3685_vm10 = vcmp.lt.s32.totalorder %v3666_v41, 1  ;;  %vm3688_vm3 = vcmp.lt.s32.totalorder %v3666_v41, 4 }
 0x444   : > { %v3844_v19 = vsel %vm11247_vm0, %v11045_v58, %v3841_v61  ;;  %v2071_v8 = vsub.s32 0, %v2069_v21  ;;  %v3693_v51 = vsel %vm3685_vm10, %v3672_v27, %v3675_v4  ;;  %v3694_v10 = vsel %vm3688_vm3, %v3681_v47, 920167782 }
 0x445   : > { %8098 = vcosq.f32 %v3844_v19  ;;  %v3697_v32 = vsel %vm3685_vm10, %v3675_v4, %v3678_v46  ;;  %v3698_v39 = vsel %vm3688_vm3, %v3684_v17, 1326507024  ;;  %v3845_v60 = vsel %vm11247_vm0, 0, %v3843_v23 }
 0x446   : > { %8100 = vsinq.f32 %v3844_v19  ;;  %v7440_v16 = vmin.u32 %v2071_v8, %v2069_v21  ;;  %v3669_v24 = vshrl.u32 %v8172_v13, %v3668_v7  ;;  %vm3687_vm2 = vcmp.lt.s32.totalorder %v3666_v41, 3 }
 0x447   : > { %vm3686_vm5 = vcmp.lt.s32.totalorder %v3666_v41, 2  ;;  %v3690_v3 = vsel %vm3688_vm3, %v3678_v46, 2102212464  ;;  %v3695_v9 = vsel %vm3687_vm2, %v3678_v46, %v3694_v10  ;;  %v3699_v31 = vsel %vm3687_vm2, %v3681_v47, %v3698_v39 }
 0x448   : > { %v2073_v43 = vclz %v7440_v16  ;;  %v3696_v40 = vsel %vm3686_vm5, %v3693_v51, %v3695_v9  ;;  %v3700_v59 = vsel %vm3686_vm5, %v3697_v32, %v3699_v31  ;;  %v3701_v42 = vshll.u32 %v3661_v30, 8 }
 0x449   : > { %v7208_v38 = vadd.s32 3, %v3845_v60  ;;  %v3689_v2 = vsel %vm3685_vm10, %v3669_v24, %v3672_v27  ;;  %v3691_v20 = vsel %vm3687_vm2, %v3675_v4, %v3690_v3  ;;  %v3849_v13 = vand.u32 3, %v3845_v60 }
 0x44a   : > { %v7441_v48 = vadd.s32 4294967294, %v2073_v43  ;;  %v11284_v35 = vmul.u32.u64.low %v3701_v42, %v3700_v59  ;;  %v11285_v12 = vmul.u32.u64.high %v3701_v42, %v3700_v59, %v11284_v35  ;;  %v3692_v53 = vsel %vm3686_vm5, %v3689_v2, %v3691_v20 }
 0x44b   : > { %v11287_v56 = vmul.u32.u64.low %v3701_v42, %v3696_v40  ;;  %v11288_v29 = vmul.u32.u64.high %v3701_v42, %v3696_v40, %v11287_v56  ;;  %v7209_v54 = vand.u32 3, %v7208_v38  ;;  %v2061_v18 = vadd.s32 %v11217_v57, %v11223_v25 }
 0x44c   : > { %vm7442_vm6 = vcmp.lt.s32.totalorder %v7441_v48, 0  ;;  %vm3850_vm4 = vcmp.lt.s32.totalorder %v3849_v13, 2  ;;  %v3708_v44 = vmul.u32 %v3701_v42, %v3692_v53  ;;  %vm3854_vm8 = vcmp.eq.s32.totalorder %v3849_v13, 2 }
 0x44d   : > { %v2076_v7 = vsel %vm7442_vm6, 0, %v7441_v48  ;;  %vm3710_vm7 = vc.u32 %v11285_v12, %v11287_v56  ;;  %v3711_v14 = vadd.s32 1, %v11288_v29  ;;  %vm7214_vm9 = vcmp.eq.s32.totalorder %v7209_v54, 2 }
 0x44e   : > { %v2077_v6 = vsub.s32 32, %v2076_v7  ;;  %v2081_v1 = vsub.s32 4294967266, %v2076_v7  ;;  %v2078_v37 = vshll.u32 %v2069_v21, %v2076_v7  ;;  %vm3851_vm11 = vcmp.eq.s32.totalorder %v3849_v13, 0 }
 0x44f   : > { %v3712_v49 = vsel %vm3710_vm7, %v3711_v14, %v11288_v29  ;;  %vm7211_vm12 = vcmp.eq.s32.totalorder %v7209_v54, 0  ;;  %vm7210_vm13 = vcmp.lt.s32.totalorder %v7209_v54, 2  ;;  %vm3848_vm14 = vweird.f32 %v11045_v58 }
 0x450   : > { %v2079_v62 = vshrl.u32 %v2061_v18, %v2077_v6  ;;  %v2082_v36 = vadd.s32 127, %v2081_v1  ;;  %v3713_v55 = vadd.s32 %v3712_v49, %v3708_v44  ;;  %vm2007_vm15 = vcmp.lt.s32.totalorder %v11112_v11, 0 }
 0x451   : > { %v2091_v58 = vsub.s32 4, %v11259_v34  ;;  %vm2006_vm0 = vcmp.le.f32.partialorder %v2005_v33, 0.7853982  ;;  %v3709_v40 = vadd.s32 %v11287_v56, %v11285_v12  ;;  %vm2097_vm7 = vweird.f32 %v11112_v11 }
 0x452   : > { %v8099_v5 = vpop.eup %8098  ;;  %v2080_v25 = vor.u32 %v2079_v62, %v2078_v37  ;;  %v2083_v15 = vshll.u32 %v2082_v36, 23  ;;  %v3714_v61 = vadd.s32 536870912, %v3713_v55 }
 0x453   : > { %v8101_v0 = vpop.eup %8100  ;;  %v3855_v28 = vxor.u32 2147483648, %v8099_v5  ;;  %v2092_v60 = vsel %vm2007_vm15, %v2091_v58, %v11259_v34 }
 0x454   : > { %v3852_v57 = vxor.u32 2147483648, %v8101_v0  ;;  %v2084_v41 = vor.u32 4788187, %v2083_v15  ;;  %v2087_v19 = vcvt.s32.f32 %v2080_v25  ;;  %v11302_v21 = vshrl.u32 %v3714_v61, 30 }
 0x455   : > { %v3856_v22 = vsel %vm3854_vm8, %v3855_v28, %v8101_v0  ;;  %v7216_v45 = vsel %vm7214_vm9, %v3855_v28, %v8101_v0  ;;  %v2094_v3 = vsel %vm2006_vm0, 0, %v2092_v60  ;;  %vm3655_vm8 = vcmp.lt.s32.totalorder %v11177_v50, 0 }
 0x456   : > { %v3853_v63 = vsel %vm3851_vm11, %v8099_v5, %v3852_v57  ;;  %v7213_v26 = vsel %vm7211_vm12, %v8099_v5, %v3852_v57  ;;  %v2085_v17 = vand.u32 2147483647, %v2084_v41  ;;  %v3716_v30 = vshll.u32 %v11302_v21, 30 }
 0x457   : > { %v3857_v27 = vsel %vm3850_vm4, %v3853_v63, %v3856_v22  ;;  %v7217_v4 = vsel %vm7210_vm13, %v7213_v26, %v7216_v45  ;;  %v5440_v31 = vadd.s32 3, %v2094_v3  ;;  %v2098_v42 = vand.u32 3, %v2094_v3 }
 0x458   : > { %v3858_v46 = vsel %vm3848_vm14, nan, %v3857_v27  ;;  %v7218_v47 = vsel %vm3848_vm14, nan, %v7217_v4  ;;  %v2088_v23 = vmul.f32 %v2087_v19, %v2085_v17  ;;  %v3717_v51 = vsub.s32 %v3713_v55, %v3716_v30 }
 0x459   : > { %3890 = vst [vmem:[%s8731_s22 + $0x1f0] sm:$0xff] %v3858_v46  ;;  %7250 = vst [vmem:[%s8731_s22 + $0x1f8] sm:$0xff] %v7218_v47  ;;  %v5441_v38 = vand.u32 3, %v5440_v31  ;;  %vm2099_vm10 = vcmp.lt.s32.totalorder %v2098_v42, 2  ;;  %vm2100_vm3 = vcmp.eq.s32.totalorder %v2098_v42, 0  ;;  %vm2103_vm2 = vcmp.eq.s32.totalorder %v2098_v42, 2 }
 0x45a   : > { %v2089_v8 = vxor.u32 2147483648, %v2088_v23  ;;  %v3719_v39 = vsub.s32 0, %v3717_v51  ;;  %v3739_v28 = vsub.s32 4, %v11302_v21  ;;  %vm3654_vm9 = vcmp.le.f32.partialorder %v3653_v52, 0.7853982 }
 0x45b   : > { %vm5446_vm5 = vcmp.eq.s32.totalorder %v5441_v38, 2  ;;  %vm5442_vm6 = vcmp.lt.s32.totalorder %v5441_v38, 2  ;;  %vm5443_vm4 = vcmp.eq.s32.totalorder %v5441_v38, 0 }
 0x45c   : > { %v2090_v10 = vsel %vm2007_vm15, %v2089_v8, %v2088_v23  ;;  %v7504_v16 = vmin.u32 %v3719_v39, %v3717_v51  ;;  %v3740_v57 = vsel %vm3655_vm8, %v3739_v28, %v11302_v21 }
 0x45d   : > { %v2093_v32 = vsel %vm2006_vm0, %v11112_v11, %v2090_v10  ;;  %v3742_v25 = vsel %vm3654_vm9, 0, %v3740_v57 }
 0x45e   : > { %8102 = vcosq.f32 %v2093_v32  ;;  %v3721_v24 = vclz %v7504_v16  ;;  %v7104_v15 = vadd.s32 3, %v3742_v25  ;;  %v3746_v55 = vand.u32 3, %v3742_v25 }
 0x45f   : > { %8104 = vsinq.f32 %v2093_v32 }
 0x460   : > { %v7505_v9 = vadd.s32 4294967294, %v3721_v24  ;;  %v7105_v22 = vand.u32 3, %v7104_v15  ;;  %vm3751_vm11 = vcmp.eq.s32.totalorder %v3746_v55, 2  ;;  %vm3748_vm13 = vcmp.eq.s32.totalorder %v3746_v55, 0 }
 0x461   : > { %vm3747_vm15 = vcmp.lt.s32.totalorder %v3746_v55, 2 }
 0x462   : > { %vm7506_vm1 = vcmp.lt.s32.totalorder %v7505_v9, 0  ;;  %vm7110_vm12 = vcmp.eq.s32.totalorder %v7105_v22, 2  ;;  %vm7107_vm14 = vcmp.eq.s32.totalorder %v7105_v22, 0  ;;  %vm7106_vm0 = vcmp.lt.s32.totalorder %v7105_v22, 2 }
 0x463   : > { %v3724_v43 = vsel %vm7506_vm1, 0, %v7505_v9  ;;  %vm3745_vm1 = vweird.f32 %v11177_v50 }
 0x464   : > { %v3725_v59 = vsub.s32 32, %v3724_v43  ;;  %v3729_v33 = vsub.s32 4294967266, %v3724_v43  ;;  %v3726_v2 = vshll.u32 %v3717_v51, %v3724_v43 }
 0x466   : > { %v3727_v48 = vshrl.u32 %v3709_v40, %v3725_v59  ;;  %v3730_v20 = vadd.s32 127, %v3729_v33 }
 0x468   : > { %v3728_v34 = vor.u32 %v3727_v48, %v3726_v2  ;;  %v3731_v13 = vshll.u32 %v3730_v20, 23 }
 0x46a   : > { %v3732_v53 = vor.u32 4788187, %v3731_v13  ;;  %v3735_v14 = vcvt.s32.f32 %v3728_v34 }
 0x46b   : > { %v8103_v35 = vpop.eup %8102 }
 0x46c   : > { %v8105_v29 = vpop.eup %8104  ;;  %v2104_v54 = vxor.u32 2147483648, %v8103_v35  ;;  %v3733_v1 = vand.u32 2147483647, %v3732_v53 }
 0x46d   : > { %v2101_v7 = vxor.u32 2147483648, %v8105_v29 }
 0x46e   : > { %v2105_v12 = vsel %vm2103_vm2, %v2104_v54, %v8105_v29  ;;  %v5448_v56 = vsel %vm5446_vm5, %v2104_v54, %v8105_v29  ;;  %v3736_v44 = vmul.f32 %v3735_v14, %v3733_v1 }
 0x46f   : > { %v2102_v18 = vsel %vm2100_vm3, %v8103_v35, %v2101_v7  ;;  %v5445_v6 = vsel %vm5443_vm4, %v8103_v35, %v2101_v7 }
 0x470   : > { %v2106_v5 = vsel %vm2099_vm10, %v2102_v18, %v2105_v12  ;;  %v5449_v37 = vsel %vm5442_vm6, %v5445_v6, %v5448_v56  ;;  %v3737_v0 = vxor.u32 2147483648, %v3736_v44 }
 0x471   : > { %v2107_v62 = vsel %vm2097_vm7, nan, %v2106_v5  ;;  %v5450_v36 = vsel %vm2097_vm7, nan, %v5449_v37 }
 0x472   : > { %3873 = vst [vmem:[%s8731_s22 + $0xe0] sm:$0xff] %v2107_v62  ;;  %7233 = vst [vmem:[%s8731_s22 + $0xe8] sm:$0xff] %v5450_v36  ;;  %v3738_v49 = vsel %vm3655_vm8, %v3737_v0, %v3736_v44 }
 0x473   : > { %v3741_v11 = vsel %vm3654_vm9, %v11177_v50, %v3738_v49 }
 0x474   : > { %8106 = vcosq.f32 %v3741_v11 }
 0x475   : > { %8108 = vsinq.f32 %v3741_v11 }
 0x481   : > { %v8107_v45 = vpop.eup %8106 }
 0x482   : > { %v8109_v63 = vpop.eup %8108  ;;  %v3752_v26 = vxor.u32 2147483648, %v8107_v45 }
 0x483   : > { %v3749_v41 = vxor.u32 2147483648, %v8109_v63 }
 0x484   : > { %v3753_v52 = vsel %vm3751_vm11, %v3752_v26, %v8109_v63  ;;  %v7112_v27 = vsel %vm7110_vm12, %v3752_v26, %v8109_v63 }
 0x485   : > { %v3750_v4 = vsel %vm3748_vm13, %v8107_v45, %v3749_v41  ;;  %v7109_v61 = vsel %vm7107_vm14, %v8107_v45, %v3749_v41 }
 0x486   : > { %v3754_v46 = vsel %vm3747_vm15, %v3750_v4, %v3753_v52  ;;  %v7113_v47 = vsel %vm7106_vm0, %v7109_v61, %v7112_v27 }
 0x487   : > { %v3755_v17 = vsel %vm3745_vm1, nan, %v3754_v46  ;;  %v7114_v19 = vsel %vm3745_vm1, nan, %v7113_v47 }
 0x488   : > { %3889 = vst [vmem:[%s8731_s22 + $0x1e0] sm:$0xff] %v3755_v17  ;;  %7249 = vst [vmem:[%s8731_s22 + $0x1e8] sm:$0xff] %v7114_v19 }
 0x489   : > { %8123 = shalt.err (!%p8120_p3)
}
 0x48a   : > { %s8124_s5 = scalar_lea.hbm %s11328_s13, 8192  ;;  %s8128_s8 = scalar_lea.hbm %s11379_s2, 32768 }
 0x48b   : > { %p8125_p4 = scmp.ne.s32.totalorder %s11328_s13, %s8124_s5  ;;  %p8129_p9 = scmp.lt.s32.totalorder %s11328_s13, %s11379_s2 }
 0x48c   : > { %p8130_p10 = scmp.lt.s32.totalorder %s8128_s8, %s8124_s5 }
 0x48d   : > { %p8126_p7 = pnand %p8125_p4, %p8234_p5 }
 0x48e   : > { %p8131_p11 = por %p8130_p10, %p8129_p9 }
 0x48f   : > { %p8127_p8 = pneg %p8126_p7 }
 0x491   : > { %p8132_p12 = pnand %p8131_p11, %p8127_p8 }
 0x493   : > { %8135 = shalt.err (!%p8132_p12)
}
 0x494   : > { %s8179_s17 = smov 256   ;;  %s8180_s3 = smov 16  }
 0x495   : > { %7935 = dma.vmem_to_hbm [thread:$0]  (%p8234_p5), %s11330_s24, 8192, %s11328_s13, %s11337_s27, %s8179_s17, %s8179_s17, %s8180_s3  }
 0x496 PF: > { %p7941_p13 = scmp.ge.s32.totalorder %s8170_s12, 2  ;;  %s7281_s21 = sand.u32 1, %s8158_s9  }
 0x497   : > { %s7282_s22 = scalar_lea.sflag [#allocation3], %s7281_s21 }
 0x498   : > { %p7938_p0 = pnand %p7941_p13, %p8238_p6 }
 0x49a   : > { %p7939_p1 = pneg %p7938_p0 }
 0x49c   : > { %8153 = dma.done.wait (%p7939_p1), %s7282_s22, 8192  }
 0x49d   : > { %8155 = vsyncadd (%p7939_p1), %s7282_s22, 4294959104  ;;  %p12_p2 = scmp.ge.s32.totalorder %s8221_s15, 6   ;;  %s11440_s9 = smov %s8162_s10 }
 0x49e   : > { %s11441_s10 = smov %s8166_s11  ;;  %s11442_s11 = smov %s8232_s18 }
 0x49f   : > { %s11443_s12 = smov %s8221_s15  ;;  %14 = sbr.rel (!%p12_p2) target bundleno = 3 (0x3), region = 63 }
 0x4a4   :  { %7287 = vsyncpa [#allocation3], 1 }
 0x4a5   :  { %7289 = vsyncpa [#allocation3 + $0x1], 1 }

</bundles_post_ra>
